<compile_context>
chip_gen: v6e
topology: v6e:2x2x1
jax: 0.10.0
libtpu: 0.0.40
codegen_flags: <defaults>
</compile_context>

<pallas_src>
import functools

import jax
import jax.numpy as jnp
from jax.experimental import pallas as pl
from jax.experimental.pallas import tpu as pltpu


def _round_up(x, m):
    return ((x + m - 1) // m) * m


def _cdiv(a, b):
    return (a + b - 1) // b


def _pad_to(x, shape):
    pads = [(0, t - s) for s, t in zip(x.shape, shape)]
    if all(p == (0, 0) for p in pads):
        return x
    return jnp.pad(x, pads)


def _vmem_budget_bytes():
    """Generation-aware VMEM budget shared by the tile heuristic and
    vmem_limit_bytes.  ~25% headroom is left for Mosaic internal scratch and
    semaphores (critical on v7x's 64 MiB per-TensorCore VMEM)."""
    try:
        cap = int(pltpu.get_tpu_info().vmem_capacity_bytes)
    except Exception:
        cap = 64 * 1024 * 1024          # conservative fallback == v7x per-TC VMEM
    return min((cap * 3) // 4, 100 * 1024 * 1024)


def _pick_batch_tile(batch, sp, dp, vmem_budget_bytes):
    # Per batch-row VMEM footprint (bytes):
    #   context tile, bf16, double buffered       : 2 * sp*dp*2
    #   src / tanh f32 temporaries                 : 2 * sp*dp*4
    #   input tile, bf16, double buffered          : 2 * dp*2
    #   outputs (h, wctx, attn f32), double bufs   : 2 * (2*dp*4 + sp*4)
    per_row = 12 * sp * dp + 4 * dp + 16 * dp + 8 * sp
    # Fixed: four (dp,dp) bf16 weight blocks (the pipeline still allocates two
    # buffers for them even though their index_map is constant) + b_c / w_v.
    fixed = 16 * dp * dp + 8 * dp
    tb = (vmem_budget_bytes - fixed) // per_row
    # 32-64 rows is the sweet spot with 2-deep buffering: finer DMA/compute
    # overlap and a small src/tanh intermediate, while the ~0.35us/step
    # overhead stays negligible against multi-us steps.
    tb = max(8, min(64, (tb // 8) * 8))
    return min(tb, _round_up(batch, 8))


def basic_attention_kernel(
    inp_ref,      # (TB, Dp)     bf16 batch tile of `input`
    ctx_ref,      # (TB, Sp, Dp) bf16 batch tile of `context`
    w_in_ref,     # (Dp, Dp)     bf16
    w_c_ref,      # (Dp, Dp)     bf16
    b_c_ref,      # (1, Dp)      f32
    w_v_ref,      # (1, Dp)      f32   linear_v weight as a row vector
    w_out1_ref,   # (Dp, Dp)     bf16  linear_out weight acting on weighted_context
    w_out2_ref,   # (Dp, Dp)     bf16  linear_out weight acting on input
    h_ref,        # (TB, Dp)     f32 out: h_tilde
    wctx_ref,     # (TB, Dp)     f32 out: weighted_context
    attn_ref,     # (TB, Sp)     f32 out: attention weights (lane-dense)
    *,
    s_actual: int,
):
    tb, sp, dp = ctx_ref.shape

    inp = inp_ref[...]                 # (TB, Dp) bf16
    ctx = ctx_ref[...]                 # (TB, Sp, Dp) bf16

    # target = linear_in(input): bf16 MXU operands, f32 accumulation.
    tgt = jnp.dot(inp, w_in_ref[...], preferred_element_type=jnp.float32)

    # source = linear_c(context): single fused (TB*Sp, Dp) @ (Dp, Dp) matmul.
    src = jnp.dot(ctx.reshape(tb * sp, dp), w_c_ref[...],
                  preferred_element_type=jnp.float32)
    src = (src + b_c_ref[...]).reshape(tb, sp, dp)

    # attn = tanh(target + source), kept in f32 (EUP; no bf16 elementwise on v5e).
    a = jnp.tanh(src + tgt.reshape(tb, 1, dp))          # (TB, Sp, Dp) f32

    # scores = linear_v(attn), computed directly in (TB, Sp) layout
    # (batch on sublanes, S on lanes) so softmax + the attn store need no
    # transpose and the store is a full-lane vst.
    w_v_row = w_v_ref[...].reshape(1, 1, dp)
    scores = jnp.sum(a * w_v_row, axis=-1)              # (TB, Sp) f32

    # Mask padded source positions (padded context rows are zero, but the
    # linear_c bias makes their scores non-zero, so mask explicitly).
    if s_actual < sp:
        s_idx = jax.lax.broadcasted_iota(jnp.int32, (tb, sp), 1)
        scores = jnp.where(s_idx < s_actual, scores, jnp.float32(-1e30))

    # softmax over the source-length (lane) axis — PyTorch Softmax(dim=1).
    # Exact divide so attention rows sum to 1 to f32 precision.
    m = jnp.max(scores, axis=-1, keepdims=True)
    e = jnp.exp(scores - m)
    probs = e / jnp.sum(e, axis=-1, keepdims=True)       # (TB, Sp) f32

    # weighted_context = attn @ context : batched MXU contraction
    # (TB, 1, Sp) @ (TB, Sp, Dp) -> (TB, 1, Dp), bf16 operands / f32 acc.
    wctx = jnp.einsum(
        "bqs,bsd->bqd", probs.astype(ctx.dtype).reshape(tb, 1, sp), ctx,
        preferred_element_type=jnp.float32,
    ).reshape(tb, dp)

    # h_tilde = tanh(linear_out(concat(wctx, input)))
    #         = tanh(wctx @ W_out[:D] + input @ W_out[D:])
    h = jnp.tanh(
        jnp.dot(wctx.astype(w_out1_ref.dtype), w_out1_ref[...],
                preferred_element_type=jnp.float32)
        + jnp.dot(inp, w_out2_ref[...], preferred_element_type=jnp.float32)
    )

    h_ref[...] = h
    wctx_ref[...] = wctx
    attn_ref[...] = probs


def basic_attention(inp, ctx, w_in, w_c, b_c, w_v, w_out, *, batch_tile=None):
    """inp: (B, D), ctx: (B, S, D). Weights in (in, out) layout; w_v: (D,); w_out: (2D, D)."""
    B, D = inp.shape
    _, S, _ = ctx.shape

    dp = _round_up(D, 128)            # lane-dense feature dim
    sp = _round_up(S, 128)            # lane-dense attn output / softmax axis

    budget = _vmem_budget_bytes()
    if batch_tile is None:
        tb = _pick_batch_tile(B, sp, dp, budget)
        # v7x megacore: keep >= 4 grid steps when B allows it so the
        # ("parallel",) batch axis can be split across both TensorCores.
        tb = min(tb, max(8, _round_up(_cdiv(B, 4), 8)))
    else:
        tb = batch_tile
    tb = max(8, (tb // 8) * 8)
    bp = _round_up(B, tb)

    bf16, f32 = jnp.bfloat16, jnp.float32

    # bf16 streaming of the big MXU operands; cast BEFORE padding so any padded
    # HBM copy of context made here is bf16 (half the old f32 pad+copy), and
    # tile-aligned inputs skip the pad entirely.  Bias / w_v stay f32 for the
    # elementwise (VPU) path.
    inp_p = _pad_to(inp.astype(bf16), (bp, dp))
    ctx_p = _pad_to(ctx.astype(bf16), (bp, sp, dp))
    w_in_p = _pad_to(w_in.astype(bf16), (dp, dp))
    w_c_p = _pad_to(w_c.astype(bf16), (dp, dp))
    b_c_p = _pad_to(b_c.astype(f32).reshape(1, D), (1, dp))
    w_v_p = _pad_to(w_v.astype(f32).reshape(1, D), (1, dp))
    w_out1_p = _pad_to(w_out[:D, :].astype(bf16), (dp, dp))   # acts on weighted_context
    w_out2_p = _pad_to(w_out[D:, :].astype(bf16), (dp, dp))   # acts on input

    out_shapes = (
        jax.ShapeDtypeStruct((bp, dp), f32),   # h_tilde (padded)
        jax.ShapeDtypeStruct((bp, dp), f32),   # weighted_context (padded)
        jax.ShapeDtypeStruct((bp, sp), f32),   # attn (padded)
    )

    grid_spec = pltpu.PrefetchScalarGridSpec(
        num_scalar_prefetch=0,
        grid=(bp // tb,),
        in_specs=[
            pl.BlockSpec((tb, dp), lambda b: (b, 0)),         # input
            pl.BlockSpec((tb, sp, dp), lambda b: (b, 0, 0)),  # context
            pl.BlockSpec((dp, dp), lambda b: (0, 0)),         # w_in   (constant index_map:
            pl.BlockSpec((dp, dp), lambda b: (0, 0)),         # w_c     fetched once, never
            pl.BlockSpec((1, dp), lambda b: (0, 0)),          # b_c     re-DMA'd across steps)
            pl.BlockSpec((1, dp), lambda b: (0, 0)),          # w_v
            pl.BlockSpec((dp, dp), lambda b: (0, 0)),         # w_out1
            pl.BlockSpec((dp, dp), lambda b: (0, 0)),         # w_out2
        ],
        out_specs=[
            pl.BlockSpec((tb, dp), lambda b: (b, 0)),
            pl.BlockSpec((tb, dp), lambda b: (b, 0)),
            pl.BlockSpec((tb, sp), lambda b: (b, 0)),
        ],
    )

    h, wctx, attn = pl.pallas_call(
        functools.partial(basic_attention_kernel, s_actual=S),
        out_shape=out_shapes,
        grid_spec=grid_spec,
        compiler_params=pltpu.CompilerParams(
            dimension_semantics=("parallel",),   # v7x: split batch over 2 TCs
            vmem_limit_bytes=budget,             # same per-generation budget as tiling
        ),
    )(inp_p, ctx_p, w_in_p, w_c_p, b_c_p, w_v_p, w_out1_p, w_out2_p)

    # Slice padding back off.
    return h[:B, :D], wctx[:B, :D], attn[:B, :S]


def basic_attention_ref(inp, ctx, w_in, w_c, b_c, w_v, w_out):
    """Pure-JAX reference mirroring the PyTorch forward.  Matmuls run at
    HIGHEST precision so this is a true f32 reference even on TPU (default TPU
    precision truncates f32 matmul operands to bf16)."""
    P = jax.lax.Precision.HIGHEST
    tgt = jnp.dot(inp, w_in, precision=P)                       # (B, D)
    src = jnp.einsum("bsd,de->bse", ctx, w_c, precision=P) + b_c  # (B, S, D)
    a = jnp.tanh(tgt[:, None, :] + src)                          # (B, S, D)
    scores = jnp.einsum("bsd,d->bs", a, w_v, precision=P)        # (B, S)
    attn = jax.nn.softmax(scores, axis=1)                        # (B, S)
    wctx = jnp.einsum("bs,bsd->bd", attn, ctx, precision=P)      # (B, D)
    h = jnp.tanh(jnp.dot(jnp.concatenate([wctx, inp], axis=1), w_out, precision=P))
    return h, wctx, attn


if __name__ == "__main__":
    B, S, D = 2, 8, 32

    key = jax.random.PRNGKey(0)
    k_inp, k_ctx, k1, k2, k3, k4, k5 = jax.random.split(key, 7)

    inp = jax.random.normal(k_inp, (B, D), dtype=jnp.float32)
    ctx = jax.random.normal(k_ctx, (B, S, D), dtype=jnp.float32)

    # Deterministic parameter init (weights stored as (in, out)).
    w_in = jax.random.normal(k1, (D, D), dtype=jnp.float32) * 0.1      # linear_in (no bias)
    w_c = jax.random.normal(k2, (D, D), dtype=jnp.float32) * 0.1       # linear_c weight
    b_c = jax.random.normal(k3, (D,), dtype=jnp.float32) * 0.1         # linear_c bias
    w_v = jax.random.normal(k4, (D,), dtype=jnp.float32) * 0.1         # linear_v (D -> 1, no bias)
    w_out = jax.random.normal(k5, (2 * D, D), dtype=jnp.float32) * 0.1  # linear_out (no bias)

    h, wctx, attn = basic_attention(inp, ctx, w_in, w_c, b_c, w_v, w_out)
    jax.block_until_ready((h, wctx, attn))

    h_r, wctx_r, attn_r = basic_attention_ref(inp, ctx, w_in, w_c, b_c, w_v, w_out)

    # bf16 MXU operands (f32 accumulation, f32 softmax) vs. HIGHEST-precision
    # f32 reference -> bf16-level tolerances.
    assert jnp.allclose(h, h_r, atol=2e-2, rtol=2e-2), float(jnp.max(jnp.abs(h - h_r)))
    assert jnp.allclose(wctx, wctx_r, atol=2e-2, rtol=2e-2), float(jnp.max(jnp.abs(wctx - wctx_r)))
    assert jnp.allclose(attn, attn_r, atol=2e-2, rtol=2e-2), float(jnp.max(jnp.abs(attn - attn_r)))

    print("KERNEL_OK")
</pallas_src>

<mosaic_0001>
module attributes {stable_mosaic.version = 11 : i64} {
  func.func @basic_attention_kernel(%arg0: i32, %arg1: memref<8x128xbf16, #tpu.memory_space<vmem>>, %arg2: memref<8x128x128xbf16, #tpu.memory_space<vmem>>, %arg3: memref<128x128xbf16, #tpu.memory_space<vmem>>, %arg4: memref<128x128xbf16, #tpu.memory_space<vmem>>, %arg5: memref<1x128xf32, #tpu.memory_space<vmem>>, %arg6: memref<1x128xf32, #tpu.memory_space<vmem>>, %arg7: memref<128x128xbf16, #tpu.memory_space<vmem>>, %arg8: memref<128x128xbf16, #tpu.memory_space<vmem>>, %arg9: memref<8x128xf32, #tpu.memory_space<vmem>>, %arg10: memref<8x128xf32, #tpu.memory_space<vmem>>, %arg11: memref<8x128xf32, #tpu.memory_space<vmem>>) attributes {dimension_semantics = [#tpu.dimension_semantics<parallel>], iteration_bounds = array<i64: 1>, scalar_prefetch = 0 : i64, scratch_operands = 0 : i64, tpu.core_type = #tpu.core_type<tc>, window_params = [{transform_indices = @transform_0, window_bounds = array<i64: 8, 128>}, {transform_indices = @transform_1, window_bounds = array<i64: 8, 128, 128>}, {pipeline_mode = #tpu.pipeline_mode<synchronous>, transform_indices = @transform_2, window_bounds = array<i64: 128, 128>}, {pipeline_mode = #tpu.pipeline_mode<synchronous>, transform_indices = @transform_3, window_bounds = array<i64: 128, 128>}, {pipeline_mode = #tpu.pipeline_mode<synchronous>, transform_indices = @transform_4, window_bounds = array<i64: 1, 128>}, {pipeline_mode = #tpu.pipeline_mode<synchronous>, transform_indices = @transform_5, window_bounds = array<i64: 1, 128>}, {pipeline_mode = #tpu.pipeline_mode<synchronous>, transform_indices = @transform_6, window_bounds = array<i64: 128, 128>}, {pipeline_mode = #tpu.pipeline_mode<synchronous>, transform_indices = @transform_7, window_bounds = array<i64: 128, 128>}, {transform_indices = @transform_8, window_bounds = array<i64: 8, 128>}, {transform_indices = @transform_9, window_bounds = array<i64: 8, 128>}, {transform_indices = @transform_10, window_bounds = array<i64: 8, 128>}]} {
    %c0 = arith.constant 0 : index
    %c0_0 = arith.constant 0 : index
    %0 = vector.load %arg1[%c0, %c0_0] : memref<8x128xbf16, #tpu.memory_space<vmem>>, vector<8x128xbf16>
    %c0_1 = arith.constant 0 : index
    %c0_2 = arith.constant 0 : index
    %c0_3 = arith.constant 0 : index
    %1 = vector.load %arg2[%c0_1, %c0_2, %c0_3] : memref<8x128x128xbf16, #tpu.memory_space<vmem>>, vector<8x128x128xbf16>
    %c0_4 = arith.constant 0 : index
    %c0_5 = arith.constant 0 : index
    %2 = vector.load %arg3[%c0_4, %c0_5] : memref<128x128xbf16, #tpu.memory_space<vmem>>, vector<128x128xbf16>
    %cst = arith.constant dense<0.000000e+00> : vector<8x128xf32>
    %3 = tpu.matmul %0, %2, %cst {dimension_numbers = #tpu.dot_dimension_numbers<[1], [0], [0], [1], [0, 0, 1, 1], [], []>} : vector<8x128xbf16>, vector<128x128xbf16>, vector<8x128xf32> -> vector<8x128xf32>
    %4 = vector.shape_cast %1 : vector<8x128x128xbf16> to vector<1024x128xbf16>
    %c0_6 = arith.constant 0 : index
    %c0_7 = arith.constant 0 : index
    %5 = vector.load %arg4[%c0_6, %c0_7] : memref<128x128xbf16, #tpu.memory_space<vmem>>, vector<128x128xbf16>
    %cst_8 = arith.constant dense<0.000000e+00> : vector<1024x128xf32>
    %6 = tpu.matmul %4, %5, %cst_8 {dimension_numbers = #tpu.dot_dimension_numbers<[1], [0], [0], [1], [0, 0, 1, 1], [], []>} : vector<1024x128xbf16>, vector<128x128xbf16>, vector<1024x128xf32> -> vector<1024x128xf32>
    %c0_9 = arith.constant 0 : index
    %c0_10 = arith.constant 0 : index
    %7 = vector.load %arg5[%c0_9, %c0_10] : memref<1x128xf32, #tpu.memory_space<vmem>>, vector<1x128xf32>
    %8 = vector.broadcast %7 : vector<1x128xf32> to vector<1024x128xf32>
    %9 = arith.addf %6, %8 : vector<1024x128xf32>
    %10 = vector.shape_cast %9 : vector<1024x128xf32> to vector<8x128x128xf32>
    %11 = vector.shape_cast %3 : vector<8x128xf32> to vector<8x1x128xf32>
    %12 = vector.broadcast %11 : vector<8x1x128xf32> to vector<8x128x128xf32>
    %13 = arith.addf %10, %12 : vector<8x128x128xf32>
    %14 = math.tanh %13 : vector<8x128x128xf32>
    %c0_11 = arith.constant 0 : index
    %c0_12 = arith.constant 0 : index
    %15 = vector.load %arg6[%c0_11, %c0_12] : memref<1x128xf32, #tpu.memory_space<vmem>>, vector<1x128xf32>
    %16 = vector.shape_cast %15 : vector<1x128xf32> to vector<1x1x128xf32>
    %17 = vector.broadcast %16 : vector<1x1x128xf32> to vector<8x128x128xf32>
    %18 = arith.mulf %14, %17 : vector<8x128x128xf32>
    %cst_13 = arith.constant dense<0.000000e+00> : vector<8x128xf32>
    %19 = vector.multi_reduction <add>, %18, %cst_13 [2] : vector<8x128x128xf32> to vector<8x128xf32>
    %20 = tpu.iota {dimensions = array<i32: 1>} : vector<8x128xi32>
    %c8_i32 = arith.constant 8 : i32
    %21 = vector.broadcast %c8_i32 : i32 to vector<8x128xi32>
    %22 = arith.cmpi slt, %20, %21 : vector<8x128xi32>
    %cst_14 = arith.constant -1.000000e+30 : f32
    %23 = vector.broadcast %cst_14 : f32 to vector<8x128xf32>
    %24 = arith.select %22, %19, %23 : vector<8x128xi1>, vector<8x128xf32>
    %cst_15 = arith.constant dense<0xFF800000> : vector<8xf32>
    %25 = vector.multi_reduction <maximumf>, %24, %cst_15 [1] : vector<8x128xf32> to vector<8xf32>
    %26 = vector.shape_cast %25 : vector<8xf32> to vector<8x1xf32>
    %27 = vector.broadcast %26 : vector<8x1xf32> to vector<8x128xf32>
    %28 = arith.subf %24, %27 : vector<8x128xf32>
    %29 = math.exp %28 : vector<8x128xf32>
    %cst_16 = arith.constant dense<0.000000e+00> : vector<8xf32>
    %30 = vector.multi_reduction <add>, %29, %cst_16 [1] : vector<8x128xf32> to vector<8xf32>
    %31 = vector.shape_cast %30 : vector<8xf32> to vector<8x1xf32>
    %32 = vector.broadcast %31 : vector<8x1xf32> to vector<8x128xf32>
    %33 = arith.divf %29, %32 : vector<8x128xf32>
    %34 = arith.truncf %33 : vector<8x128xf32> to vector<8x128xbf16>
    %35 = vector.shape_cast %34 : vector<8x128xbf16> to vector<8x1x128xbf16>
    "tpu.trace_start"() <{level = 10 : i32, message = "bqs,bsd->bqd"}> : () -> ()
    %cst_17 = arith.constant dense<0.000000e+00> : vector<8x1x128xf32>
    %36 = tpu.matmul %35, %1, %cst_17 {dimension_numbers = #tpu.dot_dimension_numbers<[2], [1], [1], [2], [0, 0, 0, 1, 1, 2], [0], [0]>} : vector<8x1x128xbf16>, vector<8x128x128xbf16>, vector<8x1x128xf32> -> vector<8x1x128xf32>
    "tpu.trace_stop"() : () -> ()
    %37 = vector.shape_cast %36 : vector<8x1x128xf32> to vector<8x128xf32>
    %38 = arith.truncf %37 : vector<8x128xf32> to vector<8x128xbf16>
    %c0_18 = arith.constant 0 : index
    %c0_19 = arith.constant 0 : index
    %39 = vector.load %arg7[%c0_18, %c0_19] : memref<128x128xbf16, #tpu.memory_space<vmem>>, vector<128x128xbf16>
    %cst_20 = arith.constant dense<0.000000e+00> : vector<8x128xf32>
    %40 = tpu.matmul %38, %39, %cst_20 {dimension_numbers = #tpu.dot_dimension_numbers<[1], [0], [0], [1], [0, 0, 1, 1], [], []>} : vector<8x128xbf16>, vector<128x128xbf16>, vector<8x128xf32> -> vector<8x128xf32>
    %c0_21 = arith.constant 0 : index
    %c0_22 = arith.constant 0 : index
    %41 = vector.load %arg8[%c0_21, %c0_22] : memref<128x128xbf16, #tpu.memory_space<vmem>>, vector<128x128xbf16>
    %cst_23 = arith.constant dense<0.000000e+00> : vector<8x128xf32>
    %42 = tpu.matmul %0, %41, %cst_23 {dimension_numbers = #tpu.dot_dimension_numbers<[1], [0], [0], [1], [0, 0, 1, 1], [], []>} : vector<8x128xbf16>, vector<128x128xbf16>, vector<8x128xf32> -> vector<8x128xf32>
    %43 = arith.addf %40, %42 : vector<8x128xf32>
    %44 = math.tanh %43 : vector<8x128xf32>
    %c0_24 = arith.constant 0 : index
    %c0_25 = arith.constant 0 : index
    %45 = vector.load %arg9[%c0_24, %c0_25] : memref<8x128xf32, #tpu.memory_space<vmem>>, vector<8x128xf32>
    tpu.vector_store %arg9[%c0_24, %c0_25], %44 {strides = array<i32>} : memref<8x128xf32, #tpu.memory_space<vmem>>, vector<8x128xf32>,
    %c0_26 = arith.constant 0 : index
    %c0_27 = arith.constant 0 : index
    %46 = vector.load %arg10[%c0_26, %c0_27] : memref<8x128xf32, #tpu.memory_space<vmem>>, vector<8x128xf32>
    tpu.vector_store %arg10[%c0_26, %c0_27], %37 {strides = array<i32>} : memref<8x128xf32, #tpu.memory_space<vmem>>, vector<8x128xf32>,
    %c0_28 = arith.constant 0 : index
    %c0_29 = arith.constant 0 : index
    %47 = vector.load %arg11[%c0_28, %c0_29] : memref<8x128xf32, #tpu.memory_space<vmem>>, vector<8x128xf32>
    tpu.vector_store %arg11[%c0_28, %c0_29], %33 {strides = array<i32>} : memref<8x128xf32, #tpu.memory_space<vmem>>, vector<8x128xf32>,
    return
  }
  func.func @transform_0(%arg0: i32) -> (i32, i32) {
    %c0_i32 = arith.constant 0 : i32
    %c0_i32_0 = arith.constant 0 : i32
    return %arg0, %c0_i32 : i32, i32
  }
  func.func @transform_1(%arg0: i32) -> (i32, i32, i32) {
    %c0_i32 = arith.constant 0 : i32
    %c0_i32_0 = arith.constant 0 : i32
    %c0_i32_1 = arith.constant 0 : i32
    return %arg0, %c0_i32, %c0_i32_0 : i32, i32, i32
  }
  func.func @transform_2(%arg0: i32) -> (i32, i32) {
    %c0_i32 = arith.constant 0 : i32
    %c0_i32_0 = arith.constant 0 : i32
    %c0_i32_1 = arith.constant 0 : i32
    return %c0_i32, %c0_i32_0 : i32, i32
  }
  func.func @transform_3(%arg0: i32) -> (i32, i32) {
    %c0_i32 = arith.constant 0 : i32
    %c0_i32_0 = arith.constant 0 : i32
    %c0_i32_1 = arith.constant 0 : i32
    return %c0_i32, %c0_i32_0 : i32, i32
  }
  func.func @transform_4(%arg0: i32) -> (i32, i32) {
    %c0_i32 = arith.constant 0 : i32
    %c0_i32_0 = arith.constant 0 : i32
    %c0_i32_1 = arith.constant 0 : i32
    return %c0_i32, %c0_i32_0 : i32, i32
  }
  func.func @transform_5(%arg0: i32) -> (i32, i32) {
    %c0_i32 = arith.constant 0 : i32
    %c0_i32_0 = arith.constant 0 : i32
    %c0_i32_1 = arith.constant 0 : i32
    return %c0_i32, %c0_i32_0 : i32, i32
  }
  func.func @transform_6(%arg0: i32) -> (i32, i32) {
    %c0_i32 = arith.constant 0 : i32
    %c0_i32_0 = arith.constant 0 : i32
    %c0_i32_1 = arith.constant 0 : i32
    return %c0_i32, %c0_i32_0 : i32, i32
  }
  func.func @transform_7(%arg0: i32) -> (i32, i32) {
    %c0_i32 = arith.constant 0 : i32
    %c0_i32_0 = arith.constant 0 : i32
    %c0_i32_1 = arith.constant 0 : i32
    return %c0_i32, %c0_i32_0 : i32, i32
  }
  func.func @transform_8(%arg0: i32) -> (i32, i32) {
    %c0_i32 = arith.constant 0 : i32
    %c0_i32_0 = arith.constant 0 : i32
    return %arg0, %c0_i32 : i32, i32
  }
  func.func @transform_9(%arg0: i32) -> (i32, i32) {
    %c0_i32 = arith.constant 0 : i32
    %c0_i32_0 = arith.constant 0 : i32
    return %arg0, %c0_i32 : i32, i32
  }
  func.func @transform_10(%arg0: i32) -> (i32, i32) {
    %c0_i32 = arith.constant 0 : i32
    %c0_i32_0 = arith.constant 0 : i32
    return %arg0, %c0_i32 : i32, i32
  }
}

</mosaic_0001>

<bundles_post_ra>
// kernel: tpu_custom_call.1
= control target key start
LH: loop header
LB: loop body
LE: loop exit
PB: predicated region body
PF: predicated region fallthrough
CT: control target
= control target key end

     0   :  { %16 = vsyncpa [#allocation3], 0  ;;  %s6074_s0 = inlined_call_operand.hbm [shape: bf16[8,128], index: 0, kind: input, shape index: {}]   ;;  %s6075_s1 = inlined_call_operand.hbm [shape: bf16[8,128,128], index: 1, kind: input, shape index: {}]   ;;  %s6076_s2 = inlined_call_operand.hbm [shape: bf16[128,128], index: 2, kind: input, shape index: {}]   ;;  %s6077_s3 = inlined_call_operand.hbm [shape: bf16[128,128], index: 3, kind: input, shape index: {}]   ;;  %s6078_s4 = inlined_call_operand.vmem [shape: f32[1,128], index: 4, kind: input, shape index: {}]   ;;  %s6079_s5 = inlined_call_operand.vmem [shape: f32[1,128], index: 5, kind: input, shape index: {}]   ;;  %s6080_s6 = inlined_call_operand.hbm [shape: bf16[128,128], index: 6, kind: input, shape index: {}]   ;;  %s6081_s7 = inlined_call_operand.hbm [shape: bf16[128,128], index: 7, kind: input, shape index: {}]   ;;  %s6082_s8 = inlined_call_operand.hbm [shape: f32[8,128], index: 8, kind: output, shape index: {0}]   ;;  %s6083_s9 = inlined_call_operand.hbm [shape: f32[8,128], index: 9, kind: output, shape index: {1}]   ;;  %s6084_s10 = inlined_call_operand.hbm [shape: f32[8,128], index: 10, kind: output, shape index: {2}]  }
   0x1   :  { %17 = vsyncpa [#allocation6], 0 }
   0x2   :  { %18 = vsyncpa [#allocation9], 0 }
   0x3   :  { %19 = vsyncpa [#allocation12], 0 }
   0x4   :  { %20 = vsyncpa [#allocation4], 0 }
   0x5   :  { %21 = vsyncpa [#allocation15], 0  ;;  %s4887_s13 = smov [#allocation5]  }
   0x6   :  { %s37_s14 = sshll.u32 %s4887_s13, 4  ;;  %s38_s14 = int_to_ptr.vmem [resolvable:$true] %s37_s14 }
   0x7   :  { %s4703_s15 = scalar_lea.vmem %s38_s14, 8192  ;;  %p4708_p1 = scmp.lt.s32.totalorder %s38_s14, %s38_s14 }
   0x8   :  { %p4704_p0 = scmp.ne.s32.totalorder %s38_s14, %s4703_s15  ;;  %p4709_p2 = scmp.lt.s32.totalorder %s4703_s15, %s4703_s15 }
   0xa   :  { %p4710_p3 = por %p4709_p2, %p4708_p1 }
   0xc   :  { %p4711_p4 = pnand %p4710_p3, %p4704_p0 }
   0xe   :  { %4714 = shalt.err (!%p4711_p4)
}
   0xf   :  { %s4888_s16 = smov 64   ;;  %s4889_s17 = smov 4  }
  0x10   :  { %43 = dma.hbm_to_vmem [thread:$0]  %s6075_s1, 8192, %s38_s14, [#allocation6], %s4888_s16, %s4888_s16, %s4889_s17  }
  0x11   :  { %s4890_s20 = smov [#allocation8]   ;;  %s4891_s22 = smov [#allocation2]  }
  0x12   :  { %s61_s21 = sshll.u32 %s4890_s20, 4  ;;  %s28_s23 = sshll.u32 %s4891_s22, 4  ;;  %s62_s21 = int_to_ptr.vmem [resolvable:$true] %s61_s21  ;;  %s29_s23 = int_to_ptr.vmem [resolvable:$true] %s28_s23 }
  0x13   :  { %s4723_s24 = scalar_lea.vmem %s62_s21, 1024  ;;  %p4728_p6 = scmp.lt.s32.totalorder %s62_s21, %s62_s21 }
  0x14   :  { %p4724_p5 = scmp.ne.s32.totalorder %s62_s21, %s4723_s24  ;;  %p4729_p7 = scmp.lt.s32.totalorder %s4723_s24, %s4723_s24 }
  0x16   :  { %p4730_p8 = por %p4729_p7, %p4728_p6 }
  0x18   :  { %p4731_p9 = pnand %p4730_p8, %p4724_p5 }
  0x1a   :  { %4734 = shalt.err (!%p4731_p9)
}
  0x1b   :  { %67 = dma.hbm_to_vmem [thread:$0]  %s6077_s3, 1024, %s62_s21, [#allocation9], %s4888_s16, %s4888_s16, %s4889_s17  }
  0x1c   :  { %s4743_s1 = scalar_lea.vmem %s29_s23, 64  ;;  %p4748_p11 = scmp.lt.s32.totalorder %s29_s23, %s29_s23 }
  0x1d   :  { %p4744_p10 = scmp.ne.s32.totalorder %s29_s23, %s4743_s1  ;;  %p4749_p12 = scmp.lt.s32.totalorder %s4743_s1, %s4743_s1 }
  0x1f   :  { %p4750_p13 = por %p4749_p12, %p4748_p11 }
  0x21   :  { %p4751_p0 = pnand %p4750_p13, %p4744_p10 }
  0x23   :  { %4754 = shalt.err (!%p4751_p0)
}
  0x24   :  { %31 = dma.hbm_to_vmem [thread:$0]  %s6074_s0, 64, %s29_s23, [#allocation3]  }
  0x25   :  { %s4892_s29 = smov [#allocation7]   ;;  %s4893_s11 = smov [#allocation10]  }
  0x26   :  { %s49_s30 = sshll.u32 %s4892_s29, 4  ;;  %s77_s12 = sshll.u32 %s4893_s11, 4  ;;  %s50_s30 = int_to_ptr.vmem [resolvable:$true] %s49_s30  ;;  %s78_s12 = int_to_ptr.vmem [resolvable:$true] %s77_s12 }
  0x27   :  { %s4763_s13 = scalar_lea.vmem %s50_s30, 1024  ;;  %p4768_p2 = scmp.lt.s32.totalorder %s50_s30, %s50_s30 }
  0x28   :  { %p4764_p1 = scmp.ne.s32.totalorder %s50_s30, %s4763_s13  ;;  %p4769_p3 = scmp.lt.s32.totalorder %s4763_s13, %s4763_s13 }
  0x2a   :  { %p4770_p4 = por %p4769_p3, %p4768_p2 }
  0x2c   :  { %p4771_p5 = pnand %p4770_p4, %p4764_p1 }
  0x2e   :  { %4774 = shalt.err (!%p4771_p5)
}
  0x2f   :  { %55 = dma.hbm_to_vmem [thread:$0]  %s6076_s2, 1024, %s50_s30, [#allocation6], %s4888_s16, %s4888_s16, %s4889_s17  }
  0x30   :  { %s4783_s0 = scalar_lea.vmem %s78_s12, 1024  ;;  %p4788_p7 = scmp.lt.s32.totalorder %s78_s12, %s78_s12 }
  0x31   :  { %p4784_p6 = scmp.ne.s32.totalorder %s78_s12, %s4783_s0  ;;  %p4789_p8 = scmp.lt.s32.totalorder %s4783_s0, %s4783_s0 }
  0x33   :  { %p4790_p9 = por %p4789_p8, %p4788_p7 }
  0x35   :  { %p4791_p10 = pnand %p4790_p9, %p4784_p6 }
  0x37   :  { %4794 = shalt.err (!%p4791_p10)
}
  0x38   :  { %83 = dma.hbm_to_vmem [thread:$0]  %s6080_s6, 1024, %s78_s12, [#allocation9], %s4888_s16, %s4888_s16, %s4889_s17  }
  0x39   :  { %s4894_s19 = smov [#allocation11]  }
  0x3a   :  { %s89_s20 = sshll.u32 %s4894_s19, 4  ;;  %s90_s20 = int_to_ptr.vmem [resolvable:$true] %s89_s20 }
  0x3b   :  { %s4803_s21 = scalar_lea.vmem %s90_s20, 1024  ;;  %p4808_p12 = scmp.lt.s32.totalorder %s90_s20, %s90_s20 }
  0x3c   :  { %p4804_p11 = scmp.ne.s32.totalorder %s90_s20, %s4803_s21  ;;  %p4809_p13 = scmp.lt.s32.totalorder %s4803_s21, %s4803_s21 }
  0x3e   :  { %p4810_p0 = por %p4809_p13, %p4808_p12 }
  0x40   :  { %p4811_p1 = pnand %p4810_p0, %p4804_p11 }
  0x42   :  { %4814 = shalt.err (!%p4811_p1)
}
  0x43   :  { %95 = dma.hbm_to_vmem [thread:$0]  %s6081_s7, 1024, %s90_s20, [#allocation12], %s4888_s16, %s4888_s16, %s4889_s17  }
  0x44   :  { %4875 = dma.done.wait [#allocation3], 64  }
  0x45   :  { %4876 = vsyncadd [#allocation3], 4294967232 }
  0x46   :  { %4877 = dma.done.wait [#allocation6], 9216  }
  0x47   :  { %4878 = vsyncadd [#allocation6], 4294958080 }
  0x48   :  { %4879 = dma.done.wait [#allocation9], 2048  }
  0x49   :  { %4880 = vsyncadd [#allocation9], 4294965248 }
  0x4a   :  { %4881 = dma.done.wait [#allocation12], 1024  }
  0x4b   :  { %4882 = vsyncadd [#allocation12], 4294966272  ;;  %v4895_v0 = vmov 0.0   ;;  %vm6085_vm0 = vmmov 0   ;;  %v4276_v1 = vld [vmem:[#allocation7 + $0x38] sm:$0xff]   ;;  %v4278_v3 = vld [vmem:[#allocation7 + $0x30] sm:$0xff]  }
  0x4c   :  { %3898 = vmatprep.subr.bf16.mxu0 %v4895_v0  ;;  %3914 = vmatprep.mubr.msk.bf16.mxu0 %vm6085_vm0, %v4895_v0  ;;  %v4277_v2 = vld [vmem:[#allocation8 + $0x38] sm:$0xff]   ;;  %v4279_v4 = vld [vmem:[#allocation8 + $0x30] sm:$0xff]   ;;  %v4281_v5 = vld [vmem:[#allocation8 + $0x28] sm:$0xff]   ;;  %vm2225_vm1 = vcmask 130112   ;;  %vm2232_vm2 = vcmask 195712   ;;  %vm2239_vm3 = vcmask 261312  }
  0x4d   :  { %3899 = vmatpush3.bf16.msra.mxu0 %v4276_v1  ;;  %3918 = vmatprep.subr.bf16.mxu1 %v4277_v2  ;;  %v4280_v6 = vld [vmem:[#allocation7 + $0x28] sm:$0xff]   ;;  %v4283_v7 = vld [vmem:[#allocation8 + $0x20] sm:$0xff]   ;;  %v4285_v9 = vld [vmem:[#allocation8 + $0x18] sm:$0xff]   ;;  %vm2246_vm4 = vcmask 326912   ;;  %vm2253_vm5 = vcmask 392512   ;;  %vm2260_vm6 = vcmask 458112  }
  0x4e   :  { %3900 = vmatprep.subr.bf16.mxu0 %v4895_v0  ;;  %3919 = vmatpush3.bf16.msra.mxu1 %v4277_v2  ;;  %v4282_v8 = vld [vmem:[#allocation7 + $0x20] sm:$0xff]   ;;  %v4284_v10 = vld [vmem:[#allocation7 + $0x18] sm:$0xff]   ;;  %v4287_v11 = vld [vmem:[#allocation8 + $0x10] sm:$0xff]   ;;  %v4897_v2 = vmov 1966171168   ;;  %vm2267_vm7 = vcmask 523712  }
  0x4f   :  { %3920 = vmatprep.subr.bf16.mxu1 %v4279_v4  ;;  %v4292_v12 = vld [vmem:[#allocation5] sm:$0xff]   ;;  %v4286_v13 = vld [vmem:[#allocation7 + $0x10] sm:$0xff]   ;;  %v4289_v14 = vld [vmem:[#allocation8 + $0x8] sm:$0xff]   ;;  %vm2274_vm8 = vcmask 589312   ;;  %vm2281_vm9 = vcmask 654912   ;;  %vm2288_vm10 = vcmask 720512  }
  0x50   :  { %3934 = vmatprep.mubr.bf16.mxu1 %v4292_v12  ;;  %v4288_v15 = vld [vmem:[#allocation7 + $0x8] sm:$0xff]   ;;  %v4291_v16 = vld [vmem:[#allocation8] sm:$0xff]   ;;  %v115_v18 = vld [vmem:[#allocation2] sm:$0xf]  ;;  %vm2295_vm11 = vcmask 786112   ;;  %vm2302_vm12 = vcmask 851712  }
  0x51   :  { %3901 = vmatpush3.bf16.msra.mxu0 %v4278_v3  ;;  %v4290_v17 = vld [vmem:[#allocation7] sm:$0xff]   ;;  %v4293_v19 = vld [vmem:[#allocation5 + $0x8] sm:$0xff]   ;;  %v4294_v20 = vld [vmem:[#allocation5 + $0x10] sm:$0xff]   ;;  %v1351_v3 = vunpack.c.l.s4 %v4897_v2  ;;  %vm2309_vm13 = vcmask 917312   ;;  %vm2316_vm14 = vcmask 982912   ;;  %vm2323_vm15 = vcmask 1048512  }
  0x52   :  { %3902 = vmatprep.subr.bf16.mxu0 %v4895_v0  ;;  %3921 = vmatpush3.bf16.msra.mxu1 %v4279_v4  ;;  %v4299_v21 = vld [vmem:[#allocation5 + $0x38] sm:$0xff]   ;;  %v4298_v22 = vld [vmem:[#allocation5 + $0x30] sm:$0xff]   ;;  %v4296_v24 = vld [vmem:[#allocation5 + $0x20] sm:$0xff]   ;;  %v1353_v4 = vlaneseq }
  0x53   :  { %3922 = vmatprep.subr.bf16.mxu1 %v4281_v5  ;;  %v4295_v23 = vld [vmem:[#allocation5 + $0x18] sm:$0xff]   ;;  %v4297_v25 = vld [vmem:[#allocation5 + $0x28] sm:$0xff]   ;;  %v4300_v26 = vld [vmem:[#allocation5 + $0x40] sm:$0xff]  }
  0x54   :  { %v4301_v27 = vld [vmem:[#allocation5 + $0x48] sm:$0xff]   ;;  %v4302_v28 = vld [vmem:[#allocation5 + $0x50] sm:$0xff]   ;;  %v4303_v29 = vld [vmem:[#allocation5 + $0x58] sm:$0xff]  }
  0x55   :  { %3903 = vmatpush3.bf16.msra.mxu0 %v4280_v6  ;;  %v4304_v30 = vld [vmem:[#allocation5 + $0x60] sm:$0xff]   ;;  %v4305_v31 = vld [vmem:[#allocation5 + $0x68] sm:$0xff]   ;;  %v4306_v32 = vld [vmem:[#allocation5 + $0x70] sm:$0xff]  }
  0x56   :  { %3904 = vmatprep.subr.bf16.mxu0 %v4895_v0  ;;  %3923 = vmatpush3.bf16.msra.mxu1 %v4281_v5  ;;  %v4307_v33 = vld [vmem:[#allocation5 + $0x78] sm:$0xff]   ;;  %v4308_v34 = vld [vmem:[#allocation5 + $0x80] sm:$0xff]   ;;  %v4309_v35 = vld [vmem:[#allocation5 + $0x88] sm:$0xff]  }
  0x57   :  { %3924 = vmatprep.subr.bf16.mxu1 %v4283_v7  ;;  %v4310_v36 = vld [vmem:[#allocation5 + $0x90] sm:$0xff]   ;;  %v4311_v37 = vld [vmem:[#allocation5 + $0x98] sm:$0xff]   ;;  %v4312_v38 = vld [vmem:[#allocation5 + $0xa0] sm:$0xff]  }
  0x58   :  { %v4313_v39 = vld [vmem:[#allocation5 + $0xa8] sm:$0xff]   ;;  %v4314_v40 = vld [vmem:[#allocation5 + $0xb0] sm:$0xff]   ;;  %v4315_v41 = vld [vmem:[#allocation5 + $0xb8] sm:$0xff]  }
  0x59   :  { %3905 = vmatpush3.bf16.msra.mxu0 %v4282_v8  ;;  %v4316_v42 = vld [vmem:[#allocation5 + $0xc0] sm:$0xff]   ;;  %v4317_v43 = vld [vmem:[#allocation5 + $0xc8] sm:$0xff]   ;;  %v4318_v44 = vld [vmem:[#allocation5 + $0xd0] sm:$0xff]   ;;  %v5012_v8 = vshrl.u32 %v1353_v4, 7 }
  0x5a   :  { %3906 = vmatprep.subr.bf16.mxu0 %v4895_v0  ;;  %3925 = vmatpush3.bf16.msra.mxu1 %v4283_v7  ;;  %v4319_v45 = vld [vmem:[#allocation5 + $0xd8] sm:$0xff]   ;;  %v4320_v46 = vld [vmem:[#allocation5 + $0xe0] sm:$0xff]   ;;  %v4321_v47 = vld [vmem:[#allocation5 + $0xe8] sm:$0xff]   ;;  %v1352_v7 = vunpack.c.0.s8 %v1351_v3 }
  0x5b   :  { %3926 = vmatprep.subr.bf16.mxu1 %v4285_v9  ;;  %v4322_v48 = vld [vmem:[#allocation5 + $0xf0] sm:$0xff]   ;;  %v4323_v49 = vld [vmem:[#allocation5 + $0xf8] sm:$0xff]   ;;  %v4324_v50 = vld [vmem:[#allocation5 + $0x100] sm:$0xff]  }
  0x5c   :  { %v4325_v51 = vld [vmem:[#allocation5 + $0x108] sm:$0xff]   ;;  %v4326_v52 = vld [vmem:[#allocation5 + $0x110] sm:$0xff]   ;;  %v4327_v53 = vld [vmem:[#allocation5 + $0x118] sm:$0xff]  }
  0x5d   :  { %3907 = vmatpush3.bf16.msra.mxu0 %v4284_v10  ;;  %v4328_v54 = vld [vmem:[#allocation5 + $0x120] sm:$0xff]   ;;  %v4329_v55 = vld [vmem:[#allocation5 + $0x128] sm:$0xff]   ;;  %v4330_v56 = vld [vmem:[#allocation5 + $0x130] sm:$0xff]  }
  0x5e   :  { %3908 = vmatprep.subr.bf16.mxu0 %v4895_v0  ;;  %3927 = vmatpush3.bf16.msra.mxu1 %v4285_v9  ;;  %v4331_v57 = vld [vmem:[#allocation5 + $0x138] sm:$0xff]   ;;  %v4332_v58 = vld [vmem:[#allocation5 + $0x140] sm:$0xff]   ;;  %v4333_v59 = vld [vmem:[#allocation5 + $0x148] sm:$0xff]   ;;  %v5015_v9 = vsub.s32 %v1352_v7, %v5012_v8 }
  0x5f   :  { %3928 = vmatprep.subr.bf16.mxu1 %v4287_v11  ;;  %v4334_v60 = vld [vmem:[#allocation5 + $0x150] sm:$0xff]   ;;  %v4335_v61 = vld [vmem:[#allocation5 + $0x158] sm:$0xff]   ;;  %v4336_v62 = vld [vmem:[#allocation5 + $0x160] sm:$0xff]  }
  0x60   :  { %v4337_v63 = vld [vmem:[#allocation5 + $0x168] sm:$0xff]   ;;  %v4338_v1 = vld [vmem:[#allocation5 + $0x170] sm:$0xff]   ;;  %v4339_v5 = vld [vmem:[#allocation5 + $0x178] sm:$0xff]  }
  0x61   :  { %3909 = vmatpush3.bf16.msra.mxu0 %v4286_v13  ;;  %v4340_v6 = vld [vmem:[#allocation5 + $0x180] sm:$0xff]   ;;  %v4341_v10 = vld [vmem:[#allocation5 + $0x188] sm:$0xff]  }
  0x62   :  { %3910 = vmatprep.subr.bf16.mxu0 %v4895_v0  ;;  %3929 = vmatpush3.bf16.msra.mxu1 %v4287_v11  ;;  %v4342_v11 = vld [vmem:[#allocation5 + $0x190] sm:$0xff]  }
  0x63   :  { %3930 = vmatprep.subr.bf16.mxu1 %v4289_v14 }
  0x65   :  { %3911 = vmatpush3.bf16.msra.mxu0 %v4288_v15 }
  0x66   :  { %3912 = vmatprep.subr.bf16.mxu0 %v4895_v0  ;;  %3931 = vmatpush3.bf16.msra.mxu1 %v4289_v14  ;;  %v5024_v14 = vsub.s32 0, %v5012_v8 }
  0x67   :  { %3932 = vmatprep.subr.bf16.mxu1 %v4291_v16 }
  0x69   :  { %3913 = vmatpush3.bf16.msra.mxu0 %v4290_v17 }
  0x6a   :  { %4062 = vmatprep.subr.bf16.mxu0 %v4895_v0  ;;  %3933 = vmatpush3.bf16.msra.mxu1 %v4291_v16 }
  0x6b   :  { %4222 = vmatprep.subr.bf16.mxu1 %v4895_v0 }
  0x6c   :  { %3915 = vmatmul.mubr.bf16.vlgmr.msra.gmra.mxu0 %v115_v18  ;;  %v5033_v18 = vld [vmem:[%s6078_s4] ss:$0 sm:$0xff] }
  0x6d   :  { %4063 = vmatpush3.bf16.msra.mxu0 %v4299_v21  ;;  %4078 = vmatprep.mubr.msk.bf16.mxu0 %vm6085_vm0, %v4895_v0 }
  0x6e   :  { %3935 = vmatmul.mubr.bf16.vlgmr.msra.gmra.mxu1 %v4293_v19  ;;  %4064 = vmatprep.subr.bf16.mxu0 %v4895_v0 }
  0x6f   :  { %3938 = vmatprep.mubr.bf16.mxu1 %v4294_v20 }
  0x71   :  { %4065 = vmatpush3.bf16.msra.mxu0 %v4298_v22 }
  0x72   :  { %4066 = vmatprep.subr.bf16.mxu0 %v4895_v0 }
  0x75   :  { %4067 = vmatpush3.bf16.msra.mxu0 %v4297_v25 }
  0x76   :  { %3939 = vmatmul.mubr.bf16.gmra.mxu1 %v4295_v23  ;;  %4068 = vmatprep.subr.bf16.mxu0 %v4895_v0 }
  0x77   :  { %3942 = vmatprep.mubr.bf16.mxu1 %v4296_v24 }
  0x79   :  { %4069 = vmatpush3.bf16.msra.mxu0 %v4296_v24  ;;  %v4343_v24 = vld [vmem:[#allocation5 + $0x198] sm:$0xff]  }
  0x7a   :  { %4070 = vmatprep.subr.bf16.mxu0 %v4895_v0 }
  0x7d   :  { %4071 = vmatpush3.bf16.msra.mxu0 %v4295_v23 }
  0x7e   :  { %3943 = vmatmul.mubr.bf16.gmra.mxu1 %v4297_v25  ;;  %4072 = vmatprep.subr.bf16.mxu0 %v4895_v0 }
  0x7f   :  { %3946 = vmatprep.mubr.bf16.mxu1 %v4298_v22 }
  0x81   :  { %4073 = vmatpush3.bf16.msra.mxu0 %v4294_v20 }
  0x82   :  { %4074 = vmatprep.subr.bf16.mxu0 %v4895_v0 }
  0x85   :  { %4075 = vmatpush3.bf16.msra.mxu0 %v4293_v19 }
  0x86   :  { %3947 = vmatmul.mubr.bf16.gmra.mxu1 %v4299_v21  ;;  %4076 = vmatprep.subr.bf16.mxu0 %v4895_v0 }
  0x87   :  { %3950 = vmatprep.mubr.bf16.mxu1 %v4300_v26 }
  0x89   :  { %4077 = vmatpush3.bf16.msra.mxu0 %v4292_v12 }
  0x8a   :  { %4082 = vmatprep.subr.bf16.mxu0 %v4895_v0 }
  0x8e   :  { %3951 = vmatmul.mubr.bf16.gmra.mxu1 %v4301_v27  ;;  %v4344_v27 = vld [vmem:[#allocation5 + $0x1a0] sm:$0xff]  }
  0x8f   :  { %3954 = vmatprep.mubr.bf16.mxu1 %v4302_v28 }
  0x96   :  { %3955 = vmatmul.mubr.bf16.gmra.mxu1 %v4303_v29 }
  0x97   :  { %3958 = vmatprep.mubr.bf16.mxu1 %v4304_v30 }
  0x9e   :  { %3959 = vmatmul.mubr.bf16.gmra.mxu1 %v4305_v31 }
  0x9f   :  { %3962 = vmatprep.mubr.bf16.mxu1 %v4306_v32 }
  0xa6   :  { %3963 = vmatmul.mubr.bf16.gmra.mxu1 %v4307_v33 }
  0xa7   :  { %3966 = vmatprep.mubr.bf16.mxu1 %v4308_v34 }
  0xae   :  { %3967 = vmatmul.mubr.bf16.gmra.mxu1 %v4309_v35 }
  0xaf   :  { %3970 = vmatprep.mubr.bf16.mxu1 %v4310_v36 }
  0xb6   :  { %3971 = vmatmul.mubr.bf16.gmra.mxu1 %v4311_v37 }
  0xb7   :  { %3974 = vmatprep.mubr.bf16.mxu1 %v4312_v38  ;;  %v4345_v38 = vld [vmem:[#allocation5 + $0x1a8] sm:$0xff]  }
  0xbe   :  { %3975 = vmatmul.mubr.bf16.gmra.mxu1 %v4313_v39 }
  0xbf   :  { %3978 = vmatprep.mubr.bf16.mxu1 %v4314_v40  ;;  %v4346_v40 = vld [vmem:[#allocation5 + $0x1b0] sm:$0xff]  }
  0xc6   :  { %3979 = vmatmul.mubr.bf16.gmra.mxu1 %v4315_v41 }
  0xc7   :  { %3982 = vmatprep.mubr.bf16.mxu1 %v4316_v42 }
  0xce   :  { %3983 = vmatmul.mubr.bf16.gmra.mxu1 %v4317_v43 }
  0xcf   :  { %3986 = vmatprep.mubr.bf16.mxu1 %v4318_v44 }
  0xd6   :  { %3987 = vmatmul.mubr.bf16.gmra.mxu1 %v4319_v45 }
  0xd7   :  { %3990 = vmatprep.mubr.bf16.mxu1 %v4320_v46 }
  0xde   :  { %3991 = vmatmul.mubr.bf16.gmra.mxu1 %v4321_v47 }
  0xdf   :  { %3994 = vmatprep.mubr.bf16.mxu1 %v4322_v48 }
  0xe6   :  { %3995 = vmatmul.mubr.bf16.gmra.mxu1 %v4323_v49 }
  0xe7   :  { %3998 = vmatprep.mubr.bf16.mxu1 %v4324_v50 }
  0xee   :  { %3999 = vmatmul.mubr.bf16.gmra.mxu1 %v4325_v51 }
  0xef   :  { %4002 = vmatprep.mubr.bf16.mxu1 %v4326_v52 }
  0xf6   :  { %4003 = vmatmul.mubr.bf16.gmra.mxu1 %v4327_v53 }
  0xf7   :  { %4006 = vmatprep.mubr.bf16.mxu1 %v4328_v54  ;;  %v4347_v54 = vld [vmem:[#allocation5 + $0x1b8] sm:$0xff]  }
  0xfe   :  { %4007 = vmatmul.mubr.bf16.gmra.mxu1 %v4329_v55  ;;  %v5060_v55 = vld [vmem:[%s6079_s5] ss:$0 sm:$0xff] }
  0xff   :  { %4010 = vmatprep.mubr.bf16.mxu1 %v4330_v56 }
 0x106   :  { %4011 = vmatmul.mubr.bf16.gmra.mxu1 %v4331_v57 }
 0x107   :  { %4014 = vmatprep.mubr.bf16.mxu1 %v4332_v58  ;;  %v4348_v58 = vld [vmem:[#allocation5 + $0x1c0] sm:$0xff]  }
 0x10e   :  { %4015 = vmatmul.mubr.bf16.gmra.mxu1 %v4333_v59 }
 0x10f   :  { %4018 = vmatprep.mubr.bf16.mxu1 %v4334_v60 }
 0x116   :  { %4019 = vmatmul.mubr.bf16.gmra.mxu1 %v4335_v61 }
 0x117   :  { %4022 = vmatprep.mubr.bf16.mxu1 %v4336_v62 }
 0x11e   :  { %4023 = vmatmul.mubr.bf16.gmra.mxu1 %v4337_v63 }
 0x11f   :  { %4026 = vmatprep.mubr.bf16.mxu1 %v4338_v1 }
 0x126   :  { %4027 = vmatmul.mubr.bf16.gmra.mxu1 %v4339_v5 }
 0x127   :  { %4030 = vmatprep.mubr.bf16.mxu1 %v4340_v6 }
 0x12c   :  { %v5017_v12 = vpop.f32.mrf.mxu0 }
 0x12d   :  { %v5021_v13 = vrot.slane %v5017_v12, %v5015_v9 }
 0x12e   :  { %v3936_v15 = vpop.f32.mrf.mxu1  ;;  %4031 = vmatmul.mubr.bf16.gmra.mxu1 %v4341_v10  ;;  %v3916_v16 = vpop.f32.mrf.mxu0 }
 0x12f   :  { %v5028_v17 = vrot.slane %v5021_v13, %v5015_v9  ;;  %4034 = vmatprep.mubr.bf16.mxu1 %v4342_v11  ;;  %v846_v26 = vadd.f32 %v3936_v15, %v5033_v18  ;;  %v4349_v15 = vld [vmem:[#allocation5 + $0x1c8] sm:$0xff]  }
 0x130   :  { %v837_v19 = vpop.f32.mrf.mxu1  ;;  %v345_v20 = vpop.f32.mrf.mxu0 }
 0x131   :  { %v5037_v21 = vrot.slane %v5028_v17, %v5024_v14  ;;  %v838_v22 = vadd.f32 %v5033_v18, %v837_v19 }
 0x132   :  { %v3937_v23 = vpop.f32.mrf.mxu1  ;;  %v3917_v25 = vpop.f32.mrf.mxu0 }
 0x133   :  { %v1438_v28 = vadd.f32 %v5037_v21, %v838_v22  ;;  %v1440_v30 = vadd.f32 %v5037_v21, %v846_v26  ;;  %v849_v31 = vadd.f32 %v3937_v23, %v5033_v18  ;;  %v4350_v22 = vld [vmem:[#allocation5 + $0x1d0] sm:$0xff]  }
 0x134   :  { %v840_v29 = vpop.f32.mrf.mxu1 }
 0x135   :  { %4372 = vtanh.f32 %v1438_v28  ;;  %v1441_v33 = vadd.f32 %v5037_v21, %v849_v31  ;;  %v841_v34 = vadd.f32 %v5033_v18, %v840_v29 }
 0x136   :  { %v3940_v32 = vpop.f32.mrf.mxu1  ;;  %4035 = vmatmul.mubr.bf16.gmra.mxu1 %v4343_v24  ;;  %4374 = vtanh.f32 %v1440_v30 }
 0x137   :  { %4038 = vmatprep.mubr.bf16.mxu1 %v4344_v27  ;;  %4376 = vtanh.f32 %v1441_v33  ;;  %v1439_v41 = vadd.f32 %v5037_v21, %v841_v34  ;;  %v862_v42 = vadd.f32 %v3940_v32, %v5033_v18  ;;  %v1364_v33 = vcombine.high %v5021_v13, %v5021_v13 }
 0x138   :  { %v853_v35 = vpop.f32.mrf.mxu1 }
 0x139   :  { %v854_v36 = vadd.f32 %v5033_v18, %v853_v35  ;;  %v1444_v48 = vadd.f32 %v5037_v21, %v862_v42 }
 0x13a   :  { %v3941_v37 = vpop.f32.mrf.mxu1 }
 0x13b   :  { %v1442_v39 = vadd.f32 %v5037_v21, %v854_v36  ;;  %v865_v50 = vadd.f32 %v3941_v37, %v5033_v18 }
 0x13c   :  { %v856_v43 = vpop.f32.mrf.mxu1 }
 0x13d   :  { %4378 = vtanh.f32 %v1442_v39  ;;  %v857_v44 = vadd.f32 %v5033_v18, %v856_v43  ;;  %v1445_v61 = vadd.f32 %v5037_v21, %v865_v50 }
 0x13e   :  { %v3944_v45 = vpop.f32.mrf.mxu1  ;;  %4039 = vmatmul.mubr.bf16.gmra.mxu1 %v4345_v38  ;;  %4380 = vtanh.f32 %v1439_v41  ;;  %v4351_v38 = vld [vmem:[#allocation5 + $0x1d8] sm:$0xff]   ;;  %v4352_v41 = vld [vmem:[#allocation5 + $0x1e0] sm:$0xff]  }
 0x13f   :  { %v1443_v46 = vadd.f32 %v5037_v21, %v857_v44  ;;  %v878_v47 = vadd.f32 %v3944_v45, %v5033_v18  ;;  %4042 = vmatprep.mubr.bf16.mxu1 %v4346_v40  ;;  %v5083_v44 = vrot.slane %v1364_v33, %v5015_v9 }
 0x140   :  { %v869_v49 = vpop.f32.mrf.mxu1 }
 0x141   :  { %4382 = vtanh.f32 %v1443_v46  ;;  %v1448_v51 = vadd.f32 %v5037_v21, %v878_v47  ;;  %v870_v52 = vadd.f32 %v5033_v18, %v869_v49 }
 0x142   :  { %v3945_v53 = vpop.f32.mrf.mxu1  ;;  %v4373_v59 = vpop.eup %4372 }
 0x143   :  { %4384 = vtanh.f32 %v1448_v51  ;;  %v1446_v56 = vadd.f32 %v5037_v21, %v870_v52  ;;  %v881_v57 = vadd.f32 %v3945_v53, %v5033_v18  ;;  %v1701_v62 = vmul.f32 %v4373_v59, %v5060_v55  ;;  %v4375_v63 = vpop.eup %4374  ;;  %v4353_v59 = vld [vmem:[#allocation5 + $0x1e8] sm:$0xff]  }
 0x144   :  { %v872_v60 = vpop.f32.mrf.mxu1  ;;  %4386 = vtanh.f32 %v1444_v48  ;;  %v4377_v6 = vpop.eup %4376  ;;  %v1703_v7 = vmul.f32 %v4375_v63, %v5060_v55  ;;  %v5093_v52 = vrot.slane %v5083_v44, %v5024_v14 }
 0x145   :  { %4388 = vtanh.f32 %v1446_v56  ;;  %v1449_v2 = vadd.f32 %v5037_v21, %v881_v57  ;;  %v873_v3 = vadd.f32 %v5033_v18, %v872_v60  ;;  %1829 = vadd.xlane.f32.xlu0 %v1701_v62  ;;  %v1704_v25 = vmul.f32 %v4377_v6, %v5060_v55  ;;  %v4354_v62 = vld [vmem:[#allocation5 + $0x1f0] sm:$0xff]  }
 0x146   :  { %v3948_v1 = vpop.f32.mrf.mxu1  ;;  %4043 = vmatmul.mubr.bf16.gmra.mxu1 %v4347_v54  ;;  %4390 = vtanh.f32 %v1445_v61 }
 0x147   :  { %4046 = vmatprep.mubr.bf16.mxu1 %v4348_v58  ;;  %4392 = vtanh.f32 %v1449_v2  ;;  %v1447_v16 = vadd.f32 %v5037_v21, %v873_v3  ;;  %v894_v19 = vadd.f32 %v3948_v1, %v5033_v18 }
 0x148   :  { %v885_v5 = vpop.f32.mrf.mxu1 }
 0x149   :  { %1833 = vadd.xlane.f32.xlu0 %v1703_v7  ;;  %4394 = vtanh.f32 %v1447_v16  ;;  %v1452_v28 = vadd.f32 %v5037_v21, %v894_v19  ;;  %v886_v29 = vadd.f32 %v5033_v18, %v885_v5 }
 0x14a   :  { %v4379_v10 = vpop.eup %4378  ;;  %v3949_v11 = vpop.f32.mrf.mxu1 }
 0x14b   :  { %v1705_v20 = vmul.f32 %v4379_v10, %v5060_v55  ;;  %v4381_v24 = vpop.eup %4380  ;;  %v897_v36 = vadd.f32 %v3949_v11, %v5033_v18  ;;  %4396 = vtanh.f32 %v1452_v28  ;;  %v1450_v39 = vadd.f32 %v5037_v21, %v886_v29 }
 0x14c   :  { %v888_v23 = vpop.f32.mrf.mxu1  ;;  %v1702_v34 = vmul.f32 %v4381_v24, %v5060_v55  ;;  %v4355_v24 = vld [vmem:[#allocation5 + $0x1f8] sm:$0xff]  }
 0x14d   :  { %1837 = vadd.xlane.f32.xlu1 %v1705_v20  ;;  %1835 = vadd.xlane.f32.xlu0 %v1704_v25  ;;  %v1453_v46 = vadd.f32 %v5037_v21, %v897_v36  ;;  %v889_v47 = vadd.f32 %v5033_v18, %v888_v23  ;;  %4398 = vtanh.f32 %v1450_v39 }
 0x14e   :  { %v4383_v26 = vpop.eup %4382  ;;  %v3952_v27 = vpop.f32.mrf.mxu1  ;;  %4047 = vmatmul.mubr.bf16.gmra.mxu1 %v4349_v15 }
 0x14f   :  { %v1706_v30 = vmul.f32 %v4383_v26, %v5060_v55  ;;  %4050 = vmatprep.mubr.bf16.mxu1 %v4350_v22  ;;  %4400 = vtanh.f32 %v1453_v46  ;;  %v1451_v56 = vadd.f32 %v5037_v21, %v889_v47  ;;  %v910_v57 = vadd.f32 %v3952_v27, %v5033_v18 }
 0x150   :  { %v4385_v31 = vpop.eup %4384  ;;  %v901_v32 = vpop.f32.mrf.mxu1 }
 0x151   :  { %1839 = vadd.xlane.f32.xlu1 %v1706_v30  ;;  %v4387_v35 = vpop.eup %4386  ;;  %1831 = vadd.xlane.f32.xlu0 %v1702_v34  ;;  %v1711_v40 = vmul.f32 %v4385_v31, %v5060_v55  ;;  %v1456_v21 = vadd.f32 %v5093_v52, %v910_v57  ;;  %v902_v3 = vadd.f32 %v5033_v18, %v901_v32 }
 0x152   :  { %v3953_v37 = vpop.f32.mrf.mxu1  ;;  %v4389_v42 = vpop.eup %4388  ;;  %v1707_v13 = vmul.f32 %v4387_v35, %v5060_v55 }
 0x153   :  { %v4391_v45 = vpop.eup %4390  ;;  %v1709_v49 = vmul.f32 %v4389_v42, %v5060_v55  ;;  %v1454_v20 = vadd.f32 %v5093_v52, %v902_v3  ;;  %v913_v22 = vadd.f32 %v3953_v37, %v5033_v18 }
 0x154   :  { %v904_v43 = vpop.f32.mrf.mxu1  ;;  %v4393_v50 = vpop.eup %4392  ;;  %v1708_v54 = vmul.f32 %v4391_v45, %v5060_v55 }
 0x155   :  { %1849 = vadd.xlane.f32.xlu1 %v1711_v40  ;;  %1841 = vadd.xlane.f32.xlu0 %v1707_v13  ;;  %v1712_v61 = vmul.f32 %v4393_v50, %v5060_v55  ;;  %v1457_v30 = vadd.f32 %v5093_v52, %v913_v22  ;;  %v905_v31 = vadd.f32 %v5033_v18, %v904_v43 }
 0x156   :  { %v5088_v48 = vpop.f32.mrf.mxu1  ;;  %4051 = vmatmul.mubr.bf16.gmra.mxu1 %v4351_v38  ;;  %v4395_v63 = vpop.eup %4394 }
 0x157   :  { %4054 = vmatprep.mubr.bf16.mxu1 %v4352_v41  ;;  %v1710_v10 = vmul.f32 %v4395_v63, %v5060_v55  ;;  %v1455_v39 = vadd.f32 %v5093_v52, %v905_v31  ;;  %v926_v40 = vadd.f32 %v5088_v48, %v5033_v18 }
 0x158   :  { %v917_v51 = vpop.f32.mrf.mxu1  ;;  %v4397_v11 = vpop.eup %4396 }
 0x159   :  { %v918_v53 = vadd.f32 %v5033_v18, %v917_v51  ;;  %1845 = vadd.xlane.f32.xlu1 %v1709_v49  ;;  %1843 = vadd.xlane.f32.xlu0 %v1708_v54  ;;  %v1715_v27 = vmul.f32 %v4397_v11, %v5060_v55  ;;  %v1460_v50 = vadd.f32 %v5093_v52, %v926_v40 }
 0x15a   :  { %v5099_v58 = vpop.f32.mrf.mxu1  ;;  %v4399_v28 = vpop.eup %4398 }
 0x15b   :  { %v1458_v60 = vadd.f32 %v5093_v52, %v918_v53  ;;  %v1713_v36 = vmul.f32 %v4399_v28, %v5060_v55  ;;  %v929_v48 = vadd.f32 %v5099_v58, %v5033_v18 }
 0x15c   :  { %v920_v1 = vpop.f32.mrf.mxu1  ;;  %v4401_v33 = vpop.eup %4400 }
 0x15d   :  { %4402 = vtanh.f32 %v1458_v60  ;;  %v921_v2 = vadd.f32 %v5033_v18, %v920_v1  ;;  %1851 = vadd.xlane.f32.xlu1 %v1712_v61  ;;  %v1716_v42 = vmul.f32 %v4401_v33, %v5060_v55  ;;  %v1461_v58 = vadd.f32 %v5093_v52, %v929_v48 }
 0x15e   :  { %4404 = vtanh.f32 %v1451_v56  ;;  %v3960_v5 = vpop.f32.mrf.mxu1  ;;  %4055 = vmatmul.mubr.bf16.gmra.mxu1 %v4353_v59 }
 0x15f   :  { %v1459_v6 = vadd.f32 %v5093_v52, %v921_v2  ;;  %v942_v7 = vadd.f32 %v3960_v5, %v5033_v18  ;;  %4058 = vmatprep.mubr.bf16.mxu1 %v4354_v62  ;;  %v1394_v62 = vcombine.high %v5028_v17, %v5028_v17 }
 0x160   :  { %v933_v15 = vpop.f32.mrf.mxu1 }
 0x161   :  { %4406 = vtanh.f32 %v1459_v6  ;;  %v1464_v16 = vadd.f32 %v5093_v52, %v942_v7  ;;  %v934_v19 = vadd.f32 %v5033_v18, %v933_v15  ;;  %1847 = vadd.xlane.f32.xlu1 %v1710_v10  ;;  %v5146_v10 = vrot.slane %v1394_v62, %v5024_v14 }
 0x162   :  { %4408 = vtanh.f32 %v1456_v21  ;;  %v3961_v23 = vpop.f32.mrf.mxu1 }
 0x163   :  { %4410 = vtanh.f32 %v1464_v16  ;;  %v1462_v25 = vadd.f32 %v5093_v52, %v934_v19  ;;  %v945_v26 = vadd.f32 %v3961_v23, %v5033_v18 }
 0x164   :  { %v936_v29 = vpop.f32.mrf.mxu1  ;;  %4412 = vtanh.f32 %v1454_v20 }
 0x165   :  { %1857 = vadd.xlane.f32.xlu1 %v1715_v27  ;;  %4414 = vtanh.f32 %v1462_v25  ;;  %v1465_v34 = vadd.f32 %v5093_v52, %v945_v26  ;;  %v937_v35 = vadd.f32 %v5033_v18, %v936_v29 }
 0x166   :  { %v3964_v32 = vpop.f32.mrf.mxu1  ;;  %4059 = vmatmul.mubr.bf16.gmra.mxu1 %v4355_v24  ;;  %4416 = vtanh.f32 %v1457_v30 }
 0x167   :  { %4238 = vmatprep.mubr.msk.bf16.mxu1 %vm6085_vm0, %v4895_v0  ;;  %4418 = vtanh.f32 %v1465_v34  ;;  %v1463_v13 = vadd.f32 %v5093_v52, %v937_v35  ;;  %v958_v45 = vadd.f32 %v3964_v32, %v5033_v18  ;;  %vm6087_vm0 = vcmask 1041409  }
 0x168   :  { %v949_v37 = vpop.f32.mrf.mxu1  ;;  %4420 = vtanh.f32 %v1455_v39 }
 0x169   :  { %1853 = vadd.xlane.f32.xlu1 %v1713_v36  ;;  %4422 = vtanh.f32 %v1463_v13  ;;  %v1468_v56 = vadd.f32 %v5093_v52, %v958_v45  ;;  %v950_v57 = vadd.f32 %v5033_v18, %v949_v37 }
 0x16a   :  { %v4403_v38 = vpop.eup %4402  ;;  %v3965_v41 = vpop.f32.mrf.mxu1  ;;  %4424 = vtanh.f32 %v1460_v50 }
 0x16b   :  { %v4405_v43 = vpop.eup %4404  ;;  %v1721_v46 = vmul.f32 %v4403_v38, %v5060_v55  ;;  %v961_v63 = vadd.f32 %v3965_v41, %v5033_v18  ;;  %4426 = vtanh.f32 %v1468_v56  ;;  %v1466_v3 = vadd.f32 %v5093_v52, %v950_v57 }
 0x16c   :  { %v952_v47 = vpop.f32.mrf.mxu1  ;;  %v1714_v53 = vmul.f32 %v4405_v43, %v5060_v55  ;;  %4428 = vtanh.f32 %v1461_v58 }
 0x16d   :  { %1859 = vadd.xlane.f32.xlu1 %v1716_v42  ;;  %1869 = vadd.xlane.f32.xlu0 %v1721_v46  ;;  %v1469_v11 = vadd.f32 %v5093_v52, %v961_v63  ;;  %v953_v15 = vadd.f32 %v5033_v18, %v952_v47  ;;  %4430 = vtanh.f32 %v1466_v3 }
 0x16e   :  { %v4407_v49 = vpop.eup %4406  ;;  %v3968_v51 = vpop.f32.mrf.mxu1 }
 0x16f   :  { %v4409_v54 = vpop.eup %4408  ;;  %v1722_v59 = vmul.f32 %v4407_v49, %v5060_v55  ;;  %4432 = vtanh.f32 %v1469_v11  ;;  %v1467_v27 = vadd.f32 %v5093_v52, %v953_v15  ;;  %v974_v28 = vadd.f32 %v3968_v51, %v5033_v18 }
 0x170   :  { %v4411_v60 = vpop.eup %4410  ;;  %v965_v61 = vpop.f32.mrf.mxu1  ;;  %v1719_v2 = vmul.f32 %v4409_v54, %v5060_v55 }
 0x171   :  { %1855 = vadd.xlane.f32.xlu1 %v1714_v53  ;;  %1871 = vadd.xlane.f32.xlu0 %v1722_v59  ;;  %v4413_v21 = vpop.eup %4412  ;;  %v1727_v6 = vmul.f32 %v4411_v60, %v5060_v55  ;;  %v1472_v52 = vadd.f32 %v5146_v10, %v974_v28  ;;  %v966_v37 = vadd.f32 %v5033_v18, %v965_v61 }
 0x172   :  { %v3969_v1 = vpop.f32.mrf.mxu1  ;;  %v4415_v7 = vpop.eup %4414  ;;  %v1717_v19 = vmul.f32 %v4413_v21, %v5060_v55 }
 0x173   :  { %v977_v5 = vadd.f32 %v3969_v1, %v5033_v18  ;;  %v4417_v20 = vpop.eup %4416  ;;  %v1725_v24 = vmul.f32 %v4415_v7, %v5060_v55  ;;  %v1470_v46 = vadd.f32 %v5146_v10, %v966_v37 }
 0x174   :  { %v968_v17 = vpop.f32.mrf.mxu1  ;;  %v4419_v25 = vpop.eup %4418  ;;  %v1720_v30 = vmul.f32 %v4417_v20, %v5060_v55 }
 0x175   :  { %1881 = vadd.xlane.f32.xlu0 %v1727_v6  ;;  %1865 = vadd.xlane.f32.xlu1 %v1719_v2  ;;  %v1473_v22 = vadd.f32 %v5146_v10, %v977_v5  ;;  %v969_v23 = vadd.f32 %v5033_v18, %v968_v17  ;;  %v4421_v31 = vpop.eup %4420  ;;  %v1728_v34 = vmul.f32 %v4419_v25, %v5060_v55 }
 0x176   :  { %v3972_v16 = vpop.f32.mrf.mxu1  ;;  %v4423_v35 = vpop.eup %4422  ;;  %v1718_v39 = vmul.f32 %v4421_v31, %v5060_v55  ;;  %v1396_v5 = vcombine.high %v5083_v44, %v5083_v44 }
 0x177   :  { %4434 = vtanh.f32 %v1473_v22  ;;  %v1471_v32 = vadd.f32 %v5146_v10, %v969_v23  ;;  %v4425_v40 = vpop.eup %4424  ;;  %v1726_v43 = vmul.f32 %v4423_v35, %v5060_v55  ;;  %v990_v47 = vadd.f32 %v3972_v16, %v5033_v18 }
 0x178   :  { %v981_v26 = vpop.f32.mrf.mxu1  ;;  %4436 = vtanh.f32 %v1467_v27  ;;  %v4427_v13 = vpop.eup %4426  ;;  %v1723_v50 = vmul.f32 %v4425_v40, %v5060_v55  ;;  %v5188_v44 = vrot.slane %v1396_v5, %v5024_v14 }
 0x179   :  { %1877 = vadd.xlane.f32.xlu0 %v1725_v24  ;;  %1861 = vadd.xlane.f32.xlu1 %v1717_v19  ;;  %v982_v33 = vadd.f32 %v5033_v18, %v981_v26  ;;  %4438 = vtanh.f32 %v1471_v32  ;;  %v4429_v48 = vpop.eup %4428  ;;  %v1731_v54 = vmul.f32 %v4427_v13, %v5060_v55  ;;  %v1476_v59 = vadd.f32 %v5146_v10, %v990_v47 }
 0x17a   :  { %v3973_v29 = vpop.f32.mrf.mxu1  ;;  %4440 = vtanh.f32 %v1472_v52  ;;  %v4431_v56 = vpop.eup %4430  ;;  %v1724_v62 = vmul.f32 %v4429_v48, %v5060_v55 }
 0x17b   :  { %v1474_v41 = vadd.f32 %v5146_v10, %v982_v33  ;;  %v993_v42 = vadd.f32 %v3973_v29, %v5033_v18  ;;  %v1729_v2 = vmul.f32 %v4431_v56, %v5060_v55 }
 0x17c   :  { %v984_v36 = vpop.f32.mrf.mxu1  ;;  %v4433_v58 = vpop.eup %4432 }
 0x17d   :  { %1883 = vadd.xlane.f32.xlu0 %v1728_v34  ;;  %1867 = vadd.xlane.f32.xlu1 %v1720_v30  ;;  %4442 = vtanh.f32 %v1474_v41  ;;  %v1477_v51 = vadd.f32 %v5146_v10, %v993_v42  ;;  %v985_v60 = vadd.f32 %v5033_v18, %v984_v36  ;;  %v1732_v16 = vmul.f32 %v4433_v58, %v5060_v55 }
 0x17e   :  { %v3976_v38 = vpop.f32.mrf.mxu1  ;;  %4444 = vtanh.f32 %v1470_v46 }
 0x17f   :  { %v1006_v53 = vadd.f32 %v3976_v38, %v5033_v18  ;;  %4446 = vtanh.f32 %v1477_v51  ;;  %v1475_v6 = vadd.f32 %v5146_v10, %v985_v60 }
 0x180   :  { %v997_v45 = vpop.f32.mrf.mxu1  ;;  %4448 = vtanh.f32 %v1476_v59 }
 0x181   :  { %1879 = vadd.xlane.f32.xlu0 %v1726_v43  ;;  %1863 = vadd.xlane.f32.xlu1 %v1718_v39  ;;  %v1480_v63 = vadd.f32 %v5146_v10, %v1006_v53  ;;  %v998_v1 = vadd.f32 %v5033_v18, %v997_v45 }
 0x182   :  { %v3977_v49 = vpop.f32.mrf.mxu1 }
 0x183   :  { %v1009_v7 = vadd.f32 %v3977_v49, %v5033_v18  ;;  %4450 = vtanh.f32 %v1480_v63  ;;  %v1478_v15 = vadd.f32 %v5146_v10, %v998_v1 }
 0x184   :  { %v1000_v57 = vpop.f32.mrf.mxu1  ;;  %v4435_v21 = vpop.eup %4434  ;;  %4452 = vtanh.f32 %v1475_v6 }
 0x185   :  { %1889 = vadd.xlane.f32.xlu0 %v1731_v54  ;;  %1873 = vadd.xlane.f32.xlu1 %v1723_v50  ;;  %v4437_v11 = vpop.eup %4436  ;;  %v1736_v19 = vmul.f32 %v4435_v21, %v5060_v55  ;;  %v1481_v23 = vadd.f32 %v5146_v10, %v1009_v7  ;;  %v1001_v24 = vadd.f32 %v5033_v18, %v1000_v57  ;;  %4454 = vtanh.f32 %v1478_v15 }
 0x186   :  { %v3980_v61 = vpop.f32.mrf.mxu1  ;;  %v4439_v20 = vpop.eup %4438  ;;  %v1730_v28 = vmul.f32 %v4437_v11, %v5060_v55 }
 0x187   :  { %v4441_v26 = vpop.eup %4440  ;;  %v1734_v29 = vmul.f32 %v4439_v20, %v5060_v55  ;;  %4456 = vtanh.f32 %v1481_v23  ;;  %v1479_v33 = vadd.f32 %v5146_v10, %v1001_v24  ;;  %v1022_v34 = vadd.f32 %v3980_v61, %v5033_v18 }
 0x188   :  { %v1013_v3 = vpop.f32.mrf.mxu1  ;;  %v1735_v37 = vmul.f32 %v4441_v26, %v5060_v55 }
 0x189   :  { %1885 = vadd.xlane.f32.xlu0 %v1729_v2  ;;  %1875 = vadd.xlane.f32.xlu1 %v1724_v62  ;;  %v1484_v43 = vadd.f32 %v5146_v10, %v1022_v34  ;;  %v1014_v13 = vadd.f32 %v5033_v18, %v1013_v3 }
 0x18a   :  { %v3981_v17 = vpop.f32.mrf.mxu1  ;;  %v4443_v30 = vpop.eup %4442 }
 0x18b   :  { %v4445_v36 = vpop.eup %4444  ;;  %v1737_v38 = vmul.f32 %v4443_v30, %v5060_v55  ;;  %v1482_v54 = vadd.f32 %v5146_v10, %v1014_v13  ;;  %v1025_v56 = vadd.f32 %v3981_v17, %v5033_v18 }
 0x18c   :  { %v5185_v22 = vpop.f32.mrf.mxu1  ;;  %v4447_v39 = vpop.eup %4446  ;;  %v1733_v46 = vmul.f32 %v4445_v36, %v5060_v55 }
 0x18d   :  { %1891 = vadd.xlane.f32.xlu0 %v1732_v16  ;;  %1899 = vadd.xlane.f32.xlu1 %v1736_v19  ;;  %v4449_v47 = vpop.eup %4448  ;;  %v1740_v48 = vmul.f32 %v4447_v39, %v5060_v55  ;;  %v1485_v2 = vadd.f32 %v5146_v10, %v1025_v56  ;;  %v1017_v21 = vadd.f32 %v5033_v18, %v5185_v22 }
 0x18e   :  { %v3984_v25 = vpop.f32.mrf.mxu1  ;;  %v1739_v59 = vmul.f32 %v4449_v47, %v5060_v55 }
 0x18f   :  { %v1038_v27 = vadd.f32 %v3984_v25, %v5033_v18  ;;  %v1483_v19 = vadd.f32 %v5146_v10, %v1017_v21 }
 0x190   :  { %v5195_v31 = vpop.f32.mrf.mxu1  ;;  %v4451_v51 = vpop.eup %4450 }
 0x191   :  { %v1488_v32 = vadd.f32 %v5188_v44, %v1038_v27  ;;  %1887 = vadd.xlane.f32.xlu0 %v1730_v28  ;;  %1895 = vadd.xlane.f32.xlu1 %v1734_v29  ;;  %v4453_v60 = vpop.eup %4452  ;;  %v1743_v58 = vmul.f32 %v4451_v51, %v5060_v55  ;;  %v1030_v20 = vadd.f32 %v5033_v18, %v5195_v31 }
 0x192   :  { %v3985_v35 = vpop.f32.mrf.mxu1  ;;  %v4455_v63 = vpop.eup %4454  ;;  %v1738_v5 = vmul.f32 %v4453_v60, %v5060_v55 }
 0x193   :  { %4458 = vtanh.f32 %v1488_v32  ;;  %v1041_v52 = vadd.f32 %v3985_v35, %v5033_v18  ;;  %v1741_v11 = vmul.f32 %v4455_v63, %v5060_v55  ;;  %v1486_v10 = vadd.f32 %v5188_v44, %v1030_v20 }
 0x194   :  { %v1032_v40 = vpop.f32.mrf.mxu1  ;;  %4460 = vtanh.f32 %v1479_v33  ;;  %v4457_v6 = vpop.eup %4456 }
 0x195   :  { %v1489_v41 = vadd.f32 %v5188_v44, %v1041_v52  ;;  %v1033_v42 = vadd.f32 %v5033_v18, %v1032_v40  ;;  %1897 = vadd.xlane.f32.xlu0 %v1735_v37  ;;  %1901 = vadd.xlane.f32.xlu1 %v1737_v38  ;;  %v1744_v23 = vmul.f32 %v4457_v6, %v5060_v55 }
 0x196   :  { %v3988_v45 = vpop.f32.mrf.mxu1  ;;  %v1349_v38 = vcombine.high %v5017_v12, %v5017_v12 }
 0x197   :  { %4462 = vtanh.f32 %v1489_v41  ;;  %v1487_v49 = vadd.f32 %v5188_v44, %v1033_v42  ;;  %v1054_v50 = vadd.f32 %v3988_v45, %v5033_v18 }
 0x198   :  { %v1045_v53 = vpop.f32.mrf.mxu1  ;;  %4464 = vtanh.f32 %v1484_v43 }
 0x199   :  { %1893 = vadd.xlane.f32.xlu0 %v1733_v46  ;;  %1907 = vadd.xlane.f32.xlu1 %v1740_v48  ;;  %4466 = vtanh.f32 %v1487_v49  ;;  %v1492_v61 = vadd.f32 %v5188_v44, %v1054_v50  ;;  %v1046_v30 = vadd.f32 %v5033_v18, %v1045_v53  ;;  %v5246_v49 = vrot.slane %v1349_v38, %v5015_v9 }
 0x19a   :  { %v3989_v57 = vpop.f32.mrf.mxu1  ;;  %4468 = vtanh.f32 %v1482_v54 }
 0x19b   :  { %v1057_v62 = vadd.f32 %v3989_v57, %v5033_v18  ;;  %4470 = vtanh.f32 %v1492_v61  ;;  %v1490_v39 = vadd.f32 %v5188_v44, %v1046_v30 }
 0x19c   :  { %v1048_v1 = vpop.f32.mrf.mxu1  ;;  %4472 = vtanh.f32 %v1485_v2 }
 0x19d   :  { %1905 = vadd.xlane.f32.xlu0 %v1739_v59  ;;  %1913 = vadd.xlane.f32.xlu1 %v1743_v58  ;;  %v1493_v7 = vadd.f32 %v5188_v44, %v1057_v62  ;;  %v1049_v40 = vadd.f32 %v5033_v18, %v1048_v1  ;;  %v5256_v62 = vrot.slane %v5246_v49, %v5015_v9 }
 0x19e   :  { %v3992_v3 = vpop.f32.mrf.mxu1 }
 0x19f   :  { %v1070_v17 = vadd.f32 %v3992_v3, %v5033_v18  ;;  %4474 = vtanh.f32 %v1493_v7  ;;  %v1491_v50 = vadd.f32 %v5188_v44, %v1049_v40 }
 0x1a0   :  { %v4459_v15 = vpop.eup %4458  ;;  %v1061_v16 = vpop.f32.mrf.mxu1  ;;  %4476 = vtanh.f32 %v1483_v19 }
 0x1a1   :  { %1903 = vadd.xlane.f32.xlu0 %v1738_v5  ;;  %1909 = vadd.xlane.f32.xlu1 %v1741_v11  ;;  %v4461_v24 = vpop.eup %4460  ;;  %v1496_v25 = vadd.f32 %v5188_v44, %v1070_v17  ;;  %v1062_v26 = vadd.f32 %v5033_v18, %v1061_v16  ;;  %v1751_v27 = vmul.f32 %v4459_v15, %v5060_v55 }
 0x1a2   :  { %v3993_v22 = vpop.f32.mrf.mxu1  ;;  %v1742_v32 = vmul.f32 %v4461_v24, %v5060_v55  ;;  %v5266_v11 = vrot.slane %v5256_v62, %v5024_v14 }
 0x1a3   :  { %4478 = vtanh.f32 %v1496_v25  ;;  %v1494_v34 = vadd.f32 %v5188_v44, %v1062_v26  ;;  %v1073_v35 = vadd.f32 %v3993_v22, %v5033_v18 }
 0x1a4   :  { %v4463_v28 = vpop.eup %4462  ;;  %v1064_v29 = vpop.f32.mrf.mxu1  ;;  %4480 = vtanh.f32 %v1486_v10 }
 0x1a5   :  { %1915 = vadd.xlane.f32.xlu1 %v1744_v23  ;;  %1929 = vadd.xlane.f32.xlu0 %v1751_v27  ;;  %v4465_v33 = vpop.eup %4464  ;;  %v1752_v36 = vmul.f32 %v4463_v28, %v5060_v55  ;;  %4482 = vtanh.f32 %v1494_v34  ;;  %v1497_v13 = vadd.f32 %v5188_v44, %v1073_v35  ;;  %v1065_v45 = vadd.f32 %v5033_v18, %v1064_v29 }
 0x1a6   :  { %v3996_v31 = vpop.f32.mrf.mxu1  ;;  %v4467_v52 = vpop.eup %4466  ;;  %v1747_v42 = vmul.f32 %v4465_v33, %v5060_v55  ;;  %4484 = vtanh.f32 %v1490_v39 }
 0x1a7   :  { %v4469_v43 = vpop.eup %4468  ;;  %v1750_v46 = vmul.f32 %v4467_v52, %v5060_v55  ;;  %v1086_v48 = vadd.f32 %v3996_v31, %v5033_v18  ;;  %4486 = vtanh.f32 %v1497_v13  ;;  %v1495_v56 = vadd.f32 %v5188_v44, %v1065_v45 }
 0x1a8   :  { %v1077_v37 = vpop.f32.mrf.mxu1  ;;  %v4471_v47 = vpop.eup %4470  ;;  %v1745_v53 = vmul.f32 %v4469_v43, %v5060_v55  ;;  %4488 = vtanh.f32 %v1491_v50 }
 0x1a9   :  { %1911 = vadd.xlane.f32.xlu1 %v1742_v32  ;;  %1931 = vadd.xlane.f32.xlu0 %v1752_v36  ;;  %v4473_v54 = vpop.eup %4472  ;;  %v1755_v59 = vmul.f32 %v4471_v47, %v5060_v55  ;;  %v1500_v58 = vadd.f32 %v5188_v44, %v1086_v48  ;;  %v1078_v63 = vadd.f32 %v5033_v18, %v1077_v37  ;;  %4490 = vtanh.f32 %v1495_v56 }
 0x1aa   :  { %v3997_v41 = vpop.f32.mrf.mxu1  ;;  %v1748_v2 = vmul.f32 %v4473_v54, %v5060_v55 }
 0x1ab   :  { %v1089_v57 = vadd.f32 %v3997_v41, %v5033_v18  ;;  %4492 = vtanh.f32 %v1500_v58  ;;  %v1498_v15 = vadd.f32 %v5188_v44, %v1078_v63 }
 0x1ac   :  { %v1080_v12 = vpop.f32.mrf.mxu1  ;;  %v4475_v60 = vpop.eup %4474 }
 0x1ad   :  { %1921 = vadd.xlane.f32.xlu1 %v1747_v42  ;;  %1927 = vadd.xlane.f32.xlu0 %v1750_v46  ;;  %v4477_v21 = vpop.eup %4476  ;;  %v1501_v3 = vadd.f32 %v5188_v44, %v1089_v57  ;;  %v1756_v6 = vmul.f32 %v4475_v60, %v5060_v55  ;;  %v1081_v16 = vadd.f32 %v5033_v18, %v1080_v12 }
 0x1ae   :  { %v4000_v51 = vpop.f32.mrf.mxu1  ;;  %v1746_v20 = vmul.f32 %v4477_v21, %v5060_v55 }
 0x1af   :  { %v1102_v5 = vadd.f32 %v4000_v51, %v5033_v18  ;;  %4494 = vtanh.f32 %v1501_v3  ;;  %v1499_v28 = vadd.f32 %v5188_v44, %v1081_v16 }
 0x1b0   :  { %v1093_v61 = vpop.f32.mrf.mxu1  ;;  %v4479_v7 = vpop.eup %4478  ;;  %4496 = vtanh.f32 %v1498_v15 }
 0x1b1   :  { %1917 = vadd.xlane.f32.xlu1 %v1745_v53  ;;  %1937 = vadd.xlane.f32.xlu0 %v1755_v59  ;;  %v4481_v22 = vpop.eup %4480  ;;  %v1504_v23 = vadd.f32 %v5266_v11, %v1102_v5  ;;  %v1094_v24 = vadd.f32 %v5033_v18, %v1093_v61  ;;  %v1759_v25 = vmul.f32 %v4479_v7, %v5060_v55 }
 0x1b2   :  { %v4001_v1 = vpop.f32.mrf.mxu1  ;;  %v4483_v26 = vpop.eup %4482  ;;  %v1749_v30 = vmul.f32 %v4481_v22, %v5060_v55  ;;  %v1365_v5 = vcombine.high %v5246_v49, %v5246_v49 }
 0x1b3   :  { %v1105_v29 = vadd.f32 %v4001_v1, %v5033_v18  ;;  %v4485_v31 = vpop.eup %4484  ;;  %4498 = vtanh.f32 %v1504_v23  ;;  %v1502_v32 = vadd.f32 %v5266_v11, %v1094_v24  ;;  %v1757_v34 = vmul.f32 %v4483_v26, %v5060_v55  ;;  %v5299_v1 = vld [vmem:[%s6078_s4] ss:$0 sm:$0xff] }
 0x1b4   :  { %v1096_v17 = vpop.f32.mrf.mxu1  ;;  %v4487_v35 = vpop.eup %4486  ;;  %4500 = vtanh.f32 %v1499_v28  ;;  %v1753_v38 = vmul.f32 %v4485_v31, %v5060_v55  ;;  %v5314_v24 = vrot.slane %v1365_v5, %v5015_v9  ;;  %v5321_v28 = vand.u32 127, %v1353_v4 }
 0x1b5   :  { %1923 = vadd.xlane.f32.xlu1 %v1748_v2  ;;  %1939 = vadd.xlane.f32.xlu0 %v1756_v6  ;;  %v1505_v44 = vadd.f32 %v5266_v11, %v1105_v29  ;;  %v1097_v52 = vadd.f32 %v5033_v18, %v1096_v17  ;;  %v4489_v39 = vpop.eup %4488  ;;  %4502 = vtanh.f32 %v1502_v32  ;;  %v1760_v42 = vmul.f32 %v4487_v35, %v5060_v55 }
 0x1b6   :  { %v4004_v19 = vpop.f32.mrf.mxu1  ;;  %v4491_v43 = vpop.eup %4490  ;;  %v1754_v12 = vmul.f32 %v4489_v39, %v5060_v55  ;;  %v2227_v35 = vadd.s32 4294967280, %v5321_v28  ;;  %v5333_v4 = vrot.slane %v5314_v24, %v5024_v14 }
 0x1b7   :  { %v1118_v33 = vadd.f32 %v4004_v19, %v5033_v18  ;;  %4504 = vtanh.f32 %v1505_v44  ;;  %v1503_v45 = vadd.f32 %v5266_v11, %v1097_v52  ;;  %v1758_v53 = vmul.f32 %v4491_v43, %v5060_v55 }
 0x1b8   :  { %v1109_v27 = vpop.f32.mrf.mxu1  ;;  %v4493_v50 = vpop.eup %4492  ;;  %v2234_v44 = vadd.s32 4294967272, %v5321_v28 }
 0x1b9   :  { %1919 = vadd.xlane.f32.xlu1 %v1746_v20  ;;  %1945 = vadd.xlane.f32.xlu0 %v1759_v25  ;;  %v1508_v40 = vadd.f32 %v5266_v11, %v1118_v33  ;;  %v1110_v46 = vadd.f32 %v5033_v18, %v1109_v27  ;;  %v1763_v61 = vmul.f32 %v4493_v50, %v5060_v55 }
 0x1ba   :  { %v4005_v10 = vpop.f32.mrf.mxu1  ;;  %v5356_v50 = vsub.s32 %v2227_v35, %v5012_v8 }
 0x1bb   :  { %v1121_v41 = vadd.f32 %v4005_v10, %v5033_v18  ;;  %4506 = vtanh.f32 %v1508_v40  ;;  %v1506_v59 = vadd.f32 %v5266_v11, %v1110_v46  ;;  %v5342_v40 = vsub.s32 %v5321_v28, %v5012_v8 }
 0x1bc   :  { %v1112_v36 = vpop.f32.mrf.mxu1  ;;  %v4495_v54 = vpop.eup %4494  ;;  %4508 = vtanh.f32 %v1503_v45 }
 0x1bd   :  { %1941 = vadd.xlane.f32.xlu0 %v1757_v34  ;;  %1925 = vadd.xlane.f32.xlu1 %v1749_v30  ;;  %v1509_v48 = vadd.f32 %v5266_v11, %v1121_v41  ;;  %v1113_v51 = vadd.f32 %v5033_v18, %v1112_v36  ;;  %v4497_v58 = vpop.eup %4496  ;;  %v2241_v36 = vadd.s32 4294967264, %v5321_v28 }
 0x1be   :  { %v4008_v37 = vpop.f32.mrf.mxu1  ;;  %v1761_v20 = vmul.f32 %v4497_v58, %v5060_v55 }
 0x1bf   :  { %v1134_v57 = vadd.f32 %v4008_v37, %v5033_v18  ;;  %4510 = vtanh.f32 %v1509_v48  ;;  %v1507_v63 = vadd.f32 %v5266_v11, %v1113_v51  ;;  %v1764_v18 = vmul.f32 %v4495_v54, %v5060_v55 }
 0x1c0   :  { %v1125_v13 = vpop.f32.mrf.mxu1  ;;  %v4499_v21 = vpop.eup %4498  ;;  %4512 = vtanh.f32 %v1506_v59  ;;  %v2220_v37 = vadd.s32 4294967288, %v5321_v28  ;;  %v5366_v54 = vsub.s32 %v2234_v44, %v5012_v8  ;;  %v5375_v59 = vadd.s32 4294967216, %v5321_v28 }
 0x1c1   :  { %1947 = vadd.xlane.f32.xlu0 %v1760_v42  ;;  %1933 = vadd.xlane.f32.xlu1 %v1753_v38  ;;  %v1512_v6 = vadd.f32 %v5266_v11, %v1134_v57  ;;  %v1126_v7 = vadd.f32 %v5299_v1, %v1125_v13  ;;  %v4501_v16 = vpop.eup %4500  ;;  %4514 = vtanh.f32 %v1507_v63  ;;  %v1767_v22 = vmul.f32 %v4499_v21, %v5060_v55  ;;  %v5350_v13 = vld [vmem:[%s6079_s5] ss:$0 sm:$0xff] }
 0x1c2   :  { %v4009_v47 = vpop.f32.mrf.mxu1  ;;  %v4503_v23 = vpop.eup %4502  ;;  %v1762_v30 = vmul.f32 %v4501_v16, %v5060_v55  ;;  %v5372_v57 = vsub.s32 %v2220_v37, %v5012_v8  ;;  %v2255_v63 = vadd.s32 4294967248, %v5321_v28  ;;  %v2262_v16 = vadd.s32 4294967240, %v5321_v28 }
 0x1c3   :  { %4516 = vtanh.f32 %v1512_v6  ;;  %v1510_v25 = vadd.f32 %v5266_v11, %v1126_v7  ;;  %v1137_v26 = vadd.f32 %v5299_v1, %v4009_v47  ;;  %v1765_v31 = vmul.f32 %v4503_v23, %v5060_v55 }
 0x1c4   :  { %v1128_v56 = vpop.f32.mrf.mxu1  ;;  %v4505_v29 = vpop.eup %4504  ;;  %v2248_v55 = vadd.s32 4294967256, %v5321_v28 }
 0x1c5   :  { %1943 = vadd.xlane.f32.xlu0 %v1758_v53  ;;  %1935 = vadd.xlane.f32.xlu1 %v1754_v12  ;;  %v1513_v38 = vadd.f32 %v5266_v11, %v1137_v26  ;;  %v1129_v39 = vadd.f32 %v5299_v1, %v1128_v56  ;;  %v1768_v45 = vmul.f32 %v5350_v13, %v4505_v29 }
 0x1c6   :  { %v4012_v60 = vpop.f32.mrf.mxu1  ;;  %v5363_v53 = vsub.s32 %v2241_v36, %v5012_v8  ;;  %v5369_v56 = vsub.s32 %v2248_v55, %v5012_v8 }
 0x1c7   :  { %v1150_v2 = vadd.f32 %v5299_v1, %v4012_v60  ;;  %v1511_v60 = vadd.f32 %v5266_v11, %v1129_v39 }
 0x1c8   :  { %v1141_v3 = vpop.f32.mrf.mxu1  ;;  %v4507_v32 = vpop.eup %4506 }
 0x1c9   :  { %1953 = vadd.xlane.f32.xlu0 %v1763_v61  ;;  %1955 = vadd.xlane.f32.xlu1 %v1764_v18  ;;  %v1516_v17 = vadd.f32 %v5266_v11, %v1150_v2  ;;  %v4509_v42 = vpop.eup %4508  ;;  %v1771_v46 = vmul.f32 %v5350_v13, %v4507_v32  ;;  %v1142_v12 = vadd.f32 %v5299_v1, %v1141_v3 }
 0x1ca   :  { %v4013_v15 = vpop.f32.mrf.mxu1  ;;  %v1766_v21 = vmul.f32 %v5350_v13, %v4509_v42 }
 0x1cb   :  { %v1153_v19 = vadd.f32 %v5299_v1, %v4013_v15  ;;  %4518 = vtanh.f32 %v1516_v17  ;;  %v1514_v6 = vadd.f32 %v5266_v11, %v1142_v12  ;;  %v2269_v15 = vadd.s32 4294967232, %v5321_v28 }
 0x1cc   :  { %v5311_v49 = vpop.f32.mrf.mxu1  ;;  %4520 = vtanh.f32 %v1510_v25  ;;  %v4511_v47 = vpop.eup %4510 }
 0x1cd   :  { %1949 = vadd.xlane.f32.xlu0 %v1761_v20  ;;  %1961 = vadd.xlane.f32.xlu1 %v1767_v22  ;;  %v1517_v10 = vadd.f32 %v5266_v11, %v1153_v19  ;;  %v4513_v2 = vpop.eup %4512  ;;  %v1772_v3 = vmul.f32 %v5350_v13, %v4511_v47  ;;  %v1145_v19 = vadd.f32 %v5299_v1, %v5311_v49 }
 0x1ce   :  { %v5318_v27 = vpop.f32.mrf.mxu1  ;;  %v5326_v33 = vpop.xlane.xlu0 %1829  ;;  %v1769_v29 = vmul.f32 %v5350_v13, %v4513_v2  ;;  %v5401_v44 = vsub.s32 %v2269_v15, %v5012_v8 }
 0x1cf   :  { %4522 = vtanh.f32 %v1517_v10  ;;  %v4515_v5 = vpop.eup %4514  ;;  %v5393_v10 = vsub.s32 %v2255_v63, %v5012_v8  ;;  %v1515_v55 = vadd.f32 %v5266_v11, %v1145_v19  ;;  %v2219_v37 = vrot.slane %v5326_v33, %v5342_v40 }
 0x1d0   :  { %v1157_v34 = vpop.f32.mrf.mxu1  ;;  %4524 = vtanh.f32 %v1513_v38  ;;  %v4517_v23 = vpop.eup %4516  ;;  %v1770_v32 = vmul.f32 %v5350_v13, %v4515_v5 }
 0x1d1   :  { %v1158_v52 = vadd.f32 %v5299_v1, %v1157_v34  ;;  %1951 = vadd.xlane.f32.xlu0 %v1762_v30  ;;  %1957 = vadd.xlane.f32.xlu1 %v1765_v31  ;;  %v1166_v34 = vadd.f32 %v5299_v1, %v5318_v27 }
 0x1d2   :  { %v5344_v41 = vpop.f32.mrf.mxu1  ;;  %v5358_v48 = vpop.xlane.xlu0 %1833 }
 0x1d3   :  { %v1518_v43 = vadd.f32 %v5333_v4, %v1158_v52  ;;  %v5404_v52 = vsub.s32 %v2262_v16, %v5012_v8  ;;  %v2231_v27 = vrot.slane %v5358_v48, %v5356_v50  ;;  %v1520_v48 = vadd.f32 %v5333_v4, %v1166_v34 }
 0x1d4   :  { %v5360_v51 = vpop.f32.mrf.mxu1 }
 0x1d5   :  { %1963 = vadd.xlane.f32.xlu0 %v1768_v45  ;;  %1969 = vadd.xlane.f32.xlu1 %v1771_v46  ;;  %4526 = vtanh.f32 %v1518_v43  ;;  %v1775_v46 = vmul.f32 %v5350_v13, %v4517_v23 }
 0x1d6   :  { %v4020_v61 = vpop.f32.mrf.mxu1  ;;  %v5378_v58 = vpop.xlane.xlu1 %1837  ;;  %4528 = vtanh.f32 %v1511_v60 }
 0x1d7   :  { %v1182_v18 = vadd.f32 %v5299_v1, %v4020_v61  ;;  %v1836_v7 = vpop.xlane.xlu0 %1835  ;;  %v2245_v61 = vrot.slane %v5378_v58, %v5363_v53 }
 0x1d8   :  { %v1173_v17 = vpop.f32.mrf.mxu1  ;;  %v4519_v30 = vpop.eup %4518  ;;  %v2238_v39 = vrot.slane %v1836_v7, %v5366_v54 }
 0x1d9   :  { %v1524_v20 = vadd.f32 %v5333_v4, %v1182_v18  ;;  %v1174_v22 = vadd.f32 %v5299_v1, %v1173_v17  ;;  %1959 = vadd.xlane.f32.xlu0 %v1766_v21  ;;  %1971 = vadd.xlane.f32.xlu1 %v1772_v3  ;;  %v1779_v45 = vmul.f32 %v5350_v13, %v4519_v30  ;;  %v4521_v11 = vpop.eup %4520  ;;  %v2276_v21 = vadd.s32 4294967224, %v5321_v28 }
 0x1da   :  { %v4021_v25 = vpop.f32.mrf.mxu1  ;;  %v1840_v26 = vpop.xlane.xlu1 %1839  ;;  %v1169_v3 = vadd.f32 %v5299_v1, %v5344_v41  ;;  %v1773_v19 = vmul.f32 %v5350_v13, %v4521_v11  ;;  %v2290_v30 = vadd.s32 4294967208, %v5321_v28  ;;  %v5453_v11 = vsub.s32 %v5375_v59, %v5012_v8 }
 0x1db   :  { %4530 = vtanh.f32 %v1524_v20  ;;  %v1522_v49 = vadd.f32 %v5333_v4, %v1174_v22  ;;  %v1185_v31 = vadd.f32 %v5299_v1, %v4021_v25  ;;  %v1832_v35 = vpop.xlane.xlu0 %1831  ;;  %v2252_v5 = vrot.slane %v1840_v26, %v5369_v56 }
 0x1dc   :  { %v1176_v36 = vpop.f32.mrf.mxu1  ;;  %4532 = vtanh.f32 %v1514_v6  ;;  %v2224_v38 = vrot.slane %v1832_v35, %v5372_v57  ;;  %v4523_v60 = vpop.eup %4522 }
 0x1dd   :  { %1965 = vadd.xlane.f32.xlu0 %v1769_v29  ;;  %1967 = vadd.xlane.f32.xlu1 %v1770_v32  ;;  %4534 = vtanh.f32 %v1522_v49  ;;  %v1525_v33 = vadd.f32 %v5333_v4, %v1185_v31  ;;  %v1177_v12 = vadd.f32 %v5299_v1, %v1176_v36  ;;  %v4525_v20 = vpop.eup %4524  ;;  %v1780_v23 = vmul.f32 %v5350_v13, %v4523_v60 }
 0x1de   :  { %v4024_v42 = vpop.f32.mrf.mxu1  ;;  %v5413_v43 = vpop.xlane.xlu1 %1849  ;;  %v2226_v47 = vsel %vm2225_vm1, %v2224_v38, %v2219_v37  ;;  %4536 = vtanh.f32 %v1515_v55  ;;  %v5438_v49 = vsub.s32 %v2276_v21, %v5012_v8  ;;  %v1521_v31 = vadd.f32 %v5333_v4, %v1169_v3 }
 0x1df   :  { %v2233_v63 = vsel %vm2232_vm2, %v2231_v27, %v2226_v47  ;;  %v1842_v2 = vpop.xlane.xlu0 %1841  ;;  %v1198_v7 = vadd.f32 %v5299_v1, %v4024_v42  ;;  %4538 = vtanh.f32 %v1525_v33  ;;  %v1523_v41 = vadd.f32 %v5333_v4, %v1177_v12 }
 0x1e0   :  { %v1189_v18 = vpop.f32.mrf.mxu1  ;;  %v2240_v6 = vsel %vm2239_vm3, %v2238_v39, %v2233_v63  ;;  %v2259_v17 = vrot.slane %v1842_v2, %v5393_v10  ;;  %4540 = vtanh.f32 %v1520_v48  ;;  %v1161_v32 = vadd.f32 %v5299_v1, %v5360_v51 }
 0x1e1   :  { %1985 = vadd.xlane.f32.xlu0 %v1779_v45  ;;  %1977 = vadd.xlane.f32.xlu1 %v1775_v46  ;;  %v2247_v58 = vsel %vm2246_vm4, %v2245_v61, %v2240_v6  ;;  %v1528_v35 = vadd.f32 %v5333_v4, %v1198_v7  ;;  %v1190_v55 = vadd.f32 %v5299_v1, %v1189_v18  ;;  %4542 = vtanh.f32 %v1523_v41 }
 0x1e2   :  { %v4025_v15 = vpop.f32.mrf.mxu1  ;;  %v1846_v16 = vpop.xlane.xlu1 %1845  ;;  %v2254_v22 = vsel %vm2253_vm5, %v2252_v5, %v2247_v58  ;;  %v1776_v51 = vmul.f32 %v5350_v13, %v4525_v20  ;;  %v5456_v33 = vsub.s32 %v2290_v30, %v5012_v8  ;;  %4544 = vtanh.f32 %v1521_v31 }
 0x1e3   :  { %v4527_v25 = vpop.eup %4526  ;;  %v1844_v26 = vpop.xlane.xlu0 %1843  ;;  %v2261_v36 = vsel %vm2260_vm6, %v2259_v17, %v2254_v22  ;;  %v2273_v37 = vrot.slane %v1846_v16, %v5401_v44  ;;  %v1519_v60 = vadd.f32 %v5333_v4, %v1161_v32  ;;  %v1201_v48 = vadd.f32 %v5299_v1, %v4025_v15 }
 0x1e4   :  { %v1192_v29 = vpop.f32.mrf.mxu1  ;;  %v2266_v34 = vrot.slane %v1844_v26, %v5404_v52  ;;  %v4529_v39 = vpop.eup %4528  ;;  %v1781_v45 = vmul.f32 %v5350_v13, %v4527_v25  ;;  %4546 = vtanh.f32 %v1528_v35  ;;  %v1526_v63 = vadd.f32 %v5333_v4, %v1190_v55 }
 0x1e5   :  { %1987 = vadd.xlane.f32.xlu0 %v1780_v23  ;;  %1973 = vadd.xlane.f32.xlu1 %v1773_v19  ;;  %v1774_v3 = vmul.f32 %v5350_v13, %v4529_v39  ;;  %v2297_v6 = vadd.s32 4294967200, %v5321_v28  ;;  %v2287_v58 = vrot.slane %v5413_v43, %v5453_v11  ;;  %4548 = vtanh.f32 %v1519_v60 }
 0x1e6   :  { %v4028_v38 = vpop.f32.mrf.mxu1  ;;  %v1852_v27 = vpop.xlane.xlu1 %1851  ;;  %v2268_v42 = vsel %vm2267_vm7, %v2266_v34, %v2261_v36  ;;  %v1529_v15 = vadd.f32 %v5333_v4, %v1201_v48  ;;  %v1193_v16 = vadd.f32 %v5299_v1, %v1192_v29  ;;  %4550 = vtanh.f32 %v1526_v63 }
 0x1e7   :  { %v2275_v12 = vsel %vm2274_vm8, %v2273_v37, %v2268_v42  ;;  %v1214_v59 = vadd.f32 %v5299_v1, %v4028_v38  ;;  %v2294_v22 = vrot.slane %v1852_v27, %v5456_v33  ;;  %v5481_v31 = vsub.s32 %v2297_v6, %v5012_v8 }
 0x1e8   :  { %v4531_v46 = vpop.eup %4530  ;;  %v1205_v47 = vpop.f32.mrf.mxu1  ;;  %v1395_v36 = vcombine.high %v5256_v62, %v5256_v62  ;;  %4552 = vtanh.f32 %v1529_v15  ;;  %v2304_v55 = vadd.s32 4294967192, %v5321_v28  ;;  %v1527_v38 = vadd.f32 %v5333_v4, %v1193_v16 }
 0x1e9   :  { %1979 = vadd.xlane.f32.xlu1 %v1776_v51  ;;  %1989 = vadd.xlane.f32.xlu0 %v1781_v45  ;;  %v4533_v61 = vpop.eup %4532  ;;  %v1787_v5 = vmul.f32 %v5350_v13, %v4531_v46  ;;  %v1532_v41 = vadd.f32 %v5333_v4, %v1214_v59  ;;  %v1206_v27 = vadd.f32 %v5299_v1, %v1205_v47 }
 0x1ea   :  { %v4029_v2 = vpop.f32.mrf.mxu1  ;;  %v1848_v18 = vpop.xlane.xlu1 %1847  ;;  %v1777_v30 = vmul.f32 %v5350_v13, %v4533_v61  ;;  %v2311_v61 = vadd.s32 4294967184, %v5321_v28  ;;  %v5499_v47 = vrot.slane %v1395_v36, %v5024_v14 }
 0x1eb   :  { %v2280_v21 = vrot.slane %v1848_v18, %v5438_v49  ;;  %v4535_v7 = vpop.eup %4534  ;;  %4554 = vtanh.f32 %v1532_v41  ;;  %v1217_v48 = vadd.f32 %v5299_v1, %v4029_v2  ;;  %v2318_v18 = vadd.s32 4294967176, %v5321_v28 }
 0x1ec   :  { %v1208_v17 = vpop.f32.mrf.mxu1  ;;  %v4537_v20 = vpop.eup %4536  ;;  %v1785_v29 = vmul.f32 %v5350_v13, %v4535_v7  ;;  %4556 = vtanh.f32 %v1527_v38  ;;  %v5506_v7 = vsub.s32 %v2304_v55, %v5012_v8  ;;  %v5515_v41 = vsub.s32 %v2311_v61, %v5012_v8 }
 0x1ed   :  { %v2282_v19 = vsel %vm2281_vm9, %v2280_v21, %v2275_v12  ;;  %1975 = vadd.xlane.f32.xlu1 %v1774_v3  ;;  %2001 = vadd.xlane.f32.xlu0 %v1787_v5  ;;  %v1209_v26 = vadd.f32 %v5299_v1, %v1208_v17  ;;  %v4539_v32 = vpop.eup %4538  ;;  %v1778_v51 = vmul.f32 %v5350_v13, %v4537_v20 }
 0x1ee   :  { %v2289_v23 = vsel %vm2288_vm10, %v2287_v58, %v2282_v19  ;;  %v4032_v43 = vpop.f32.mrf.mxu1  ;;  %v5475_v25 = vpop.xlane.xlu1 %1857  ;;  %v1788_v12 = vmul.f32 %v5350_v13, %v4539_v32  ;;  %v1530_v3 = vadd.f32 %v5333_v4, %v1206_v27  ;;  %v1533_v20 = vadd.f32 %v5333_v4, %v1217_v48 }
 0x1ef   :  { %v2296_v35 = vsel %vm2295_vm11, %v2294_v22, %v2289_v23  ;;  %v4541_v37 = vpop.eup %4540  ;;  %v1531_v45 = vadd.f32 %v5333_v4, %v1209_v26  ;;  %v5518_v23 = vsub.s32 %v2318_v18, %v5012_v8 }
 0x1f0   :  { %v5483_v34 = vpop.f32.mrf.mxu1  ;;  %v4543_v60 = vpop.eup %4542  ;;  %v1783_v2 = vmul.f32 %v5350_v13, %v4541_v37 }
 0x1f1   :  { %1981 = vadd.xlane.f32.xlu1 %v1777_v30  ;;  %1997 = vadd.xlane.f32.xlu0 %v1785_v29  ;;  %v4545_v21 = vpop.eup %4544  ;;  %4558 = vtanh.f32 %v1531_v45  ;;  %v1786_v19 = vmul.f32 %v5350_v13, %v4543_v60  ;;  %v1230_v30 = vadd.f32 %v5299_v1, %v4032_v43  ;;  %v2315_v43 = vrot.slane %v5475_v25, %v5515_v41 }
 0x1f2   :  { %v4033_v39 = vpop.f32.mrf.mxu1  ;;  %v1854_v42 = vpop.xlane.xlu1 %1853  ;;  %4560 = vtanh.f32 %v1530_v3 }
 0x1f3   :  { %v1233_v62 = vadd.f32 %v5299_v1, %v4033_v39  ;;  %v2301_v46 = vrot.slane %v1854_v42, %v5481_v31  ;;  %v4547_v58 = vpop.eup %4546 }
 0x1f4   :  { %v1224_v63 = vpop.f32.mrf.mxu1  ;;  %v4549_v26 = vpop.eup %4548  ;;  %v1791_v4 = vmul.f32 %v5350_v13, %v4547_v58 }
 0x1f5   :  { %v2303_v59 = vsel %vm2302_vm12, %v2301_v46, %v2296_v35  ;;  %1983 = vadd.xlane.f32.xlu1 %v1778_v51  ;;  %2003 = vadd.xlane.f32.xlu0 %v1788_v12  ;;  %v1537_v17 = vadd.f32 %v5499_v47, %v1233_v62  ;;  %v1225_v15 = vadd.f32 %v5299_v1, %v1224_v63  ;;  %v4551_v36 = vpop.eup %4550 }
 0x1f6   :  { %v4036_v5 = vpop.f32.mrf.mxu1  ;;  %v1860_v6 = vpop.xlane.xlu1 %1859  ;;  %v1784_v35 = vmul.f32 %v5350_v13, %v4545_v21  ;;  %v1782_v51 = vmul.f32 %v5350_v13, %v4549_v26  ;;  %v1536_v62 = vadd.f32 %v5499_v47, %v1230_v30  ;;  %v1222_v46 = vadd.f32 %v5299_v1, %v5483_v34 }
 0x1f7   :  { %v5510_v16 = vpop.xlane.xlu0 %1869  ;;  %4562 = vtanh.f32 %v1537_v17  ;;  %v1535_v55 = vadd.f32 %v5499_v47, %v1225_v15  ;;  %v1246_v8 = vadd.f32 %v5299_v1, %v4036_v5  ;;  %v2322_v39 = vrot.slane %v1860_v6, %v5518_v23  ;;  %v4553_v45 = vpop.eup %4552 }
 0x1f8   :  { %v1237_v22 = vpop.f32.mrf.mxu1  ;;  %4564 = vtanh.f32 %v1533_v20  ;;  %v1789_v48 = vmul.f32 %v5350_v13, %v4551_v36  ;;  %v4555_v61 = vpop.eup %4554  ;;  %v1534_v34 = vadd.f32 %v5499_v47, %v1222_v46  ;;  %v1792_v20 = vmul.f32 %v5350_v13, %v4553_v45 }
 0x1f9   :  { %1993 = vadd.xlane.f32.xlu1 %v1783_v2  ;;  %1999 = vadd.xlane.f32.xlu0 %v1786_v19  ;;  %4566 = vtanh.f32 %v1535_v55  ;;  %v1540_v63 = vadd.f32 %v5499_v47, %v1246_v8  ;;  %v4557_v58 = vpop.eup %4556  ;;  %v1795_v19 = vmul.f32 %v5350_v13, %v4555_v61  ;;  %v1397_v30 = vcombine.high %v5314_v24, %v5314_v24 }
 0x1fa   :  { %v4037_v29 = vpop.f32.mrf.mxu1  ;;  %v1856_v32 = vpop.xlane.xlu1 %1855  ;;  %4568 = vtanh.f32 %v1536_v62 }
 0x1fb   :  { %v2308_v37 = vrot.slane %v1856_v32, %v5506_v7  ;;  %v5526_v38 = vpop.xlane.xlu0 %1871  ;;  %v1249_v5 = vadd.f32 %v5299_v1, %v4037_v29  ;;  %4570 = vtanh.f32 %v1540_v63 }
 0x1fc   :  { %v1240_v27 = vpop.f32.mrf.mxu1  ;;  %4572 = vtanh.f32 %v1534_v34 }
 0x1fd   :  { %v2310_v42 = vsel %vm2309_vm13, %v2308_v37, %v2303_v59  ;;  %1995 = vadd.xlane.f32.xlu1 %v1784_v35  ;;  %2009 = vadd.xlane.f32.xlu0 %v1791_v4  ;;  %v1238_v59 = vadd.f32 %v5299_v1, %v1237_v22  ;;  %v1541_v29 = vadd.f32 %v5499_v47, %v1249_v5 }
 0x1fe   :  { %v2317_v12 = vsel %vm2316_vm14, %v2315_v43, %v2310_v42  ;;  %v4040_v60 = vpop.f32.mrf.mxu1  ;;  %v5537_v25 = vpop.xlane.xlu1 %1865  ;;  %v1241_v32 = vadd.f32 %v5299_v1, %v1240_v27  ;;  %v1790_v37 = vmul.f32 %v5350_v13, %v4557_v58  ;;  %v5569_v42 = vrot.slane %v1397_v30, %v5024_v14 }
 0x1ff   :  { %v5543_v18 = vsel %vm2323_vm15, %v2322_v39, %v2317_v12  ;;  %v5545_v21 = vpop.xlane.xlu0 %1881  ;;  %v1538_v17 = vadd.f32 %v5499_v47, %v1238_v59  ;;  %v4559_v22 = vpop.eup %4558  ;;  %v1262_v45 = vadd.f32 %v5299_v1, %v4040_v60  ;;  %v2347_v58 = vrot.slane %v5510_v16, %v5363_v53 }
 0x200   :  { %v1253_v3 = vpop.f32.mrf.mxu1  ;;  %v4561_v36 = vpop.eup %4560  ;;  %v1794_v8 = vmul.f32 %v5350_v13, %v4559_v22  ;;  %v1539_v27 = vadd.f32 %v5499_v47, %v1241_v32  ;;  %v2352_v60 = vrot.slane %v5526_v38, %v5369_v56 }
 0x201   :  { %1991 = vadd.xlane.f32.xlu1 %v1782_v51  ;;  %2005 = vadd.xlane.f32.xlu0 %v1789_v48  ;;  %4574 = vtanh.f32 %v1538_v17  ;;  %v1793_v12 = vmul.f32 %v5350_v13, %v4561_v36  ;;  %v2337_v17 = vrot.slane %v5537_v25, %v5356_v50  ;;  %v1544_v16 = vadd.f32 %v5499_v47, %v1262_v45 }
 0x202   :  { %v5549_v6 = vpop.f32.mrf.mxu1  ;;  %v1862_v2 = vpop.xlane.xlu1 %1861  ;;  %4576 = vtanh.f32 %v1541_v29  ;;  %v1254_v38 = vadd.f32 %v5299_v1, %v1253_v3  ;;  %v2377_v45 = vrot.slane %v5545_v21, %v5453_v11 }
 0x203   :  { %v5552_v15 = vpop.xlane.xlu0 %1877  ;;  %v2328_v48 = vrot.slane %v1862_v2, %v5342_v40 }
 0x204   :  { %v5556_v26 = vpop.f32.mrf.mxu1  ;;  %v4563_v43 = vpop.eup %4562 }
 0x205   :  { %2017 = vadd.xlane.f32.xlu1 %v1795_v19  ;;  %2011 = vadd.xlane.f32.xlu0 %v1792_v20  ;;  %v4565_v39 = vpop.eup %4564  ;;  %v1800_v34 = vmul.f32 %v5350_v13, %v4563_v43 }
 0x206   :  { %v5562_v35 = vpop.f32.mrf.mxu1  ;;  %v1868_v4 = vpop.xlane.xlu1 %1867  ;;  %v1796_v2 = vmul.f32 %v5350_v13, %v4565_v39 }
 0x207   :  { %v5564_v55 = vpop.xlane.xlu0 %1883  ;;  %v4567_v5 = vpop.eup %4566  ;;  %v2342_v20 = vrot.slane %v1868_v4, %v5366_v54 }
 0x208   :  { %v1269_v24 = vpop.f32.mrf.mxu1  ;;  %v4569_v36 = vpop.eup %4568 }
 0x209   :  { %v1270_v51 = vadd.f32 %v5299_v1, %v1269_v24  ;;  %2015 = vadd.xlane.f32.xlu1 %v1794_v8  ;;  %2007 = vadd.xlane.f32.xlu0 %v1790_v37  ;;  %v1798_v24 = vmul.f32 %v5350_v13, %v4567_v5  ;;  %v4571_v39 = vpop.eup %4570 }
 0x20a   :  { %v5574_v62 = vpop.f32.mrf.mxu1  ;;  %v1864_v46 = vpop.xlane.xlu1 %1863 }
 0x20b   :  { %v1546_v61 = vadd.f32 %v5499_v47, %v1270_v51  ;;  %v5579_v63 = vpop.xlane.xlu0 %1879  ;;  %v2332_v59 = vrot.slane %v1864_v46, %v5372_v57 }
 0x20c   :  { %v1272_v19 = vpop.f32.mrf.mxu1 }
 0x20d   :  { %4578 = vtanh.f32 %v1546_v61  ;;  %v2333_v22 = vsel %vm2225_vm1, %v2332_v59, %v2328_v48  ;;  %v1273_v30 = vadd.f32 %v5299_v1, %v1272_v19  ;;  %2027 = vadd.xlane.f32.xlu1 %v1800_v34  ;;  %2013 = vadd.xlane.f32.xlu0 %v1793_v12  ;;  %v1542_v48 = vadd.f32 %v5499_v47, %v1254_v38 }
 0x20e   :  { %4580 = vtanh.f32 %v1539_v27  ;;  %v2338_v29 = vsel %vm2232_vm2, %v2337_v17, %v2333_v22  ;;  %v4048_v25 = vpop.f32.mrf.mxu1  ;;  %v1874_v32 = vpop.xlane.xlu1 %1873  ;;  %v1265_v61 = vadd.f32 %v5299_v1, %v5549_v6  ;;  %v2367_v22 = vrot.slane %v5552_v15, %v5401_v44 }
 0x20f   :  { %v2343_v8 = vsel %vm2239_vm3, %v2342_v20, %v2338_v29  ;;  %v1547_v4 = vadd.f32 %v5499_v47, %v1273_v30  ;;  %v1294_v37 = vadd.f32 %v5299_v1, %v4048_v25  ;;  %v5599_v43 = vpop.xlane.xlu0 %1889  ;;  %v2357_v3 = vrot.slane %v1874_v32, %v5393_v10  ;;  %v4573_v17 = vpop.eup %4572 }
 0x210   :  { %v2348_v51 = vsel %vm2246_vm4, %v2347_v58, %v2343_v8  ;;  %v5604_v27 = vpop.f32.mrf.mxu1  ;;  %v1799_v58 = vmul.f32 %v5350_v13, %v4569_v36  ;;  %v4575_v20 = vpop.eup %4574  ;;  %v1257_v6 = vadd.f32 %v5299_v1, %v5556_v26  ;;  %v2372_v30 = vrot.slane %v5579_v63, %v5438_v49 }
 0x211   :  { %4582 = vtanh.f32 %v1547_v4  ;;  %v1552_v46 = vadd.f32 %v5569_v42, %v1294_v37  ;;  %v2353_v12 = vsel %vm2253_vm5, %v2352_v60, %v2348_v51  ;;  %2023 = vadd.xlane.f32.xlu1 %v1798_v24  ;;  %2019 = vadd.xlane.f32.xlu0 %v1796_v2  ;;  %v1803_v2 = vmul.f32 %v5350_v13, %v4571_v39  ;;  %v4577_v8 = vpop.eup %4576 }
 0x212   :  { %v2358_v59 = vsel %vm2260_vm6, %v2357_v3, %v2353_v12  ;;  %v4049_v34 = vpop.f32.mrf.mxu1  ;;  %v1876_v5 = vpop.xlane.xlu1 %1875  ;;  %4584 = vtanh.f32 %v1544_v16  ;;  %v1545_v32 = vadd.f32 %v5499_v47, %v1265_v61  ;;  %v1797_v63 = vmul.f32 %v5350_v13, %v4573_v17 }
 0x213   :  { %v1297_v21 = vadd.f32 %v5299_v1, %v4049_v34  ;;  %v1886_v19 = vpop.xlane.xlu0 %1885  ;;  %v2362_v60 = vrot.slane %v1876_v5, %v5404_v52  ;;  %4586 = vtanh.f32 %v1552_v46  ;;  %v2382_v4 = vrot.slane %v5564_v55, %v5456_v33 }
 0x214   :  { %v1288_v38 = vpop.f32.mrf.mxu1  ;;  %4588 = vtanh.f32 %v1542_v48  ;;  %v1801_v51 = vmul.f32 %v5350_v13, %v4575_v20  ;;  %v2387_v3 = vrot.slane %v1886_v19, %v5481_v31  ;;  %v1543_v61 = vadd.f32 %v5499_v47, %v1257_v6 }
 0x215   :  { %v1553_v16 = vadd.f32 %v5569_v42, %v1297_v21  ;;  %v2363_v29 = vsel %vm2267_vm7, %v2362_v60, %v2358_v59  ;;  %v1289_v25 = vadd.f32 %v5299_v1, %v1288_v38  ;;  %2033 = vadd.xlane.f32.xlu1 %v1803_v2  ;;  %2025 = vadd.xlane.f32.xlu0 %v1799_v58 }
 0x216   :  { %v2368_v15 = vsel %vm2274_vm8, %v2367_v22, %v2363_v29  ;;  %v4052_v36 = vpop.f32.mrf.mxu1  ;;  %v5629_v26 = vpop.xlane.xlu1 %1899  ;;  %v1278_v21 = vadd.f32 %v5299_v1, %v5562_v35  ;;  %v1286_v35 = vadd.f32 %v5299_v1, %v5604_v27 }
 0x217   :  { %v2373_v37 = vsel %vm2281_vm9, %v2372_v30, %v2368_v15  ;;  %v1551_v24 = vadd.f32 %v5569_v42, %v1289_v25  ;;  %v1892_v39 = vpop.xlane.xlu0 %1891  ;;  %4590 = vtanh.f32 %v1553_v16  ;;  %v1310_v46 = vadd.f32 %v5299_v1, %v4052_v36 }
 0x218   :  { %v1301_v12 = vpop.f32.mrf.mxu1  ;;  %v2378_v48 = vsel %vm2288_vm10, %v2377_v45, %v2373_v37  ;;  %4592 = vtanh.f32 %v1545_v32  ;;  %v1804_v45 = vmul.f32 %v5350_v13, %v4577_v8  ;;  %v2397_v30 = vrot.slane %v5599_v43, %v5515_v41 }
 0x219   :  { %2029 = vadd.xlane.f32.xlu1 %v1801_v51  ;;  %2021 = vadd.xlane.f32.xlu0 %v1797_v63  ;;  %v2383_v55 = vsel %vm2295_vm11, %v2382_v4, %v2378_v48  ;;  %4594 = vtanh.f32 %v1551_v24  ;;  %v1556_v60 = vadd.f32 %v5569_v42, %v1310_v46  ;;  %v1302_v2 = vadd.f32 %v5299_v1, %v1301_v12 }
 0x21a   :  { %v4579_v59 = vpop.eup %4578  ;;  %v4053_v34 = vpop.f32.mrf.mxu1  ;;  %v2388_v5 = vsel %vm2302_vm12, %v2387_v3, %v2383_v55  ;;  %4596 = vtanh.f32 %v1543_v61  ;;  %v2402_v16 = vrot.slane %v1892_v39, %v5518_v23  ;;  %v1548_v15 = vadd.f32 %v5499_v47, %v1278_v21 }
 0x21b   :  { %v1896_v58 = vpop.xlane.xlu1 %1895  ;;  %v4581_v17 = vpop.eup %4580  ;;  %v1809_v6 = vmul.f32 %v5350_v13, %v4579_v59  ;;  %v1313_v36 = vadd.f32 %v5299_v1, %v4053_v34  ;;  %4598 = vtanh.f32 %v1556_v60  ;;  %v1554_v27 = vadd.f32 %v5569_v42, %v1302_v2 }
 0x21c   :  { %v1888_v19 = vpop.xlane.xlu0 %1887  ;;  %v1304_v22 = vpop.f32.mrf.mxu1  ;;  %v1802_v8 = vmul.f32 %v5350_v13, %v4581_v17  ;;  %v1281_v3 = vadd.f32 %v5299_v1, %v5574_v62  ;;  %v1550_v12 = vadd.f32 %v5569_v42, %v1286_v35  ;;  %4600 = vtanh.f32 %v1548_v15 }
 0x21d   :  { %v2392_v20 = vrot.slane %v1888_v19, %v5506_v7  ;;  %2035 = vadd.xlane.f32.xlu1 %v1804_v45  ;;  %2045 = vadd.xlane.f32.xlu0 %v1809_v6  ;;  %v1557_v59 = vadd.f32 %v5569_v42, %v1313_v36  ;;  %v2411_v34 = vrot.slane %v1896_v58, %v5372_v57  ;;  %4602 = vtanh.f32 %v1554_v27 }
 0x21e   :  { %v4583_v38 = vpop.eup %4582  ;;  %v4056_v25 = vpop.f32.mrf.mxu1  ;;  %v1549_v60 = vadd.f32 %v5499_v47, %v1281_v3  ;;  %4604 = vtanh.f32 %v1550_v12  ;;  %v2421_v58 = vrot.slane %v5629_v26, %v5366_v54 }
 0x21f   :  { %v2393_v29 = vsel %vm2309_vm13, %v2392_v20, %v2388_v5  ;;  %v1902_v32 = vpop.xlane.xlu1 %1901  ;;  %v4585_v4 = vpop.eup %4584  ;;  %v1810_v39 = vmul.f32 %v5350_v13, %v4583_v38  ;;  %4606 = vtanh.f32 %v1557_v59  ;;  %v1326_v36 = vadd.f32 %v5299_v1, %v4056_v25  ;;  %v4636_v25 = vld [vmem:[%s6078_s4] ss:$0 sm:$0xff] }
 0x220   :  { %v2398_v63 = vsel %vm2316_vm14, %v2397_v30, %v2393_v29  ;;  %v1898_v43 = vpop.xlane.xlu0 %1897  ;;  %v1317_v24 = vpop.f32.mrf.mxu1  ;;  %v1807_v62 = vmul.f32 %v5350_v13, %v4585_v4  ;;  %v2426_v47 = vrot.slane %v1902_v32, %v5363_v53  ;;  %4608 = vtanh.f32 %v1549_v60 }
 0x221   :  { %v2403_v37 = vsel %vm2323_vm15, %v2402_v16, %v2398_v63  ;;  %v4587_v51 = vpop.eup %4586  ;;  %2031 = vadd.xlane.f32.xlu1 %v1802_v8  ;;  %2047 = vadd.xlane.f32.xlu0 %v1810_v39  ;;  %v2416_v2 = vrot.slane %v1898_v43, %v5356_v50  ;;  %v1318_v32 = vadd.f32 %v5299_v1, %v1317_v24 }
 0x222   :  { %v5667_v46 = vsel %vm6087_vm0, %v2403_v37, %v5543_v18  ;;  %v4057_v48 = vpop.f32.mrf.mxu1  ;;  %v4589_v55 = vpop.eup %4588  ;;  %v1305_v18 = vadd.f32 %v5299_v1, %v1304_v22  ;;  %v1815_v19 = vmul.f32 %v5350_v13, %v4587_v51  ;;  %vm6088_vm0 = vcmask 1042434  }
 0x223   :  { %v5670_v61 = vpop.xlane.xlu1 %1907  ;;  %v1329_v20 = vadd.f32 %v5299_v1, %v4057_v48  ;;  %v1805_v29 = vmul.f32 %v5350_v13, %v4589_v55  ;;  %v1560_v48 = vadd.f32 %v5569_v42, %v1326_v36 }
 0x224   :  { %v1894_v5 = vpop.xlane.xlu0 %1893  ;;  %v1320_v21 = vpop.f32.mrf.mxu1  ;;  %v1555_v26 = vadd.f32 %v5569_v42, %v1305_v18  ;;  %v2441_v18 = vrot.slane %v5670_v61, %v5404_v52 }
 0x225   :  { %v2407_v17 = vrot.slane %v1894_v5, %v5342_v40  ;;  %v4591_v45 = vpop.eup %4590  ;;  %2041 = vadd.xlane.f32.xlu1 %v1807_v62  ;;  %2057 = vadd.xlane.f32.xlu0 %v1815_v19  ;;  %v1561_v37 = vadd.f32 %v5569_v42, %v1329_v20  ;;  %v1558_v62 = vadd.f32 %v5569_v42, %v1318_v32 }
 0x226   :  { %v5684_v22 = vpop.f32.mrf.mxu1  ;;  %v4593_v38 = vpop.eup %4592  ;;  %v1816_v43 = vmul.f32 %v5350_v13, %v4591_v45  ;;  %4610 = vtanh.f32 %v1555_v26 }
 0x227   :  { %v2412_v6 = vsel %vm2225_vm1, %v2411_v34, %v2407_v17  ;;  %v5686_v30 = vpop.xlane.xlu1 %1913  ;;  %v4595_v15 = vpop.eup %4594  ;;  %v1808_v12 = vmul.f32 %v5350_v13, %v4593_v38  ;;  %4612 = vtanh.f32 %v1561_v37  ;;  %v1321_v38 = vadd.f32 %v4636_v25, %v1320_v21 }
 0x228   :  { %v2417_v35 = vsel %vm2232_vm2, %v2416_v2, %v2412_v6  ;;  %v1906_v16 = vpop.xlane.xlu0 %1905  ;;  %v1333_v63 = vpop.f32.mrf.mxu1  ;;  %v1814_v1 = vmul.f32 %v5350_v13, %v4595_v15  ;;  %4614 = vtanh.f32 %v1560_v48 }
 0x229   :  { %v2422_v8 = vsel %vm2239_vm3, %v2421_v58, %v2417_v35  ;;  %2037 = vadd.xlane.f32.xlu1 %v1805_v29  ;;  %v4597_v27 = vpop.eup %4596  ;;  %2059 = vadd.xlane.f32.xlu0 %v1816_v43  ;;  %v1334_v51 = vadd.f32 %v4636_v25, %v1333_v63  ;;  %v2436_v34 = vrot.slane %v1906_v16, %v5393_v10  ;;  %4616 = vtanh.f32 %v1558_v62 }
 0x22a   :  { %v2427_v4 = vsel %vm2246_vm4, %v2426_v47, %v2422_v8  ;;  %v4061_v55 = vpop.f32.mrf.mxu1  ;;  %v4599_v24 = vpop.eup %4598  ;;  %v1806_v5 = vmul.f32 %v5350_v13, %v4597_v27  ;;  %v2456_v27 = vrot.slane %v5686_v30, %v5453_v11 }
 0x22b   :  { %v1910_v39 = vpop.xlane.xlu1 %1909  ;;  %v1562_v45 = vadd.f32 %v5569_v42, %v1334_v51  ;;  %v1345_v60 = vadd.f32 %v4636_v25, %v4061_v55  ;;  %v4601_v6 = vpop.eup %4600  ;;  %v1819_v61 = vmul.f32 %v5350_v13, %v4599_v24  ;;  %v5734_v55 = vld [vmem:[%s6079_s5] ss:$0 sm:$0xff]  ;;  %s4898_s5 = smov [#allocation14]  }
 0x22c   :  { %v1904_v3 = vpop.xlane.xlu0 %1903  ;;  %v2446_v58 = vrot.slane %v1910_v39, %v5401_v44  ;;  %v4603_v35 = vpop.eup %4602  ;;  %v1811_v21 = vmul.f32 %v5350_v13, %v4601_v6  ;;  %s3596_s29 = sshll.u32 %s4898_s5, 4  ;;  %s3597_s29 = int_to_ptr.vmem [resolvable:$true] %s3596_s29 }
 0x22d   :  { %v2431_v59 = vrot.slane %v1904_v3, %v5369_v56  ;;  %2043 = vadd.xlane.f32.xlu1 %v1808_v12  ;;  %2055 = vadd.xlane.f32.xlu0 %v1814_v1  ;;  %v1336_v29 = vpop.f32.mrf.mxu1  ;;  %v4605_v26 = vpop.eup %4604  ;;  %4618 = vtanh.f32 %v1562_v45  ;;  %v1565_v36 = vadd.f32 %v5569_v42, %v1345_v60  ;;  %v1817_v37 = vmul.f32 %v5350_v13, %v4603_v35  ;;  %s4815_s30 = scalar_lea.vmem %s3597_s29, 128  ;;  %p4820_p3 = scmp.lt.s32.totalorder %s3597_s29, %s3597_s29 }
 0x22e   :  { %v4607_v8 = vpop.eup %4606  ;;  %v1337_v32 = vadd.f32 %v4636_v25, %v1336_v29  ;;  %v1813_v30 = vmul.f32 %v5734_v55, %v4605_v26  ;;  %v1342_v1 = vadd.f32 %v4636_v25, %v5684_v22  ;;  %p4816_p2 = scmp.ne.s32.totalorder %s3597_s29, %s4815_s30  ;;  %p4821_p4 = scmp.lt.s32.totalorder %s4815_s30, %s4815_s30 }
 0x22f   :  { %v2432_v17 = vsel %vm2253_vm5, %v2431_v59, %v2427_v4  ;;  %v1916_v19 = vpop.xlane.xlu1 %1915  ;;  %v1559_v4 = vadd.f32 %v5569_v42, %v1321_v38  ;;  %4620 = vtanh.f32 %v1565_v36  ;;  %v4609_v59 = vpop.eup %4608 }
 0x230   :  { %v2437_v2 = vsel %vm2260_vm6, %v2436_v34, %v2432_v17  ;;  %v5714_v20 = vpop.xlane.xlu0 %1929  ;;  %v2461_v39 = vrot.slane %v1916_v19, %v5456_v33  ;;  %v1563_v24 = vadd.f32 %v5569_v42, %v1337_v32  ;;  %v1820_v34 = vmul.f32 %v5734_v55, %v4607_v8  ;;  %p4822_p5 = por %p4821_p4, %p4820_p3 }
 0x231   :  { %v2442_v47 = vsel %vm2267_vm7, %v2441_v18, %v2437_v2  ;;  %2039 = vadd.xlane.f32.xlu1 %v1806_v5  ;;  %2065 = vadd.xlane.f32.xlu0 %v1819_v61  ;;  %4622 = vtanh.f32 %v1559_v4  ;;  %v1812_v45 = vmul.f32 %v5734_v55, %v4609_v59  ;;  %v1564_v60 = vadd.f32 %v5569_v42, %v1342_v1 }
 0x232   :  { %v2447_v16 = vsel %vm2274_vm8, %v2446_v58, %v2442_v47  ;;  %4624 = vtanh.f32 %v1563_v24  ;;  %p4823_p6 = pnand %p4822_p5, %p4816_p2 }
 0x233   :  { %v1912_v15 = vpop.xlane.xlu1 %1911  ;;  %v4611_v5 = vpop.eup %4610  ;;  %4626 = vtanh.f32 %v1564_v60 }
 0x234   :  { %v2451_v63 = vrot.slane %v1912_v15, %v5438_v49  ;;  %v5721_v43 = vpop.xlane.xlu0 %1931  ;;  %v4613_v18 = vpop.eup %4612  ;;  %v1818_v22 = vmul.f32 %v5734_v55, %v4611_v5 }
 0x235   :  { %2049 = vadd.xlane.f32.xlu1 %v1811_v21  ;;  %2061 = vadd.xlane.f32.xlu0 %v1817_v37  ;;  %v4615_v25 = vpop.eup %4614  ;;  %v1824_v47 = vmul.f32 %v5734_v55, %v4613_v18  ;;  %v2500_v24 = vrot.slane %v5721_v43, %v5366_v54 }
 0x236   :  { %v2452_v51 = vsel %vm2281_vm9, %v2451_v63, %v2447_v16  ;;  %v4617_v6 = vpop.eup %4616  ;;  %v1823_v35 = vmul.f32 %v5734_v55, %v4615_v25 }
 0x237   :  { %v2457_v3 = vsel %vm2288_vm10, %v2456_v27, %v2452_v51  ;;  %v1922_v12 = vpop.xlane.xlu1 %1921  ;;  %v1821_v63 = vmul.f32 %v5734_v55, %v4617_v6 }
 0x238   :  { %v1928_v48 = vpop.xlane.xlu0 %1927  ;;  %v2462_v13 = vsel %vm2295_vm11, %v2461_v39, %v2457_v3  ;;  %v2476_v36 = vrot.slane %v1922_v12, %v5515_v41 }
 0x239   :  { %2053 = vadd.xlane.f32.xlu1 %v1813_v30  ;;  %2067 = vadd.xlane.f32.xlu0 %v1820_v34  ;;  %v2490_v37 = vrot.slane %v1928_v48, %v5372_v57  ;;  %v2495_v30 = vrot.slane %v5714_v20, %v5356_v50 }
 0x23a   :  { %v4619_v61 = vpop.eup %4618 }
 0x23b   :  { %v1918_v62 = vpop.xlane.xlu1 %1917  ;;  %v1825_v15 = vmul.f32 %v5734_v55, %v4619_v61 }
 0x23c   :  { %v2466_v17 = vrot.slane %v1918_v62, %v5481_v31  ;;  %v5742_v19 = vpop.xlane.xlu0 %1937  ;;  %v4621_v26 = vpop.eup %4620 }
 0x23d   :  { %2051 = vadd.xlane.f32.xlu1 %v1812_v45  ;;  %2063 = vadd.xlane.f32.xlu0 %v1818_v22  ;;  %v1828_v12 = vmul.f32 %v5734_v55, %v4621_v26  ;;  %v2515_v25 = vrot.slane %v5742_v19, %v5393_v10 }
 0x23e   :  { %v2467_v2 = vsel %vm2302_vm12, %v2466_v17, %v2462_v13  ;;  %v4623_v21 = vpop.eup %4622 }
 0x23f   :  { %v1924_v58 = vpop.xlane.xlu1 %1923  ;;  %v1822_v59 = vmul.f32 %v5734_v55, %v4623_v21  ;;  %v4625_v1 = vpop.eup %4624 }
 0x240   :  { %v1940_v38 = vpop.xlane.xlu0 %1939  ;;  %v2481_v8 = vrot.slane %v1924_v58, %v5518_v23  ;;  %v4627_v17 = vpop.eup %4626 }
 0x241   :  { %2075 = vadd.xlane.f32.xlu1 %v1824_v47  ;;  %2073 = vadd.xlane.f32.xlu0 %v1823_v35  ;;  %v2520_v58 = vrot.slane %v1940_v38, %v5404_v52 }
 0x243   :  { %v1920_v42 = vpop.xlane.xlu1 %1919 }
 0x244   :  { %v2471_v16 = vrot.slane %v1920_v42, %v5506_v7  ;;  %v1946_v29 = vpop.xlane.xlu0 %1945 }
 0x245   :  { %2077 = vadd.xlane.f32.xlu1 %v1825_v15  ;;  %2069 = vadd.xlane.f32.xlu0 %v1821_v63  ;;  %v2535_v26 = vrot.slane %v1946_v29, %v5453_v11 }
 0x246   :  { %v2472_v4 = vsel %vm2309_vm13, %v2471_v16, %v2467_v2  ;;  %v1827_v2 = vmul.f32 %v5734_v55, %v4627_v17 }
 0x247   :  { %v2477_v27 = vsel %vm2316_vm14, %v2476_v36, %v2472_v4  ;;  %v1926_v32 = vpop.xlane.xlu1 %1925 }
 0x248   :  { %v2482_v39 = vsel %vm2323_vm15, %v2481_v8, %v2477_v27  ;;  %v1942_v51 = vpop.xlane.xlu0 %1941  ;;  %v2486_v3 = vrot.slane %v1926_v32, %v5342_v40 }
 0x249   :  { %v2881_v13 = vsel %vm6088_vm0, %v2482_v39, %v5667_v46  ;;  %2083 = vadd.xlane.f32.xlu1 %v1828_v12  ;;  %2071 = vadd.xlane.f32.xlu0 %v1822_v59  ;;  %v1826_v46 = vmul.f32 %v5734_v55, %v4625_v1  ;;  %v2525_v47 = vrot.slane %v1942_v51, %v5401_v44  ;;  %vm6089_vm0 = vcmask 1043459  }
 0x24a   :  { %v2491_v48 = vsel %vm2225_vm1, %v2490_v37, %v2486_v3 }
 0x24b   :  { %v2496_v34 = vsel %vm2232_vm2, %v2495_v30, %v2491_v48  ;;  %v1934_v5 = vpop.xlane.xlu1 %1933 }
 0x24c   :  { %v1948_v62 = vpop.xlane.xlu0 %1947  ;;  %v2501_v18 = vsel %vm2239_vm3, %v2500_v24, %v2496_v34  ;;  %v2505_v20 = vrot.slane %v1934_v5, %v5363_v53 }
 0x24d   :  { %2079 = vadd.xlane.f32.xlu0 %v1826_v46  ;;  %v2540_v55 = vrot.slane %v1948_v62, %v5456_v33 }
 0x24e   :  { %v2506_v45 = vsel %vm2246_vm4, %v2505_v20, %v2501_v18 }
 0x24f   :  { %v1936_v60 = vpop.xlane.xlu1 %1935 }
 0x250   :  { %v1944_v43 = vpop.xlane.xlu0 %1943  ;;  %v2510_v22 = vrot.slane %v1936_v60, %v5369_v56 }
 0x251   :  { %2081 = vadd.xlane.f32.xlu0 %v1827_v2  ;;  %v2530_v42 = vrot.slane %v1944_v43, %v5438_v49 }
 0x252   :  { %v2511_v6 = vsel %vm2253_vm5, %v2510_v22, %v2506_v45 }
 0x253   :  { %v2516_v61 = vsel %vm2260_vm6, %v2515_v25, %v2511_v6  ;;  %v1956_v35 = vpop.xlane.xlu1 %1955 }
 0x254   :  { %v2521_v16 = vsel %vm2267_vm7, %v2520_v58, %v2516_v61  ;;  %v1954_v15 = vpop.xlane.xlu0 %1953  ;;  %v2560_v51 = vrot.slane %v1956_v35, %v5518_v23 }
 0x255   :  { %v2526_v19 = vsel %vm2274_vm8, %v2525_v47, %v2521_v16  ;;  %v2555_v39 = vrot.slane %v1954_v15, %v5515_v41 }
 0x256   :  { %v2531_v38 = vsel %vm2281_vm9, %v2530_v42, %v2526_v19 }
 0x257   :  { %v2536_v36 = vsel %vm2288_vm10, %v2535_v26, %v2531_v38  ;;  %v1962_v63 = vpop.xlane.xlu1 %1961 }
 0x258   :  { %v1950_v21 = vpop.xlane.xlu0 %1949  ;;  %v2541_v8 = vsel %vm2295_vm11, %v2540_v55, %v2536_v36  ;;  %v2574_v18 = vrot.slane %v1962_v63, %v5356_v50 }
 0x259   :  { %v2545_v4 = vrot.slane %v1950_v21, %v5481_v31 }
 0x25b   :  { %v2546_v27 = vsel %vm2302_vm12, %v2545_v4, %v2541_v8  ;;  %v1958_v32 = vpop.xlane.xlu1 %1957 }
 0x25c   :  { %v1952_v37 = vpop.xlane.xlu0 %1951  ;;  %v2565_v5 = vrot.slane %v1958_v32, %v5342_v40 }
 0x25d   :  { %v2550_v29 = vrot.slane %v1952_v37, %v5506_v7 }
 0x25f   :  { %v2551_v3 = vsel %vm2309_vm13, %v2550_v29, %v2546_v27  ;;  %v1970_v12 = vpop.xlane.xlu1 %1969 }
 0x260   :  { %v2556_v30 = vsel %vm2316_vm14, %v2555_v39, %v2551_v3  ;;  %v1964_v59 = vpop.xlane.xlu0 %1963  ;;  %v2594_v25 = vrot.slane %v1970_v12, %v5393_v10 }
 0x261   :  { %v2561_v1 = vsel %vm2323_vm15, %v2560_v51, %v2556_v30  ;;  %v2579_v20 = vrot.slane %v1964_v59, %v5366_v54 }
 0x262   :  { %v2883_v24 = vsel %vm6089_vm0, %v2561_v1, %v2881_v13  ;;  %vm6090_vm0 = vcmask 1044484  }
 0x263   :  { %v1972_v48 = vpop.xlane.xlu1 %1971 }
 0x264   :  { %v1960_v34 = vpop.xlane.xlu0 %1959  ;;  %v2599_v6 = vrot.slane %v1972_v48, %v5404_v52 }
 0x265   :  { %v2569_v62 = vrot.slane %v1960_v34, %v5372_v57 }
 0x267   :  { %v2570_v46 = vsel %vm2225_vm1, %v2569_v62, %v2565_v5  ;;  %v1968_v17 = vpop.xlane.xlu1 %1967 }
 0x268   :  { %v2575_v45 = vsel %vm2232_vm2, %v2574_v18, %v2570_v46  ;;  %v1966_v60 = vpop.xlane.xlu0 %1965  ;;  %v2589_v43 = vrot.slane %v1968_v17, %v5369_v56 }
 0x269   :  { %v2580_v13 = vsel %vm2239_vm3, %v2579_v20, %v2575_v45  ;;  %v2584_v22 = vrot.slane %v1966_v60, %v5363_v53 }
 0x26b   :  { %v2585_v2 = vsel %vm2246_vm4, %v2584_v22, %v2580_v13  ;;  %v1978_v58 = vpop.xlane.xlu1 %1977 }
 0x26c   :  { %v2590_v47 = vsel %vm2253_vm5, %v2589_v43, %v2585_v2  ;;  %v1986_v61 = vpop.xlane.xlu0 %1985  ;;  %v2614_v8 = vrot.slane %v1978_v58, %v5453_v11 }
 0x26d   :  { %v2595_v35 = vsel %vm2260_vm6, %v2594_v25, %v2590_v47  ;;  %v2634_v1 = vrot.slane %v1986_v61, %v5515_v41 }
 0x26e   :  { %v2600_v42 = vsel %vm2267_vm7, %v2599_v6, %v2595_v35 }
 0x26f   :  { %v1974_v16 = vpop.xlane.xlu1 %1973 }
 0x270   :  { %v1988_v15 = vpop.xlane.xlu0 %1987  ;;  %v2604_v26 = vrot.slane %v1974_v16, %v5401_v44 }
 0x271   :  { %v2639_v48 = vrot.slane %v1988_v15, %v5518_v23 }
 0x272   :  { %v2605_v19 = vsel %vm2274_vm8, %v2604_v26, %v2600_v42 }
 0x273   :  { %v1980_v55 = vpop.xlane.xlu1 %1979 }
 0x274   :  { %v1990_v38 = vpop.xlane.xlu0 %1989  ;;  %v2619_v4 = vrot.slane %v1980_v55, %v5456_v33 }
 0x275   :  { %v2644_v43 = vrot.slane %v1990_v38, %v5342_v40 }
 0x277   :  { %v1976_v36 = vpop.xlane.xlu1 %1975 }
 0x278   :  { %v2609_v63 = vrot.slane %v1976_v36, %v5438_v49  ;;  %v2002_v21 = vpop.xlane.xlu0 %2001 }
 0x279   :  { %v2673_v16 = vrot.slane %v2002_v21, %v5393_v10 }
 0x27a   :  { %v2610_v27 = vsel %vm2281_vm9, %v2609_v63, %v2605_v19 }
 0x27b   :  { %v2615_v32 = vsel %vm2288_vm10, %v2614_v8, %v2610_v27  ;;  %v1982_v37 = vpop.xlane.xlu1 %1981 }
 0x27c   :  { %v2620_v29 = vsel %vm2295_vm11, %v2619_v4, %v2615_v32  ;;  %v2624_v39 = vrot.slane %v1982_v37, %v5481_v31  ;;  %v1998_v51 = vpop.xlane.xlu0 %1997 }
 0x27d   :  { %v2663_v6 = vrot.slane %v1998_v51, %v5363_v53 }
 0x27e   :  { %v2625_v3 = vsel %vm2302_vm12, %v2624_v39, %v2620_v29 }
 0x27f   :  { %v1984_v12 = vpop.xlane.xlu1 %1983 }
 0x280   :  { %v2629_v30 = vrot.slane %v1984_v12, %v5506_v7  ;;  %v2004_v59 = vpop.xlane.xlu0 %2003 }
 0x281   :  { %v2678_v26 = vrot.slane %v2004_v59, %v5404_v52 }
 0x282   :  { %v2630_v34 = vsel %vm2309_vm13, %v2629_v30, %v2625_v3 }
 0x283   :  { %v2635_v5 = vsel %vm2316_vm14, %v2634_v1, %v2630_v34  ;;  %v1994_v62 = vpop.xlane.xlu1 %1993 }
 0x284   :  { %v2640_v18 = vsel %vm2323_vm15, %v2639_v48, %v2635_v5  ;;  %v2000_v20 = vpop.xlane.xlu0 %1999  ;;  %v2653_v25 = vrot.slane %v1994_v62, %v5356_v50 }
 0x285   :  { %v2885_v46 = vsel %vm6090_vm0, %v2640_v18, %v2883_v24  ;;  %v2668_v24 = vrot.slane %v2000_v20, %v5369_v56  ;;  %vm2886_vm0 = vcmask 1045509  }
 0x287   :  { %v1996_v17 = vpop.xlane.xlu1 %1995 }
 0x288   :  { %v2010_v45 = vpop.xlane.xlu0 %2009  ;;  %v2658_v2 = vrot.slane %v1996_v17, %v5366_v54 }
 0x289   :  { %v2693_v21 = vrot.slane %v2010_v45, %v5453_v11 }
 0x28b   :  { %v1992_v60 = vpop.xlane.xlu1 %1991 }
 0x28c   :  { %v2648_v13 = vrot.slane %v1992_v60, %v5372_v57  ;;  %v2006_v22 = vpop.xlane.xlu0 %2005 }
 0x28d   :  { %v2683_v38 = vrot.slane %v2006_v22, %v5401_v44 }
 0x28e   :  { %v2649_v58 = vsel %vm2225_vm1, %v2648_v13, %v2644_v43 }
 0x28f   :  { %v2654_v47 = vsel %vm2232_vm2, %v2653_v25, %v2649_v58  ;;  %v2018_v61 = vpop.xlane.xlu1 %2017 }
 0x290   :  { %v2659_v35 = vsel %vm2239_vm3, %v2658_v2, %v2654_v47  ;;  %v2012_v42 = vpop.xlane.xlu0 %2011  ;;  %v2713_v59 = vrot.slane %v2018_v61, %v5515_v41 }
 0x291   :  { %v2664_v15 = vsel %vm2246_vm4, %v2663_v6, %v2659_v35  ;;  %v2698_v32 = vrot.slane %v2012_v42, %v5456_v33 }
 0x292   :  { %v2669_v19 = vsel %vm2253_vm5, %v2668_v24, %v2664_v15 }
 0x293   :  { %v2674_v55 = vsel %vm2260_vm6, %v2673_v16, %v2669_v19  ;;  %v2016_v36 = vpop.xlane.xlu1 %2015 }
 0x294   :  { %v2679_v63 = vsel %vm2267_vm7, %v2678_v26, %v2674_v55  ;;  %v2008_v8 = vpop.xlane.xlu0 %2007  ;;  %v2708_v30 = vrot.slane %v2016_v36, %v5506_v7 }
 0x295   :  { %v2684_v4 = vsel %vm2274_vm8, %v2683_v38, %v2679_v63  ;;  %v2688_v27 = vrot.slane %v2008_v8, %v5438_v49 }
 0x297   :  { %v2689_v37 = vsel %vm2281_vm9, %v2688_v27, %v2684_v4  ;;  %v2028_v29 = vpop.xlane.xlu1 %2027 }
 0x298   :  { %v2694_v39 = vsel %vm2288_vm10, %v2693_v21, %v2689_v37  ;;  %v2014_v51 = vpop.xlane.xlu0 %2013  ;;  %v2737_v36 = vrot.slane %v2028_v29, %v5366_v54 }
 0x299   :  { %v2699_v3 = vsel %vm2295_vm11, %v2698_v32, %v2694_v39  ;;  %v2703_v12 = vrot.slane %v2014_v51, %v5481_v31 }
 0x29b   :  { %v2704_v1 = vsel %vm2302_vm12, %v2703_v12, %v2699_v3  ;;  %v2024_v48 = vpop.xlane.xlu1 %2023 }
 0x29c   :  { %v2709_v34 = vsel %vm2309_vm13, %v2708_v30, %v2704_v1  ;;  %v2020_v5 = vpop.xlane.xlu0 %2019  ;;  %v2727_v15 = vrot.slane %v2024_v48, %v5372_v57 }
 0x29d   :  { %v2714_v62 = vsel %vm2316_vm14, %v2713_v59, %v2709_v34  ;;  %v2718_v18 = vrot.slane %v2020_v5, %v5518_v23 }
 0x29f   :  { %v2719_v20 = vsel %vm2323_vm15, %v2718_v18, %v2714_v62  ;;  %v2034_v17 = vpop.xlane.xlu1 %2033 }
 0x2a0   :  { %v2026_v45 = vpop.xlane.xlu0 %2025  ;;  %v5863_v60 = vsel %vm2886_vm0, %v2719_v20, %v2885_v46  ;;  %v2752_v30 = vrot.slane %v2034_v17, %v5393_v10 }
 0x2a1   :  { %v2732_v19 = vrot.slane %v2026_v45, %v5356_v50 }
 0x2a3   :  { %v2030_v43 = vpop.xlane.xlu1 %2029 }
 0x2a4   :  { %v2022_v13 = vpop.xlane.xlu0 %2021  ;;  %v2742_v21 = vrot.slane %v2030_v43, %v5363_v53 }
 0x2a5   :  { %v2723_v35 = vrot.slane %v2022_v13, %v5342_v40 }
 0x2a7   :  { %v2036_v22 = vpop.xlane.xlu1 %2035  ;;  %v2728_v46 = vsel %vm2225_vm1, %v2727_v15, %v2723_v35 }
 0x2a8   :  { %v5865_v25 = vpop.xlane.xlu0 %2045  ;;  %v2733_v38 = vsel %vm2232_vm2, %v2732_v19, %v2728_v46  ;;  %v2757_v62 = vrot.slane %v2036_v22, %v5404_v52 }
 0x2a9   :  { %v2738_v4 = vsel %vm2239_vm3, %v2737_v36, %v2733_v38 }
 0x2aa   :  { %v2743_v37 = vsel %vm2246_vm4, %v2742_v21, %v2738_v4 }
 0x2ab   :  { %v2032_v2 = vpop.xlane.xlu1 %2031 }
 0x2ac   :  { %v5867_v58 = vpop.xlane.xlu0 %2047  ;;  %v2747_v27 = vrot.slane %v2032_v2, %v5369_v56 }
 0x2ae   :  { %v2748_v12 = vsel %vm2253_vm5, %v2747_v27, %v2743_v37 }
 0x2af   :  { %v2042_v6 = vpop.xlane.xlu1 %2041  ;;  %v2753_v34 = vsel %vm2260_vm6, %v2752_v30, %v2748_v12 }
 0x2b0   :  { %v2058_v47 = vpop.xlane.xlu0 %2057  ;;  %v2758_v17 = vsel %vm2267_vm7, %v2757_v62, %v2753_v34  ;;  %v2772_v22 = vrot.slane %v2042_v6, %v5453_v11  ;;  %v2782_v6 = vrot.slane %v5865_v25, %v5481_v31 }
 0x2b1   :  { %v2811_v29 = vrot.slane %v2058_v47, %v5356_v50 }
 0x2b3   :  { %v2038_v61 = vpop.xlane.xlu1 %2037 }
 0x2b4   :  { %v2060_v24 = vpop.xlane.xlu0 %2059  ;;  %v2762_v5 = vrot.slane %v2038_v61, %v5401_v44 }
 0x2b5   :  { %v2816_v1 = vrot.slane %v2060_v24, %v5366_v54 }
 0x2b6   :  { %v2763_v45 = vsel %vm2274_vm8, %v2762_v5, %v2758_v17  ;;  %v4638_v17 = vld [vmem:[#allocation5 + $0x78] sm:$0xff]  }
 0x2b7   :  { %v2044_v42 = vpop.xlane.xlu1 %2043 }
 0x2b8   :  { %v2056_v16 = vpop.xlane.xlu0 %2055 }
 0x2b9   :  { %v2806_v39 = vrot.slane %v2056_v16, %v5372_v57  ;;  %v2777_v16 = vrot.slane %v2044_v42, %v5456_v33 }
 0x2bb   :  { %v2040_v26 = vpop.xlane.xlu1 %2039 }
 0x2bc   :  { %v2066_v55 = vpop.xlane.xlu0 %2065 }
 0x2bf   :  { %v5875_v63 = vpop.xlane.xlu1 %2049 }
 0x2c0   :  { %v2062_v8 = vpop.xlane.xlu0 %2061  ;;  %v2792_v25 = vrot.slane %v5875_v63, %v5515_v41 }
 0x2c1   :  { %v2821_v20 = vrot.slane %v2062_v8, %v5363_v53  ;;  %v2831_v53 = vrot.slane %v2066_v55, %v5393_v10 }
 0x2c3   :  { %v2054_v32 = vpop.xlane.xlu1 %2053 }
 0x2c4   :  { %v2068_v51 = vpop.xlane.xlu0 %2067  ;;  %v2802_v3 = vrot.slane %v2054_v32, %v5342_v40  ;;  %v2767_v40 = vrot.slane %v2040_v26, %v5438_v49 }
 0x2c5   :  { %v2836_v26 = vrot.slane %v2068_v51, %v5404_v52 }
 0x2c6   :  { %v2807_v59 = vsel %vm2225_vm1, %v2806_v39, %v2802_v3  ;;  %v2768_v2 = vsel %vm2281_vm9, %v2767_v40, %v2763_v45  ;;  %vm2888_vm1 = vcmask 1046534   ;;  %v4640_v45 = vld [vmem:[#allocation5 + $0x68] sm:$0xff]  }
 0x2c7   :  { %v2812_v48 = vsel %vm2232_vm2, %v2811_v29, %v2807_v59  ;;  %v2052_v50 = vpop.xlane.xlu1 %2051  ;;  %v2773_v24 = vsel %vm2288_vm10, %v2772_v22, %v2768_v2  ;;  %vm2890_vm2 = vcmask 1047559   ;;  %v4643_v2 = vld [vmem:[#allocation5 + $0x50] sm:$0xff]  }
 0x2c8   :  { %v2064_v57 = vpop.xlane.xlu0 %2063  ;;  %v2817_v18 = vsel %vm2239_vm3, %v2816_v1, %v2812_v48  ;;  %v2778_v46 = vsel %vm2295_vm11, %v2777_v16, %v2773_v24  ;;  %v2797_v32 = vrot.slane %v2052_v50, %v5518_v23  ;;  %vm2087_vm3 = vcmp.lt.s32.totalorder %v5321_v28, 8  ;;  %v4645_v24 = vld [vmem:[#allocation5 + $0x40] sm:$0xff]   ;;  %v4647_v16 = vld [vmem:[#allocation5 + $0xb0] sm:$0xff]  }
 0x2c9   :  { %v2826_v54 = vrot.slane %v2064_v57, %v5369_v56  ;;  %v2822_v43 = vsel %vm2246_vm4, %v2821_v20, %v2817_v18  ;;  %v2783_v55 = vsel %vm2302_vm12, %v2782_v6, %v2778_v46  ;;  %vm6091_vm4 = vmmov 0   ;;  %v4649_v46 = vld [vmem:[#allocation5 + $0xa0] sm:$0xff]  }
 0x2cb   :  { %v2827_v47 = vsel %vm2253_vm5, %v2826_v54, %v2822_v43  ;;  %v2076_v61 = vpop.xlane.xlu1 %2075  ;;  %v4639_v54 = vld [vmem:[#allocation5 + $0x70] sm:$0xff]   ;;  %v4641_v43 = vld [vmem:[#allocation5 + $0x60] sm:$0xff]   ;;  %vm6092_vm5 = vcmask 1041409  }
 0x2cc   :  { %v2074_v13 = vpop.xlane.xlu0 %2073  ;;  %v2832_v56 = vsel %vm2260_vm6, %v2831_v53, %v2827_v47  ;;  %v2856_v52 = vrot.slane %v2076_v61, %v5456_v33  ;;  %v4644_v47 = vld [vmem:[#allocation5 + $0x48] sm:$0xff]   ;;  %vm6093_vm6 = vmmov %vm6092_vm5 }
 0x2cd   :  { %v2837_v38 = vsel %vm2267_vm7, %v2836_v26, %v2832_v56  ;;  %v2851_v42 = vrot.slane %v2074_v13, %v5453_v11  ;;  %v4642_v13 = vld [vmem:[#allocation5 + $0x58] sm:$0xff]   ;;  %v4648_v56 = vld [vmem:[#allocation5 + $0xa8] sm:$0xff]   ;;  %vm6094_vm7 = vcmask 1042434  }
 0x2ce   :  { %v4650_v26 = vld [vmem:[#allocation5 + $0x98] sm:$0xff]  }
 0x2cf   :  { %v2078_v36 = vpop.xlane.xlu1 %2077 }
 0x2d0   :  { %v2070_v35 = vpop.xlane.xlu0 %2069  ;;  %v2861_v11 = vrot.slane %v2078_v36, %v5481_v31  ;;  %v4652_v36 = vld [vmem:[#allocation5 + $0x88] sm:$0xff]  }
 0x2d1   :  { %v2841_v15 = vrot.slane %v2070_v35, %v5401_v44  ;;  %v2787_v44 = vrot.slane %v5867_v58, %v5506_v7  ;;  %v4646_v35 = vld [vmem:[#allocation5 + $0xb8] sm:$0xff]  }
 0x2d3   :  { %v2842_v8 = vsel %vm2274_vm8, %v2841_v15, %v2837_v38  ;;  %v2084_v39 = vpop.xlane.xlu1 %2083  ;;  %v4356_v15 = vld [vmem:[#allocation11 + $0x38] sm:$0xff]   ;;  %vm6095_vm8 = vmmov %vm6094_vm7 }
 0x2d4   :  { %v2072_v19 = vpop.xlane.xlu0 %2071  ;;  %v2876_v29 = vrot.slane %v2084_v39, %v5518_v23  ;;  %4223 = vmatpush3.bf16.msra.mxu1 %v4356_v15  ;;  %v4663_v39 = vld [vmem:[#allocation5 + $0x130] sm:$0xff]  }
 0x2d5   :  { %v2846_v10 = vrot.slane %v2072_v19, %v5438_v49  ;;  %v2788_v49 = vsel %vm2309_vm13, %v2787_v44, %v2783_v55  ;;  %4224 = vmatprep.subr.bf16.mxu1 %v4895_v0  ;;  %v4651_v19 = vld [vmem:[#allocation5 + $0x90] sm:$0xff]   ;;  %v4653_v55 = vld [vmem:[#allocation5 + $0x80] sm:$0xff]   ;;  %v4656_v44 = vld [vmem:[#allocation5 + $0xe8] sm:$0xff]  }
 0x2d6   :  { %v2793_v51 = vsel %vm2316_vm14, %v2792_v25, %v2788_v49  ;;  %v4658_v25 = vld [vmem:[#allocation5 + $0xd8] sm:$0xff]   ;;  %v4660_v49 = vld [vmem:[#allocation5 + $0xc8] sm:$0xff]   ;;  %v4687_v15 = vld [vmem:[#allocation5 + $0x1f0] sm:$0xff]  }
 0x2d7   :  { %v2847_v4 = vsel %vm2281_vm9, %v2846_v10, %v2842_v8  ;;  %v2798_v63 = vsel %vm2323_vm15, %v2797_v32, %v2793_v51  ;;  %v4654_v8 = vld [vmem:[#allocation5 + $0xf8] sm:$0xff]   ;;  %v4664_v51 = vld [vmem:[#allocation5 + $0x128] sm:$0xff]   ;;  %vm6096_vm9 = vcmask 1043459  }
 0x2d8   :  { %v2852_v27 = vsel %vm2288_vm10, %v2851_v42, %v2847_v4  ;;  %v2080_v21 = vpop.xlane.xlu0 %2079  ;;  %v2889_v59 = vsel %vm2888_vm1, %v2798_v63, %v5863_v60  ;;  %v4657_v4 = vld [vmem:[#allocation5 + $0xe0] sm:$0xff]   ;;  %v4666_v63 = vld [vmem:[#allocation5 + $0x118] sm:$0xff]   ;;  %vm6097_vm10 = vmmov %vm6096_vm9 }
 0x2d9   :  { %v2857_v37 = vsel %vm2295_vm11, %v2856_v52, %v2852_v27  ;;  %v2866_v58 = vrot.slane %v2080_v21, %v5506_v7  ;;  %v4357_v52 = vld [vmem:[#allocation11 + $0x30] sm:$0xff]   ;;  %vm6098_vm11 = vcmask 1044484  }
 0x2da   :  { %v2862_v33 = vsel %vm2302_vm12, %v2861_v11, %v2857_v37  ;;  %4225 = vmatpush3.bf16.msra.mxu1 %v4357_v52  ;;  %v4659_v27 = vld [vmem:[#allocation5 + $0xd0] sm:$0xff]   ;;  %v4661_v11 = vld [vmem:[#allocation5 + $0xc0] sm:$0xff]   ;;  %vm6099_vm12 = vmmov %vm6098_vm11 }
 0x2db   :  { %v2867_v30 = vsel %vm2309_vm13, %v2866_v58, %v2862_v33  ;;  %4226 = vmatprep.subr.bf16.mxu1 %v4895_v0  ;;  %v4662_v58 = vld [vmem:[#allocation5 + $0x138] sm:$0xff]   ;;  %v4358_v33 = vld [vmem:[#allocation11 + $0x28] sm:$0xff]  }
 0x2dc   :  { %v2082_v3 = vpop.xlane.xlu0 %2081 }
 0x2dd   :  { %v2871_v12 = vrot.slane %v2082_v3, %v5515_v41  ;;  %v4665_v3 = vld [vmem:[#allocation5 + $0x120] sm:$0xff]  }
 0x2de   :  { %4227 = vmatpush3.bf16.msra.mxu1 %v4358_v33 }
 0x2df   :  { %v2872_v31 = vsel %vm2316_vm14, %v2871_v12, %v2867_v30  ;;  %4228 = vmatprep.subr.bf16.mxu1 %v4895_v0  ;;  %v4667_v12 = vld [vmem:[#allocation5 + $0x110] sm:$0xff]   ;;  %v4668_v30 = vld [vmem:[#allocation5 + $0x108] sm:$0xff]  }
 0x2e0   :  { %v2877_v7 = vsel %vm2323_vm15, %v2876_v29, %v2872_v31 }
 0x2e1   :  { %v2891_v1 = vsel %vm2890_vm2, %v2877_v7, %v2889_v59  ;;  %v4669_v7 = vld [vmem:[#allocation5 + $0x100] sm:$0xff]  }
 0x2e2   :  { %v2893_v48 = vsel %vm2087_vm3, %v2891_v1, -1e+30  ;;  %v4670_v1 = vld [vmem:[#allocation5 + $0x178] sm:$0xff]  }
 0x2e3   :  { %2894 = vmax.xlane.f32.xlu0 %v2893_v48 }
 0x36c   :  { %v2895_v41 = vpop.xlane.xlu0 %2894 }
 0x36d   :  { %v2896_v34 = vsub.f32 %v2893_v48, %v2895_v41  ;;  %v4671_v48 = vld [vmem:[#allocation5 + $0x170] sm:$0xff]   ;;  %v4359_v41 = vld [vmem:[#allocation11 + $0x20] sm:$0xff]  }
 0x36e   :  { %4229 = vmatpush3.bf16.msra.mxu1 %v4359_v41  ;;  %v4365_v41 = vld [vmem:[#allocation10 + $0x30] sm:$0xff]  }
 0x36f   :  { %v2897_v5 = vmul.f32 1.442695, %v2896_v34  ;;  %v4672_v34 = vld [vmem:[#allocation5 + $0x168] sm:$0xff]   ;;  %4230 = vmatprep.subr.bf16.mxu1 %v4895_v0 }
 0x371   :  { %4628 = vpow2.f32 %v2897_v5  ;;  %v4673_v5 = vld [vmem:[#allocation5 + $0x160] sm:$0xff]  }
 0x37e   :  { %v4629_v23 = vpop.eup %4628 }
 0x37f   :  { %2899 = vadd.xlane.f32.xlu1 %v4629_v23 }
 0x408   :  { %v2900_v57 = vpop.xlane.xlu1 %2899 }
 0x409   :  { %4630 = vrcp.f32 %v2900_v57  ;;  %v4675_v57 = vld [vmem:[#allocation5 + $0x150] sm:$0xff]  }
 0x416   :  { %v4631_v62 = vpop.eup %4630 }
 0x417   :  { %v2902_v40 = vmul.f32 %v4631_v62, %v4629_v23  ;;  %v4674_v23 = vld [vmem:[#allocation5 + $0x158] sm:$0xff]  }
 0x419   :  { %v2903_v28 = vpack.c.bf16 %v2902_v40, %v2902_v40  ;;  %3579 = vst [vmem:[#allocation16] sm:$0xff] %v2902_v40  ;;  %v4676_v40 = vld [vmem:[#allocation5 + $0x148] sm:$0xff]  }
 0x41b   :  { %v2911_v18 = vrot.slane %v2903_v28, %v5015_v9 }
 0x41d   :  { %v5942_v60 = vrot.slane %v2911_v18, %v5015_v9  ;;  %v2912_v6 = vcombine.high %v2911_v18, %v2911_v18  ;;  %v4677_v18 = vld [vmem:[#allocation5 + $0x140] sm:$0xff]  }
 0x41f   :  { %v3707_v50 = vpack.i.b16 %v5942_v60, %v5942_v60  ;;  %v2930_v22 = vunpack.i.h.s16 %v5942_v60  ;;  %v5969_v38 = vrot.slane %v2912_v6, %v5015_v9  ;;  %v4655_v9 = vld [vmem:[#allocation5 + $0xf0] sm:$0xff]   ;;  %v2927_v29 = vcombine.high %v5942_v60, %v5942_v60  ;;  %v4688_v6 = vld [vmem:[#allocation5 + $0x1e8] sm:$0xff]  }
 0x421   :  { %v2941_v20 = vrot.slane %v3707_v50, %v5024_v14  ;;  %v2983_v61 = vpack.i.b16 %v2930_v22, %v2930_v22  ;;  %v3708_v10 = vpack.i.b16 %v5969_v38, %v5969_v38  ;;  %v2932_v21 = vunpack.i.h.s16 %v5969_v38  ;;  %v4678_v50 = vld [vmem:[#allocation5 + $0x1b8] sm:$0xff]   ;;  %v4684_v22 = vld [vmem:[#allocation5 + $0x188] sm:$0xff]  }
 0x422   :  { %v3709_v31 = vpack.i.b16 %v2927_v29, %v2927_v29  ;;  %v2934_v62 = vunpack.i.h.s16 %v2927_v29 }
 0x423   :  { %4079 = vmatmul.mubr.bf16.vlgmr.msra.gmra.mxu0 %v2941_v20  ;;  %v2987_v53 = vrot.slane %v2983_v61, %v5024_v14  ;;  %v3033_v42 = vrot.slane %v3708_v10, %v5024_v14  ;;  %v3075_v32 = vpack.i.b16 %v2932_v21, %v2932_v21  ;;  %v4679_v20 = vld [vmem:[#allocation5 + $0x1b0] sm:$0xff]   ;;  %v4685_v61 = vld [vmem:[#allocation5 + $0x180] sm:$0xff]  }
 0x424   :  { %4083 = vmatpush3.bf16.msra.mxu0 %v4638_v17  ;;  %4098 = vmatprep.mubr.msk.bf16.mxu0 %vm6091_vm4, %v4895_v0  ;;  %v3125_v59 = vrot.slane %v3709_v31, %v5024_v14  ;;  %v3167_v28 = vpack.i.b16 %v2934_v62, %v2934_v62  ;;  %v4360_v17 = vld [vmem:[#allocation11 + $0x18] sm:$0xff]   ;;  %v4369_v62 = vld [vmem:[#allocation10 + $0x10] sm:$0xff]  }
 0x425   :  { %4084 = vmatprep.subr.bf16.mxu0 %v4895_v0  ;;  %v3079_v37 = vrot.slane %v3075_v32, %v5024_v14  ;;  %4231 = vmatpush3.bf16.msra.mxu1 %v4360_v17 }
 0x426   :  { %v3171_v60 = vrot.slane %v3167_v28, %v5024_v14  ;;  %4232 = vmatprep.subr.bf16.mxu1 %v4895_v0 }
 0x428   :  { %4085 = vmatpush3.bf16.msra.mxu0 %v4639_v54  ;;  %v4680_v54 = vld [vmem:[#allocation5 + $0x1a8] sm:$0xff]  }
 0x429   :  { %4086 = vmatprep.subr.bf16.mxu0 %v4895_v0 }
 0x42c   :  { %4087 = vmatpush3.bf16.msra.mxu0 %v4640_v45  ;;  %v4681_v45 = vld [vmem:[#allocation5 + $0x1a0] sm:$0xff]  }
 0x42d   :  { %4088 = vmatprep.subr.bf16.mxu0 %v4895_v0 }
 0x430   :  { %4089 = vmatpush3.bf16.msra.mxu0 %v4641_v43  ;;  %v4682_v43 = vld [vmem:[#allocation5 + $0x198] sm:$0xff]  }
 0x431   :  { %4090 = vmatprep.subr.bf16.mxu0 %v4895_v0 }
 0x434   :  { %4091 = vmatpush3.bf16.msra.mxu0 %v4642_v13  ;;  %v4683_v13 = vld [vmem:[#allocation5 + $0x190] sm:$0xff]  }
 0x435   :  { %4092 = vmatprep.subr.bf16.mxu0 %v4895_v0 }
 0x438   :  { %4093 = vmatpush3.bf16.msra.mxu0 %v4643_v2  ;;  %v2928_v2 = vcombine.high %v5969_v38, %v5969_v38  ;;  %v4690_v38 = vld [vmem:[#allocation5 + $0x1d8] sm:$0xff]  }
 0x439   :  { %4094 = vmatprep.subr.bf16.mxu0 %v4895_v0 }
 0x43a   :  { %v2936_v10 = vunpack.i.h.s16 %v2928_v2 }
 0x43c   :  { %4095 = vmatpush3.bf16.msra.mxu0 %v4644_v47  ;;  %v3710_v47 = vpack.i.b16 %v2928_v2, %v2928_v2 }
 0x43d   :  { %4096 = vmatprep.subr.bf16.mxu0 %v4895_v0 }
 0x440   :  { %4097 = vmatpush3.bf16.msra.mxu0 %v4645_v24  ;;  %v3217_v24 = vrot.slane %v3710_v47, %v5024_v14 }
 0x441   :  { %4102 = vmatprep.subr.bf16.mxu0 %v4895_v0 }
 0x443   :  { %4099 = vmatmul.mubr.bf16.vlgmr.msra.gmra.mxu0 %v2987_v53 }
 0x444   :  { %4103 = vmatpush3.bf16.msra.mxu0 %v4646_v35  ;;  %4118 = vmatprep.mubr.msk.bf16.mxu0 %vm6091_vm4, %v4895_v0  ;;  %v4686_v35 = vld [vmem:[#allocation5 + $0x1f8] sm:$0xff]  }
 0x445   :  { %4104 = vmatprep.subr.bf16.mxu0 %v4895_v0 }
 0x448   :  { %4105 = vmatpush3.bf16.msra.mxu0 %v4647_v16 }
 0x449   :  { %4106 = vmatprep.subr.bf16.mxu0 %v4895_v0 }
 0x44c   :  { %4107 = vmatpush3.bf16.msra.mxu0 %v4648_v56 }
 0x44d   :  { %4108 = vmatprep.subr.bf16.mxu0 %v4895_v0 }
 0x450   :  { %4109 = vmatpush3.bf16.msra.mxu0 %v4649_v46 }
 0x451   :  { %4110 = vmatprep.subr.bf16.mxu0 %v4895_v0 }
 0x454   :  { %4111 = vmatpush3.bf16.msra.mxu0 %v4650_v26  ;;  %v4361_v26 = vld [vmem:[#allocation11 + $0x10] sm:$0xff]  }
 0x455   :  { %4112 = vmatprep.subr.bf16.mxu0 %v4895_v0  ;;  %4233 = vmatpush3.bf16.msra.mxu1 %v4361_v26 }
 0x456   :  { %4234 = vmatprep.subr.bf16.mxu1 %v4895_v0 }
 0x458   :  { %4113 = vmatpush3.bf16.msra.mxu0 %v4651_v19  ;;  %v4689_v19 = vld [vmem:[#allocation5 + $0x1e0] sm:$0xff]  }
 0x459   :  { %4114 = vmatprep.subr.bf16.mxu0 %v4895_v0 }
 0x45c   :  { %4115 = vmatpush3.bf16.msra.mxu0 %v4652_v36  ;;  %v4691_v36 = vld [vmem:[#allocation5 + $0x1d0] sm:$0xff]  }
 0x45d   :  { %4116 = vmatprep.subr.bf16.mxu0 %v4895_v0 }
 0x460   :  { %4117 = vmatpush3.bf16.msra.mxu0 %v4653_v55  ;;  %v4692_v55 = vld [vmem:[#allocation5 + $0x1c8] sm:$0xff]  }
 0x461   :  { %4122 = vmatprep.subr.bf16.mxu0 %v4895_v0 }
 0x463   :  { %4119 = vmatmul.mubr.bf16.vlgmr.msra.gmra.mxu0 %v3033_v42  ;;  %v3259_v42 = vpack.i.b16 %v2936_v10, %v2936_v10 }
 0x464   :  { %4123 = vmatpush3.bf16.msra.mxu0 %v4654_v8  ;;  %4138 = vmatprep.mubr.msk.bf16.mxu0 %vm6091_vm4, %v4895_v0  ;;  %v4693_v8 = vld [vmem:[#allocation5 + $0x1c0] sm:$0xff]  }
 0x465   :  { %4124 = vmatprep.subr.bf16.mxu0 %v4895_v0 }
 0x468   :  { %4125 = vmatpush3.bf16.msra.mxu0 %v4655_v9  ;;  %v3263_v9 = vrot.slane %v3259_v42, %v5024_v14 }
 0x469   :  { %4126 = vmatprep.subr.bf16.mxu0 %v4895_v0 }
 0x46c   :  { %4127 = vmatpush3.bf16.msra.mxu0 %v4656_v44 }
 0x46d   :  { %4128 = vmatprep.subr.bf16.mxu0 %v4895_v0 }
 0x470   :  { %4129 = vmatpush3.bf16.msra.mxu0 %v4657_v4 }
 0x471   :  { %4130 = vmatprep.subr.bf16.mxu0 %v4895_v0 }
 0x474   :  { %4131 = vmatpush3.bf16.msra.mxu0 %v4658_v25 }
 0x475   :  { %4132 = vmatprep.subr.bf16.mxu0 %v4895_v0 }
 0x478   :  { %4133 = vmatpush3.bf16.msra.mxu0 %v4659_v27 }
 0x479   :  { %4134 = vmatprep.subr.bf16.mxu0 %v4895_v0 }
 0x47c   :  { %4135 = vmatpush3.bf16.msra.mxu0 %v4660_v49 }
 0x47d   :  { %4136 = vmatprep.subr.bf16.mxu0 %v4895_v0 }
 0x480   :  { %4137 = vmatpush3.bf16.msra.mxu0 %v4661_v11 }
 0x481   :  { %4142 = vmatprep.subr.bf16.mxu0 %v4895_v0 }
 0x483   :  { %4139 = vmatmul.mubr.bf16.vlgmr.msra.gmra.mxu0 %v3079_v37 }
 0x484   :  { %4143 = vmatpush3.bf16.msra.mxu0 %v4662_v58  ;;  %4158 = vmatprep.mubr.msk.bf16.mxu0 %vm6091_vm4, %v4895_v0 }
 0x485   :  { %4144 = vmatprep.subr.bf16.mxu0 %v4895_v0 }
 0x488   :  { %4145 = vmatpush3.bf16.msra.mxu0 %v4663_v39  ;;  %v4362_v39 = vld [vmem:[#allocation11 + $0x8] sm:$0xff]  }
 0x489   :  { %4146 = vmatprep.subr.bf16.mxu0 %v4895_v0  ;;  %4235 = vmatpush3.bf16.msra.mxu1 %v4362_v39 }
 0x48a   :  { %4236 = vmatprep.subr.bf16.mxu1 %v4895_v0 }
 0x48c   :  { %4147 = vmatpush3.bf16.msra.mxu0 %v4664_v51 }
 0x48d   :  { %4148 = vmatprep.subr.bf16.mxu0 %v4895_v0 }
 0x490   :  { %4149 = vmatpush3.bf16.msra.mxu0 %v4665_v3 }
 0x491   :  { %4150 = vmatprep.subr.bf16.mxu0 %v4895_v0 }
 0x494   :  { %4151 = vmatpush3.bf16.msra.mxu0 %v4666_v63 }
 0x495   :  { %4152 = vmatprep.subr.bf16.mxu0 %v4895_v0 }
 0x498   :  { %4153 = vmatpush3.bf16.msra.mxu0 %v4667_v12 }
 0x499   :  { %4154 = vmatprep.subr.bf16.mxu0 %v4895_v0 }
 0x49c   :  { %4155 = vmatpush3.bf16.msra.mxu0 %v4668_v30 }
 0x49d   :  { %4156 = vmatprep.subr.bf16.mxu0 %v4895_v0 }
 0x4a0   :  { %4157 = vmatpush3.bf16.msra.mxu0 %v4669_v7 }
 0x4a1   :  { %4162 = vmatprep.subr.bf16.mxu0 %v4895_v0 }
 0x4a3   :  { %4159 = vmatmul.mubr.bf16.vlgmr.msra.gmra.mxu0 %v3125_v59 }
 0x4a4   :  { %4163 = vmatpush3.bf16.msra.mxu0 %v4670_v1  ;;  %4178 = vmatprep.mubr.msk.bf16.mxu0 %vm6091_vm4, %v4895_v0  ;;  %v4363_v1 = vld [vmem:[#allocation11] sm:$0xff]  }
 0x4a5   :  { %4164 = vmatprep.subr.bf16.mxu0 %v4895_v0  ;;  %4237 = vmatpush3.bf16.msra.mxu1 %v4363_v1 }
 0x4a8   :  { %4165 = vmatpush3.bf16.msra.mxu0 %v4671_v48  ;;  %v4364_v48 = vld [vmem:[#allocation10 + $0x38] sm:$0xff]  }
 0x4a9   :  { %4166 = vmatprep.subr.bf16.mxu0 %v4895_v0 }
 0x4ac   :  { %4167 = vmatpush3.bf16.msra.mxu0 %v4672_v34  ;;  %v4694_v34 = vld [vmem:[#allocation2] sm:$0xf] }
 0x4ad   :  { %4168 = vmatprep.subr.bf16.mxu0 %v4895_v0  ;;  %4239 = vmatmul.mubr.bf16.vlgmr.msra.gmra.mxu1 %v4694_v34 }
 0x4b0   :  { %4169 = vmatpush3.bf16.msra.mxu0 %v4673_v5  ;;  %v4366_v5 = vld [vmem:[#allocation10 + $0x28] sm:$0xff]  }
 0x4b1   :  { %4170 = vmatprep.subr.bf16.mxu0 %v4895_v0 }
 0x4b4   :  { %4171 = vmatpush3.bf16.msra.mxu0 %v4674_v23  ;;  %v4367_v23 = vld [vmem:[#allocation10 + $0x20] sm:$0xff]  }
 0x4b5   :  { %4172 = vmatprep.subr.bf16.mxu0 %v4895_v0 }
 0x4b8   :  { %4173 = vmatpush3.bf16.msra.mxu0 %v4675_v57  ;;  %v4368_v57 = vld [vmem:[#allocation10 + $0x18] sm:$0xff]  }
 0x4b9   :  { %4174 = vmatprep.subr.bf16.mxu0 %v4895_v0 }
 0x4bc   :  { %4175 = vmatpush3.bf16.msra.mxu0 %v4676_v40 }
 0x4bd   :  { %4176 = vmatprep.subr.bf16.mxu0 %v4895_v0 }
 0x4c0   :  { %4177 = vmatpush3.bf16.msra.mxu0 %v4677_v18 }
 0x4c1   :  { %4182 = vmatprep.subr.bf16.mxu0 %v4895_v0 }
 0x4c3   :  { %4179 = vmatmul.mubr.bf16.vlgmr.msra.gmra.mxu0 %v3171_v60 }
 0x4c4   :  { %4183 = vmatpush3.bf16.msra.mxu0 %v4678_v50  ;;  %4198 = vmatprep.mubr.msk.bf16.mxu0 %vm6091_vm4, %v4895_v0  ;;  %v4370_v50 = vld [vmem:[#allocation10 + $0x8] sm:$0xff]  }
 0x4c5   :  { %4184 = vmatprep.subr.bf16.mxu0 %v4895_v0 }
 0x4c8   :  { %4185 = vmatpush3.bf16.msra.mxu0 %v4679_v20 }
 0x4c9   :  { %4186 = vmatprep.subr.bf16.mxu0 %v4895_v0 }
 0x4cc   :  { %4187 = vmatpush3.bf16.msra.mxu0 %v4680_v54 }
 0x4cd   :  { %4188 = vmatprep.subr.bf16.mxu0 %v4895_v0 }
 0x4d0   :  { %4189 = vmatpush3.bf16.msra.mxu0 %v4681_v45 }
 0x4d1   :  { %4190 = vmatprep.subr.bf16.mxu0 %v4895_v0 }
 0x4d4   :  { %4191 = vmatpush3.bf16.msra.mxu0 %v4682_v43 }
 0x4d5   :  { %4192 = vmatprep.subr.bf16.mxu0 %v4895_v0 }
 0x4d8   :  { %4193 = vmatpush3.bf16.msra.mxu0 %v4683_v13  ;;  %v4371_v13 = vld [vmem:[#allocation10] sm:$0xff]  }
 0x4d9   :  { %4194 = vmatprep.subr.bf16.mxu0 %v4895_v0 }
 0x4dc   :  { %4195 = vmatpush3.bf16.msra.mxu0 %v4684_v22 }
 0x4dd   :  { %4196 = vmatprep.subr.bf16.mxu0 %v4895_v0 }
 0x4e0   :  { %4197 = vmatpush3.bf16.msra.mxu0 %v4685_v61 }
 0x4e1   :  { %4202 = vmatprep.subr.bf16.mxu0 %v4895_v0 }
 0x4e3   :  { %4199 = vmatmul.mubr.bf16.vlgmr.msra.gmra.mxu0 %v3217_v24  ;;  %v2977_v53 = vpop.f32.mrf.mxu0 }
 0x4e4   :  { %4203 = vmatpush3.bf16.msra.mxu0 %v4686_v35  ;;  %4218 = vmatprep.mubr.msk.bf16.mxu0 %vm6091_vm4, %v4895_v0  ;;  %v3305_v52 = vpack.c.bf16 %v2977_v53, %v2977_v53 }
 0x4e5   :  { %v4080_v16 = vpop.f32.mrf.mxu0  ;;  %4204 = vmatprep.subr.bf16.mxu0 %v4895_v0 }
 0x4e6   :  { %v3441_v11 = vunpack.c.l.b16 %v3305_v52 }
 0x4e7   :  { %v2980_v56 = vpop.f32.mrf.mxu0 }
 0x4e8   :  { %4205 = vmatpush3.bf16.msra.mxu0 %v4687_v15 }
 0x4e9   :  { %v4081_v46 = vpop.f32.mrf.mxu0  ;;  %4206 = vmatprep.subr.bf16.mxu0 %v4895_v0 }
 0x4ec   :  { %4207 = vmatpush3.bf16.msra.mxu0 %v4688_v6 }
 0x4ed   :  { %4208 = vmatprep.subr.bf16.mxu0 %v4895_v0 }
 0x4f0   :  { %4209 = vmatpush3.bf16.msra.mxu0 %v4689_v19 }
 0x4f1   :  { %4210 = vmatprep.subr.bf16.mxu0 %v4895_v0 }
 0x4f4   :  { %4211 = vmatpush3.bf16.msra.mxu0 %v4690_v38 }
 0x4f5   :  { %4212 = vmatprep.subr.bf16.mxu0 %v4895_v0 }
 0x4f8   :  { %4213 = vmatpush3.bf16.msra.mxu0 %v4691_v36 }
 0x4f9   :  { %4214 = vmatprep.subr.bf16.mxu0 %v4895_v0 }
 0x4fc   :  { %4215 = vmatpush3.bf16.msra.mxu0 %v4692_v55 }
 0x4fd   :  { %4216 = vmatprep.subr.bf16.mxu0 %v4895_v0 }
 0x500   :  { %4217 = vmatpush3.bf16.msra.mxu0 %v4693_v8 }
 0x501   :  { %4242 = vmatprep.subr.bf16.mxu0 %v4895_v0 }
 0x503   :  { %v3023_v44 = vpop.f32.mrf.mxu0  ;;  %4219 = vmatmul.mubr.bf16.vlgmr.msra.gmra.mxu0 %v3263_v9 }
 0x504   :  { %v3306_v4 = vpack.c.bf16 %v3023_v44, %v3023_v44  ;;  %v3563_v25 = vrot.slane %v3023_v44, 7  ;;  %4258 = vmatprep.mubr.msk.bf16.mxu0 %vm6091_vm4, %v4895_v0  ;;  %4243 = vmatpush3.bf16.msra.mxu0 %v4364_v48 }
 0x505   :  { %v4100_v27 = vpop.f32.mrf.mxu0  ;;  %4244 = vmatprep.subr.bf16.mxu0 %v4895_v0 }
 0x506   :  { %v3442_v21 = vunpack.c.l.b16 %v3306_v4  ;;  %v3564_v49 = vsel %vm6092_vm5, %v3563_v25, %v2977_v53 }
 0x507   :  { %v3026_v32 = vpop.f32.mrf.mxu0 }
 0x508   :  { %v3449_v37 = vrot.slane %v3442_v21, 7  ;;  %4245 = vmatpush3.bf16.msra.mxu0 %v4365_v41 }
 0x509   :  { %v4101_v58 = vpop.f32.mrf.mxu0  ;;  %4246 = vmatprep.subr.bf16.mxu0 %v4895_v0 }
 0x50a   :  { %v3450_v14 = vsel %vm6093_vm6, %v3449_v37, %v3441_v11 }
 0x50c   :  { %4247 = vmatpush3.bf16.msra.mxu0 %v4366_v5 }
 0x50d   :  { %4248 = vmatprep.subr.bf16.mxu0 %v4895_v0 }
 0x510   :  { %4249 = vmatpush3.bf16.msra.mxu0 %v4367_v23 }
 0x511   :  { %4250 = vmatprep.subr.bf16.mxu0 %v4895_v0 }
 0x514   :  { %4251 = vmatpush3.bf16.msra.mxu0 %v4368_v57 }
 0x515   :  { %4252 = vmatprep.subr.bf16.mxu0 %v4895_v0 }
 0x518   :  { %4253 = vmatpush3.bf16.msra.mxu0 %v4369_v62 }
 0x519   :  { %4254 = vmatprep.subr.bf16.mxu0 %v4895_v0 }
 0x51c   :  { %4255 = vmatpush3.bf16.msra.mxu0 %v4370_v50 }
 0x51d   :  { %4256 = vmatprep.subr.bf16.mxu0 %v4895_v0 }
 0x520   :  { %4257 = vmatpush3.bf16.msra.mxu0 %v4371_v13 }
 0x523   :  { %v3069_v33 = vpop.f32.mrf.mxu0 }
 0x524   :  { %v3307_v51 = vpack.c.bf16 %v3069_v33, %v3069_v33  ;;  %v3565_v3 = vrot.slane %v3069_v33, 6 }
 0x525   :  { %v4120_v63 = vpop.f32.mrf.mxu0 }
 0x526   :  { %v3443_v12 = vunpack.c.l.b16 %v3307_v51  ;;  %v3566_v29 = vsel %vm6094_vm7, %v3565_v3, %v3564_v49 }
 0x527   :  { %v3072_v30 = vpop.f32.mrf.mxu0 }
 0x528   :  { %v3451_v31 = vrot.slane %v3443_v12, 6 }
 0x529   :  { %v4121_v7 = vpop.f32.mrf.mxu0 }
 0x52a   :  { %v3452_v59 = vsel %vm6095_vm8, %v3451_v31, %v3450_v14 }
 0x543   :  { %v3115_v40 = vpop.f32.mrf.mxu0 }
 0x544   :  { %v3308_v28 = vpack.c.bf16 %v3115_v40, %v3115_v40  ;;  %v3567_v18 = vrot.slane %v3115_v40, 5 }
 0x545   :  { %v4140_v60 = vpop.f32.mrf.mxu0 }
 0x546   :  { %v3444_v20 = vunpack.c.l.b16 %v3308_v28  ;;  %v3568_v17 = vsel %vm6096_vm9, %v3567_v18, %v3566_v29 }
 0x547   :  { %v3118_v54 = vpop.f32.mrf.mxu0 }
 0x548   :  { %v3453_v45 = vrot.slane %v3444_v20, 5 }
 0x549   :  { %v4141_v43 = vpop.f32.mrf.mxu0 }
 0x54a   :  { %v3454_v2 = vsel %vm6097_vm10, %v3453_v45, %v3452_v59 }
 0x563   :  { %v3161_v22 = vpop.f32.mrf.mxu0 }
 0x564   :  { %v3309_v47 = vpack.c.bf16 %v3161_v22, %v3161_v22  ;;  %v3569_v61 = vrot.slane %v3161_v22, 4 }
 0x565   :  { %v4160_v24 = vpop.f32.mrf.mxu0 }
 0x566   :  { %v3445_v53 = vunpack.c.l.b16 %v3309_v47  ;;  %v3570_v35 = vsel %vm6098_vm11, %v3569_v61, %v3568_v17 }
 0x567   :  { %v3164_v16 = vpop.f32.mrf.mxu0 }
 0x568   :  { %v3455_v56 = vrot.slane %v3445_v53, 4 }
 0x569   :  { %v4161_v15 = vpop.f32.mrf.mxu0 }
 0x56a   :  { %v3456_v46 = vsel %vm6099_vm12, %v3455_v56, %v3454_v2 }
 0x56d   :  { %v3427_v31 = vpop.f32.mrf.mxu1 }
 0x56f   :  { %v4240_v7 = vpop.f32.mrf.mxu1 }
 0x571   :  { %v3430_v59 = vpop.f32.mrf.mxu1 }
 0x573   :  { %v4241_v1 = vpop.f32.mrf.mxu1 }
 0x583   :  { %v3207_v26 = vpop.f32.mrf.mxu0 }
 0x584   :  { %v3310_v42 = vpack.c.bf16 %v3207_v26, %v3207_v26  ;;  %v3571_v44 = vrot.slane %v3207_v26, 3 }
 0x585   :  { %v4180_v6 = vpop.f32.mrf.mxu0 }
 0x586   :  { %v3446_v9 = vunpack.c.l.b16 %v3310_v42  ;;  %v3572_v21 = vsel %vm2886_vm0, %v3571_v44, %v3570_v35 }
 0x587   :  { %v3210_v0 = vpop.f32.mrf.mxu0 }
 0x588   :  { %v3457_v27 = vrot.slane %v3446_v9, 3 }
 0x589   :  { %v4181_v19 = vpop.f32.mrf.mxu0 }
 0x58a   :  { %v3458_v51 = vsel %vm2886_vm0, %v3457_v27, %v3456_v46 }
 0x5a3   :  { %v3253_v38 = vpop.f32.mrf.mxu0 }
 0x5a4   :  { %v3311_v8 = vpack.c.bf16 %v3253_v38, %v3253_v38  ;;  %v3573_v4 = vrot.slane %v3253_v38, 2 }
 0x5a5   :  { %v4200_v36 = vpop.f32.mrf.mxu0 }
 0x5a6   :  { %v3447_v52 = vunpack.c.l.b16 %v3311_v8  ;;  %v3574_v58 = vsel %vm2888_vm1, %v3573_v4, %v3572_v21 }
 0x5a7   :  { %v3256_v10 = vpop.f32.mrf.mxu0 }
 0x5a8   :  { %v3459_v11 = vrot.slane %v3447_v52, 2 }
 0x5a9   :  { %v4201_v55 = vpop.f32.mrf.mxu0 }
 0x5aa   :  { %v3460_v63 = vsel %vm2888_vm1, %v3459_v11, %v3458_v51 }
 0x5c3   :  { %v3299_v25 = vpop.f32.mrf.mxu0 }
 0x5c4   :  { %v3312_v49 = vpack.c.bf16 %v3299_v25, %v3299_v25  ;;  %v3575_v32 = vrot.slane %v3299_v25, 1 }
 0x5c5   :  { %v4220_v37 = vpop.f32.mrf.mxu0 }
 0x5c6   :  { %v3448_v14 = vunpack.c.l.b16 %v3312_v49  ;;  %v3576_v39 = vsel %vm2890_vm2, %v3575_v32, %v3574_v58 }
 0x5c7   :  { %v3302_v33 = vpop.f32.mrf.mxu0  ;;  %3578 = vst [vmem:[#allocation14] sm:$0xff] %v3576_v39 }
 0x5c8   :  { %v3461_v3 = vrot.slane %v3448_v14, 1 }
 0x5c9   :  { %v4221_v12 = vpop.f32.mrf.mxu0 }
 0x5ca   :  { %v3462_v29 = vsel %vm2890_vm2, %v3461_v3, %v3460_v63 }
 0x5cb   :  { %v3463_v30 = vpack.c.b16 %v3462_v29, %v3462_v29 }
 0x5cd   :  { %4259 = vmatmul.mubr.bf16.vlgmr.msra.gmra.mxu0 %v3463_v30 }
 0x5ce   :  { %4826 = shalt.err (!%p4823_p6)
}
 0x5cf   :  { %3599 = dma.vmem_to_hbm [thread:$0]  %s3597_s29, 128, %s6083_s9, [#allocation15]  }
 0x5d0   :  { %s4899_s13 = smov [#allocation16]  }
 0x5d1   :  { %s3606_s3 = sshll.u32 %s4899_s13, 4  ;;  %s3607_s3 = int_to_ptr.vmem [resolvable:$true] %s3606_s3 }
 0x5d2   :  { %s4835_s14 = scalar_lea.vmem %s3607_s3, 128  ;;  %p4840_p8 = scmp.lt.s32.totalorder %s3607_s3, %s3607_s3 }
 0x5d3   :  { %p4836_p7 = scmp.ne.s32.totalorder %s3607_s3, %s4835_s14  ;;  %p4841_p9 = scmp.lt.s32.totalorder %s4835_s14, %s4835_s14 }
 0x5d5   :  { %p4842_p10 = por %p4841_p9, %p4840_p8 }
 0x5d7   :  { %p4843_p11 = pnand %p4842_p10, %p4836_p7 }
 0x5d9   :  { %4846 = shalt.err (!%p4843_p11)
}
 0x5da   :  { %3609 = dma.vmem_to_hbm [thread:$0]  %s3607_s3, 128, %s6084_s10, [#allocation15]  }
 0x5db   :  { %s4900_s9 = smov [#allocation13]  }
 0x5dc   :  { %s3586_s18 = sshll.u32 %s4900_s9, 4  ;;  %s3587_s18 = int_to_ptr.vmem [resolvable:$true] %s3586_s18 }
 0x5dd   :  { %s4855_s19 = scalar_lea.vmem %s3587_s18, 128  ;;  %p4860_p13 = scmp.lt.s32.totalorder %s3587_s18, %s3587_s18 }
 0x5de   :  { %p4856_p12 = scmp.ne.s32.totalorder %s3587_s18, %s4855_s19  ;;  %p4861_p0 = scmp.lt.s32.totalorder %s4855_s19, %s4855_s19 }
 0x5e0   :  { %p4862_p1 = por %p4861_p0, %p4860_p13 }
 0x5e2   :  { %p4863_p2 = pnand %p4862_p1, %p4856_p12 }
 0x68d   :  { %v3547_v48 = vpop.f32.mrf.mxu0 }
 0x68e   :  { %v3548_v41 = vadd.f32 %v3547_v48, %v3427_v31 }
 0x68f   :  { %v4260_v34 = vpop.f32.mrf.mxu0 }
 0x690   :  { %4632 = vtanh.f32 %v3548_v41 }
 0x691   :  { %v3550_v5 = vpop.f32.mrf.mxu0 }
 0x693   :  { %v4261_v23 = vpop.f32.mrf.mxu0 }
 0x69d   :  { %v4633_v57 = vpop.eup %4632 }
 0x69e   :  { %3554 = vst [vmem:[#allocation13] sm:$0xff] %v4633_v57 }
 0x69f   :  { %4866 = shalt.err (!%p4863_p2)
}
 0x6a0   :  { %3589 = dma.vmem_to_hbm [thread:$0]  %s3587_s18, 128, %s6082_s8, [#allocation4]  }
 0x6a1   :  { %4883 = dma.done.wait [#allocation4], 128  }
 0x6a2   :  { %4884 = vsyncadd [#allocation4], 4294967168 }
 0x6a3   :  { %4885 = dma.done.wait [#allocation15], 256  }
 0x6a4   :  { %4886 = vsyncadd [#allocation15], 4294967040 }
 0x6a5   :  { %3619 = vsyncpa [#allocation3], 1 }
 0x6a6   :  { %3620 = vsyncpa [#allocation6], 1 }
 0x6a7   :  { %3621 = vsyncpa [#allocation9], 1 }
 0x6a8   :  { %3622 = vsyncpa [#allocation12], 1 }
 0x6a9   :  { %3623 = vsyncpa [#allocation4], 1 }
 0x6aa   :  { %3624 = vsyncpa [#allocation15], 1 }

</bundles_post_ra>
